<compile_context>
chip_gen: v7x
topology: tpu7x:2x2x1
jax: 0.10.0
libtpu: 0.0.40
codegen_flags: <defaults>
</compile_context>

<pallas_src>
import math
from functools import partial

import jax
import jax.numpy as jnp
from jax import lax
from jax.experimental import pallas as pl
from jax.experimental.pallas import tpu as pltpu

LANE = 128


# ----------------------------------------------------------------------------
# small helpers
# ----------------------------------------------------------------------------
def _round_up(x, m):
    return ((x + m - 1) // m) * m


def _pick_tile(size, candidates):
    for c in candidates:
        if c <= size and size % c == 0:
            return c
    return size


def _pad_last2(x, d1, d2, value=0.0):
    """Zero-pad the last two dims of a 3-D array up to (d1, d2)."""
    return jnp.pad(x, ((0, 0), (0, d1 - x.shape[1]), (0, d2 - x.shape[2])),
                   constant_values=value)


def _pad_vec(v, d, value=0.0):
    return jnp.pad(v, ((0, d - v.shape[0]),), constant_values=value)


def bn_fold(c, c_pad, eps=1e-5):
    """Eval-mode SynchronizedBatchNorm2d (gamma=1, beta=0, mean=0, var=1)."""
    scale = jnp.full((c,), 1.0 / math.sqrt(1.0 + eps), jnp.float32)
    return _pad_vec(scale, c_pad, 1.0), jnp.zeros((c_pad,), jnp.float32)


# ----------------------------------------------------------------------------
# Pallas kernels
# ----------------------------------------------------------------------------
def _mm_kernel(a_ref, b_ref, scale_ref, bias_ref, o_ref, acc_ref, *, relu):
    @pl.when(pl.program_id(3) == 0)
    def _init():
        acc_ref[...] = jnp.zeros_like(acc_ref)

    acc_ref[...] += jnp.dot(a_ref[0], b_ref[0],
                            preferred_element_type=jnp.float32)

    @pl.when(pl.program_id(3) == pl.num_programs(3) - 1)
    def _finalize():
        out = acc_ref[...] * scale_ref[...] + bias_ref[...]
        if relu:
            out = jnp.maximum(out, 0.0)
        o_ref[0] = out


def _mm_res_kernel(a_ref, b_ref, scale_ref, bias_ref, res_ref, o_ref, acc_ref,
                   *, relu):
    @pl.when(pl.program_id(3) == 0)
    def _init():
        acc_ref[...] = jnp.zeros_like(acc_ref)

    acc_ref[...] += jnp.dot(a_ref[0], b_ref[0],
                            preferred_element_type=jnp.float32)

    @pl.when(pl.program_id(3) == pl.num_programs(3) - 1)
    def _finalize():
        out = acc_ref[...] * scale_ref[...] + bias_ref[...] + res_ref[0]
        if relu:
            out = jnp.maximum(out, 0.0)
        o_ref[0] = out


def _conv3x3_kernel(x0_ref, x1_ref, x2_ref, w_ref, scale_ref, bias_ref, o_ref,
                    *, relu):
    """One output row per step: 9 shifted (1x1) matmuls accumulated in f32."""
    width, tco = o_ref.shape
    rows = (x0_ref[...], x1_ref[...], x2_ref[...])      # each (W+2, Cin) bf16
    acc = jnp.zeros((width, tco), jnp.float32)
    for dh in range(3):
        row = rows[dh]
        for dj in range(3):
            acc += jnp.dot(row[dj:dj + width, :], w_ref[3 * dh + dj],
                           preferred_element_type=jnp.float32)
    acc = acc * scale_ref[...] + bias_ref[...]
    if relu:
        acc = jnp.maximum(acc, 0.0)
    o_ref[...] = acc


def _ema_kernel(x_ref, mu0_ref, y_ref, mu_out_ref,
                mu_ref, mu_prev_ref, num_ref, den_ref,
                *, stages, k_real, n_real, tile, mask_rows):
    """Grid = (batch, stage, HW-tile). mu / numerator / denominator are carried
    in VMEM scratch across the (stage, tile) axes; the last stage index runs the
    reconstruction + ReLU and writes y and the final mu."""
    s = pl.program_id(1)
    t = pl.program_id(2)
    nt = pl.num_programs(2)
    kp = mu_ref.shape[1]

    @pl.when(jnp.logical_and(s == 0, t == 0))
    def _init_mu():
        mu_ref[...] = mu0_ref[0]

    x = x_ref[0]                                        # (tile, Cp) f32

    if k_real < kp:                                     # mask padded bases
        kcol = lax.broadcasted_iota(jnp.int32, (1, kp), 1)
        kbias = jnp.where(kcol < k_real, 0.0, -1e30).astype(jnp.float32)
    else:
        kbias = None

    def softmax_z(mu_mat):
        z = jnp.dot(x, mu_mat, preferred_element_type=jnp.float32)
        if kbias is not None:
            z = z + kbias
        z = jnp.exp(z - jnp.max(z, axis=-1, keepdims=True))
        return z * pl.reciprocal(jnp.sum(z, axis=-1, keepdims=True), approx=True)

    is_em = s < stages

    @pl.when(jnp.logical_and(is_em, t == 0))
    def _init_acc():
        num_ref[...] = jnp.zeros_like(num_ref)
        den_ref[...] = jnp.zeros_like(den_ref)

    @pl.when(is_em)
    def _em_step():
        z = softmax_z(mu_ref[...])
        if mask_rows:                                   # padded H*W rows -> 0
            rid = lax.broadcasted_iota(jnp.int32, (tile, 1), 0) + t * tile
            z = jnp.where(rid < n_real, z, 0.0)
        den_ref[...] += jnp.sum(z, axis=0, keepdims=True)
        num_ref[...] += lax.dot_general(x, z, (((0,), (0,)), ((), ())),
                                        preferred_element_type=jnp.float32)

        @pl.when(t == nt - 1)
        def _finish_stage():
            @pl.when(s == stages - 1)
            def _save_prev():
                mu_prev_ref[...] = mu_ref[...]
            mu_new = num_ref[...] * pl.reciprocal(1e-6 + den_ref[...],
                                                  approx=True)
            nrm = jnp.sqrt(jnp.sum(mu_new * mu_new, axis=0, keepdims=True))
            mu_ref[...] = mu_new * pl.reciprocal(1e-6 + nrm, approx=True)

    @pl.when(jnp.logical_not(is_em))
    def _reconstruct():
        z = softmax_z(mu_prev_ref[...])
        y = lax.dot_general(z, mu_ref[...], (((1,), (1,)), ((), ())),
                            preferred_element_type=jnp.float32)
        y_ref[0] = jnp.maximum(y, 0.0)
        mu_out_ref[0] = mu_ref[...]


# ----------------------------------------------------------------------------
# pallas_call wrappers
# ----------------------------------------------------------------------------
def matmul_affine(a, b, scale, bias, *, relu=False, residual=None):
    """out[g] = act(a[ga] @ b[gb] * scale + bias (+ residual[g])).

    a: (Na, M, K), b: (Nb, K, C) with Na, Nb in {1, G}.  MXU operands are cast
    to bf16 (f32 accumulation); scale/bias/residual/output stay f32.  M is
    padded to a multiple of 8 and K/C to multiples of 128 (lane-dense outputs,
    full MXU width); padding is sliced off before returning.
    """
    Na, M, K = a.shape
    Nb, Kb, C = b.shape
    assert Kb == K
    G = max(Na, Nb)
    assert Na in (1, G) and Nb in (1, G)
    assert scale.shape == (C,) and bias.shape == (C,)

    Mp, Kp, Cp = _round_up(M, 8), _round_up(K, LANE), _round_up(C, LANE)
    tm = _pick_tile(Mp, (256, 128, 64, 32, 16, 8))
    tk = _pick_tile(Kp, (512, 256, 128))
    tn = _pick_tile(Cp, (256, 128))

    a_p = _pad_last2(a, Mp, Kp).astype(jnp.bfloat16)
    b_p = _pad_last2(b, Kp, Cp).astype(jnp.bfloat16)
    scale_p = _pad_vec(scale.astype(jnp.float32), Cp, 1.0).reshape(1, Cp)
    bias_p = _pad_vec(bias.astype(jnp.float32), Cp, 0.0).reshape(1, Cp)

    a_idx = ((lambda g, i, j, k: (g, i, k)) if Na == G else
             (lambda g, i, j, k: (0, i, k)))
    b_idx = ((lambda g, i, j, k: (g, k, j)) if Nb == G else
             (lambda g, i, j, k: (0, k, j)))

    in_specs = [pl.BlockSpec((1, tm, tk), a_idx),
                pl.BlockSpec((1, tk, tn), b_idx),
                pl.BlockSpec((1, tn), lambda g, i, j, k: (0, j)),
                pl.BlockSpec((1, tn), lambda g, i, j, k: (0, j))]
    args = [a_p, b_p, scale_p, bias_p]
    bytes_accessed = a_p.size * 2 + b_p.size * 2 + G * Mp * Cp * 4
    if residual is not None:
        assert residual.shape == (G, M, C)
        res_p = _pad_last2(residual.astype(jnp.float32), Mp, Cp)
        in_specs.append(pl.BlockSpec((1, tm, tn), lambda g, i, j, k: (g, i, j)))
        args.append(res_p)
        bytes_accessed += res_p.size * 4
        kernel = partial(_mm_res_kernel, relu=relu)
    else:
        kernel = partial(_mm_kernel, relu=relu)

    out = pl.pallas_call(
        kernel,
        out_shape=jax.ShapeDtypeStruct((G, Mp, Cp), jnp.float32),
        grid=(G, Mp // tm, Cp // tn, Kp // tk),
        in_specs=in_specs,
        out_specs=pl.BlockSpec((1, tm, tn), lambda g, i, j, k: (g, i, j)),
        scratch_shapes=[pltpu.VMEM((tm, tn), jnp.float32)],
        compiler_params=pltpu.CompilerParams(
            dimension_semantics=("parallel", "parallel", "parallel",
                                 "arbitrary")),
        cost_estimate=pl.CostEstimate(flops=int(2 * G * Mp * Kp * Cp),
                                      transcendentals=0,
                                      bytes_accessed=int(bytes_accessed)),
    )(*args)
    return out[:, :M, :C]


def conv3x3_bn_act(x, w9, scale, bias, *, relu=True):
    """3x3 / stride 1 / pad 1 conv fused with affine (folded BN) + ReLU.

    x: (N, H, W, Cin) NHWC (Cin a multiple of 128); w9: (9, Cin, Cout) with
    tap index 3*dh + dj (channel dims pre-padded).  No HBM im2col: the kernel
    reads three shifted padded rows and accumulates 9 shifted matmuls.
    """
    N, H, W, Cin = x.shape
    Cout = w9.shape[2]
    Wp = W + 2
    tco = _pick_tile(Cout, (256, 128))
    xp = jnp.pad(x, ((0, 0), (1, 1), (1, 1), (0, 0))).astype(jnp.bfloat16)
    w9b = w9.astype(jnp.bfloat16)
    scale2 = scale.reshape(1, Cout).astype(jnp.float32)
    bias2 = bias.reshape(1, Cout).astype(jnp.float32)

    def x_spec(dh):
        return pl.BlockSpec((None, None, Wp, Cin),
                            lambda n, h, j, dh=dh: (n, h + dh, 0, 0))

    bytes_accessed = 3 * xp.size * 2 + w9b.size * 2 + N * H * W * Cout * 4
    return pl.pallas_call(
        partial(_conv3x3_kernel, relu=relu),
        out_shape=jax.ShapeDtypeStruct((N, H, W, Cout), jnp.float32),
        grid=(N, H, Cout // tco),
        in_specs=[x_spec(0), x_spec(1), x_spec(2),
                  pl.BlockSpec((9, Cin, tco), lambda n, h, j: (0, 0, j)),
                  pl.BlockSpec((1, tco), lambda n, h, j: (0, j)),
                  pl.BlockSpec((1, tco), lambda n, h, j: (0, j))],
        out_specs=pl.BlockSpec((None, None, W, tco),
                               lambda n, h, j: (n, h, 0, j)),
        compiler_params=pltpu.CompilerParams(
            dimension_semantics=("parallel", "parallel", "parallel")),
        cost_estimate=pl.CostEstimate(flops=int(2 * N * H * W * 9 * Cin * Cout),
                                      transcendentals=0,
                                      bytes_accessed=int(bytes_accessed)),
    )(xp, xp, xp, w9b, scale2, bias2)


def ema_attention(x, mu0, *, stage_num, k_real):
    """EMAU EM iterations + reconstruction, tiled over the H*W axis.

    x: (N, HW, Cp) f32 (padded channels zero), mu0: (1, Cp, Kp) zero-padded
    beyond the real (C, K).  Returns y (N, HW, Cp) post-ReLU and mu (N, Cp, Kp).
    Note: y blocks are only written during the final (reconstruction) stage
    index; earlier visits leave the block untouched, and the last visit per
    block always carries the real data, so the HBM result is correct.
    """
    N, HW, Cp = x.shape
    Kp = mu0.shape[2]
    HWp = _round_up(HW, 8)
    tile = _pick_tile(HWp, (1024, 512, 256, 128, 64, 32, 16, 8))
    if HWp != HW:
        x = jnp.pad(x, ((0, 0), (0, HWp - HW), (0, 0)))
    T = HWp // tile

    kernel = partial(_ema_kernel, stages=stage_num, k_real=k_real, n_real=HW,
                     tile=tile, mask_rows=(HWp != HW))
    y, mu = pl.pallas_call(
        kernel,
        out_shape=(jax.ShapeDtypeStruct((N, HWp, Cp), jnp.float32),
                   jax.ShapeDtypeStruct((N, Cp, Kp), jnp.float32)),
        grid=(N, stage_num + 1, T),
        in_specs=[pl.BlockSpec((1, tile, Cp), lambda n, s, t: (n, t, 0)),
                  pl.BlockSpec((1, Cp, Kp), lambda n, s, t: (0, 0, 0))],
        out_specs=(pl.BlockSpec((1, tile, Cp), lambda n, s, t: (n, t, 0)),
                   pl.BlockSpec((1, Cp, Kp), lambda n, s, t: (n, 0, 0))),
        scratch_shapes=[pltpu.VMEM((Cp, Kp), jnp.float32),   # mu (current)
                        pltpu.VMEM((Cp, Kp), jnp.float32),   # mu at last stage
                        pltpu.VMEM((Cp, Kp), jnp.float32),   # numerator acc
                        pltpu.VMEM((1, Kp), jnp.float32)],   # denominator acc
        compiler_params=pltpu.CompilerParams(
            dimension_semantics=("parallel", "arbitrary", "arbitrary")),
        cost_estimate=pl.CostEstimate(
            flops=int(4 * N * (stage_num + 1) * HWp * Cp * Kp),
            transcendentals=int(N * (stage_num + 1) * HWp * Kp),
            bytes_accessed=int(4 * (x.size + N * HWp * Cp + mu0.size))),
    )(x, mu0)
    return y[:, :HW, :], mu


# ----------------------------------------------------------------------------
# Plain-JAX glue (layout plumbing only)
# ----------------------------------------------------------------------------
def im2col(x, kh, kw, stride, pad):
    """x: (N, C, H, W) -> (N, Ho*Wo, C*kh*kw), matching torch weight flatten.
    Only used for the tiny strided backbone stand-in."""
    N, C, H, W = x.shape
    xp = jnp.pad(x, ((0, 0), (0, 0), (pad, pad), (pad, pad)))
    Ho = (H + 2 * pad - kh) // stride + 1
    Wo = (W + 2 * pad - kw) // stride + 1
    patches = []
    for i in range(kh):
        for j in range(kw):
            patches.append(xp[:, :, i:i + stride * Ho:stride,
                              j:j + stride * Wo:stride])
    cols = jnp.stack(patches, axis=2)                     # (N, C, kh*kw, Ho, Wo)
    cols = cols.transpose(0, 3, 4, 1, 2).reshape(N, Ho * Wo, C * kh * kw)
    return cols, Ho, Wo


def interp_matrix(out_size, in_size):
    """Row-stochastic bilinear (align_corners=True) interpolation matrix."""
    if in_size == 1:
        return jnp.ones((out_size, 1), jnp.float32)
    src = jnp.arange(out_size, dtype=jnp.float32) * (in_size - 1) / (out_size - 1)
    lo = jnp.clip(jnp.floor(src).astype(jnp.int32), 0, in_size - 2)
    frac = src - lo.astype(jnp.float32)
    return (jax.nn.one_hot(lo, in_size) * (1.0 - frac)[:, None]
            + jax.nn.one_hot(lo + 1, in_size) * frac[:, None]).astype(jnp.float32)


def bilinear_upsample(x, Hout, Wout):
    """Separable align_corners=True bilinear upsample of NHWC x (lane dim = C)."""
    N, Hf, Wf, C = x.shape
    ones_c = jnp.ones((C,), jnp.float32)
    zeros_c = jnp.zeros((C,), jnp.float32)
    # 1) upsample W:  out1[n, h] = Mw @ x[n, h]
    Mw = interp_matrix(Wout, Wf)
    out1 = matmul_affine(Mw[None], x.reshape(N * Hf, Wf, C), ones_c, zeros_c)
    out1 = out1.reshape(N, Hf, Wout, C)
    # 2) upsample H:  out2[n] = Mh @ out1[n]  (flattened over W*C)
    Mh = interp_matrix(Hout, Hf)
    d = Wout * C
    out2 = matmul_affine(Mh[None], out1.reshape(N, Hf, d),
                         jnp.ones((d,), jnp.float32),
                         jnp.zeros((d,), jnp.float32))
    return out2.reshape(N, Hout, Wout, C)


# ----------------------------------------------------------------------------
# EMANet (scaled-down, inference path)
# ----------------------------------------------------------------------------
class EMANetPallas:
    def __init__(self, band, n_classes, *, c_backbone=64, c_fc0=32, k_bases=16,
                 c_fc1=16, stage_num=3, seed=0):
        self.stage_num = stage_num
        self.n_classes = n_classes
        self.c_fc0 = c_fc0
        self.k_bases = k_bases

        cb_p = _round_up(c_backbone, LANE)
        c0_p = _round_up(c_fc0, LANE)
        c1_p = _round_up(c_fc1, LANE)
        k_p = _round_up(k_bases, LANE)
        ncls_p = _round_up(n_classes, LANE)

        key = jax.random.PRNGKey(seed)
        ks = jax.random.split(key, 8)

        def conv_w(k, cout, cin, kh, kw):
            n = kh * kw * cout
            return (jax.random.normal(k, (cout, cin, kh, kw), jnp.float32)
                    * math.sqrt(2.0 / n))

        def to_taps(w, cin_p, cout_p):
            # torch (Cout, Cin, 3, 3) -> (9, Cin_p, Cout_p), tap = 3*dh + dj
            cout, cin = w.shape[:2]
            w9 = w.transpose(2, 3, 1, 0).reshape(9, cin, cout)
            return jnp.pad(w9, ((0, 0), (0, cin_p - cin), (0, cout_p - cout)))

        def to_mat(w, cin_p, cout_p):
            # torch 1x1 (Cout, Cin, 1, 1) -> (Cin_p, Cout_p)
            cout, cin = w.shape[:2]
            m = w.reshape(cout, cin).T
            return jnp.pad(m, ((0, cin_p - cin), (0, cout_p - cout)))

        # Backbone stand-in (TODO(synk): replaces the external ResNet101).
        w_bb = conv_w(ks[0], c_backbone, band, 3, 3)
        self.w_backbone = jnp.pad(w_bb.reshape(c_backbone, band * 9).T,
                                  ((0, 0), (0, cb_p - c_backbone)))
        self.bn_backbone = bn_fold(c_backbone, cb_p)
        # fc0: ConvBNReLU(c_backbone, c_fc0, 3, 1, 1, 1)
        self.w_fc0 = to_taps(conv_w(ks[1], c_fc0, c_backbone, 3, 3), cb_p, c0_p)
        self.bn_fc0 = bn_fold(c_fc0, c0_p)
        # EMAU(c_fc0, k_bases, stage_num)
        mu = (jax.random.normal(ks[2], (1, c_fc0, k_bases), jnp.float32)
              * math.sqrt(2.0 / k_bases))
        mu = mu / (1e-6 + jnp.linalg.norm(mu, axis=1, keepdims=True))
        self.mu0 = jnp.pad(mu, ((0, 0), (0, c0_p - c_fc0), (0, k_p - k_bases)))
        self.w_ema_conv1 = to_mat(conv_w(ks[3], c_fc0, c_fc0, 1, 1), c0_p, c0_p)
        self.b_ema_conv1 = jnp.zeros((c0_p,), jnp.float32)   # deterministic zero
        self.w_ema_conv2 = to_mat(conv_w(ks[4], c_fc0, c_fc0, 1, 1), c0_p, c0_p)
        self.bn_ema_conv2 = bn_fold(c_fc0, c0_p)
        self.ones_c0 = jnp.ones((c0_p,), jnp.float32)
        # fc1: ConvBNReLU(c_fc0, c_fc1, 3, 1, 1, 1) + Dropout2d (identity @ eval)
        self.w_fc1 = to_taps(conv_w(ks[5], c_fc1, c_fc0, 3, 3), c0_p, c1_p)
        self.bn_fc1 = bn_fold(c_fc1, c1_p)
        # fc2: Conv2d(c_fc1, n_classes, 1) with bias
        self.w_fc2 = to_mat(conv_w(ks[6], n_classes, c_fc1, 1, 1), c1_p, ncls_p)
        self.b_fc2 = jnp.zeros((ncls_p,), jnp.float32)
        self.scale_fc2 = jnp.ones((ncls_p,), jnp.float32)

    def emau(self, x):
        """x: (N, H, W, c0_p) NHWC -> (out NHWC, mu (N, c_fc0, k_bases))."""
        N, H, W, C = x.shape
        x_flat = x.reshape(N, H * W, C)                     # idn (residual)
        # conv1 (1x1 with bias)
        h1 = matmul_affine(x_flat, self.w_ema_conv1[None], self.ones_c0,
                           self.b_ema_conv1, relu=False)
        # EM iterations + reconstruction + ReLU
        y, mu = ema_attention(h1, self.mu0, stage_num=self.stage_num,
                              k_real=self.k_bases)
        # conv2 (1x1, no bias) + BN + residual + ReLU
        s2, b2 = self.bn_ema_conv2
        out = matmul_affine(y, self.w_ema_conv2[None], s2, b2,
                            relu=True, residual=x_flat)
        out = out.reshape(N, H, W, C)
        return out, mu[:, :self.c_fc0, :self.k_bases]

    def __call__(self, img):
        N, _, Himg, Wimg = img.shape
        # Backbone stand-in: strided 3x3 Conv-BN-ReLU (output stride 8).
        cols, Ho, Wo = im2col(img, 3, 3, stride=8, pad=1)
        s, b = self.bn_backbone
        x = matmul_affine(cols, self.w_backbone[None], s, b, relu=True)
        x = x.reshape(N, Ho, Wo, -1)                        # NHWC, padded C
        # fc0
        s, b = self.bn_fc0
        x = conv3x3_bn_act(x, self.w_fc0, s, b, relu=True)
        # EMAU
        x, mu = self.emau(x)
        # fc1 (+ Dropout2d p=0.1 -> identity in eval mode)
        s, b = self.bn_fc1
        x = conv3x3_bn_act(x, self.w_fc1, s, b, relu=True)
        # fc2 (1x1 conv with bias)
        Nn, Hf, Wf, Cf = x.shape
        x = matmul_affine(x.reshape(Nn, Hf * Wf, Cf), self.w_fc2[None],
                          self.scale_fc2, self.b_fc2, relu=False)
        x = x.reshape(Nn, Hf, Wf, -1)
        # Bilinear upsample (align_corners=True), separable W-then-H matmuls.
        pred = bilinear_upsample(x, Himg, Wimg)
        pred = pred[..., :self.n_classes].transpose(0, 3, 1, 2)   # back to NCHW
        return pred, mu


if __name__ == "__main__":
    key = jax.random.PRNGKey(0)
    img = jax.random.normal(key, (2, 4, 32, 32), jnp.float32)   # NCHW, band=4

    model = EMANetPallas(band=4, n_classes=5)
    fwd = jax.jit(model.__call__)
    pred, mu = fwd(img)
    pred = jax.block_until_ready(pred)
    mu = jax.block_until_ready(mu)

    assert pred.shape == (2, 5, 32, 32), pred.shape
    assert mu.shape == (2, 32, 16), mu.shape
    assert bool(jnp.all(jnp.isfinite(pred))) and bool(jnp.all(jnp.isfinite(mu)))
    print("KERNEL_OK")
</pallas_src>

<mosaic_0001>
module attributes {stable_mosaic.version = 11 : i64} {
  func.func @_mm_kernel(%arg0: i32, %arg1: i32, %arg2: i32, %arg3: i32, %arg4: memref<1x16x128xbf16, #tpu.memory_space<vmem>>, %arg5: memref<1x128x128xbf16, #tpu.memory_space<vmem>>, %arg6: memref<1x128xf32, #tpu.memory_space<vmem>>, %arg7: memref<1x128xf32, #tpu.memory_space<vmem>>, %arg8: memref<1x16x128xf32, #tpu.memory_space<vmem>>, %arg9: memref<16x128xf32, #tpu.memory_space<vmem>>) attributes {dimension_semantics = [#tpu.dimension_semantics<parallel>, #tpu.dimension_semantics<parallel>, #tpu.dimension_semantics<parallel>, #tpu.dimension_semantics<arbitrary>], iteration_bounds = array<i64: 2, 1, 1, 1>, scalar_prefetch = 0 : i64, scratch_operands = 1 : i64, tpu.core_type = #tpu.core_type<tc>, window_params = [{transform_indices = @transform_0, window_bounds = array<i64: 1, 16, 128>}, {transform_indices = @transform_1, window_bounds = array<i64: 1, 128, 128>}, {transform_indices = @transform_2, window_bounds = array<i64: 1, 128>}, {transform_indices = @transform_3, window_bounds = array<i64: 1, 128>}, {transform_indices = @transform_4, window_bounds = array<i64: 1, 16, 128>}]} {
    %c0_i32 = arith.constant 0 : i32
    %0 = arith.cmpi eq, %arg3, %c0_i32 : i32
    %1 = arith.extui %0 : i1 to i32
    %c0_i32_0 = arith.constant 0 : i32
    %2 = arith.cmpi ne, %1, %c0_i32_0 : i32
    scf.if %2 {
      %cst_12 = arith.constant 0.000000e+00 : f32
      %14 = vector.broadcast %cst_12 : f32 to vector<16x128xf32>
      %c0_13 = arith.constant 0 : index
      %c0_14 = arith.constant 0 : index
      %15 = vector.load %arg9[%c0_13, %c0_14] : memref<16x128xf32, #tpu.memory_space<vmem>>, vector<16x128xf32>
      tpu.vector_store %arg9[%c0_13, %c0_14], %14 {strides = array<i32>} : memref<16x128xf32, #tpu.memory_space<vmem>>, vector<16x128xf32>,
    } else {
    }
    %c0 = arith.constant 0 : index
    %c0_1 = arith.constant 0 : index
    %3 = vector.load %arg9[%c0, %c0_1] : memref<16x128xf32, #tpu.memory_space<vmem>>, vector<16x128xf32>
    %c0_2 = arith.constant 0 : index
    %c0_3 = arith.constant 0 : index
    %c0_4 = arith.constant 0 : index
    %4 = vector.load %arg4[%c0_2, %c0_3, %c0_4] : memref<1x16x128xbf16, #tpu.memory_space<vmem>>, vector<1x16x128xbf16>
    %5 = vector.shape_cast %4 : vector<1x16x128xbf16> to vector<16x128xbf16>
    %c0_5 = arith.constant 0 : index
    %c0_6 = arith.constant 0 : index
    %c0_7 = arith.constant 0 : index
    %6 = vector.load %arg5[%c0_5, %c0_6, %c0_7] : memref<1x128x128xbf16, #tpu.memory_space<vmem>>, vector<1x128x128xbf16>
    %7 = vector.shape_cast %6 : vector<1x128x128xbf16> to vector<128x128xbf16>
    %cst = arith.constant dense<0.000000e+00> : vector<16x128xf32>
    %8 = tpu.matmul %5, %7, %cst {dimension_numbers = #tpu.dot_dimension_numbers<[1], [0], [0], [1], [0, 0, 1, 1], [], []>} : vector<16x128xbf16>, vector<128x128xbf16>, vector<16x128xf32> -> vector<16x128xf32>
    %9 = arith.addf %3, %8 : vector<16x128xf32>
    %c0_8 = arith.constant 0 : index
    %c0_9 = arith.constant 0 : index
    %10 = vector.load %arg9[%c0_8, %c0_9] : memref<16x128xf32, #tpu.memory_space<vmem>>, vector<16x128xf32>
    tpu.vector_store %arg9[%c0_8, %c0_9], %9 {strides = array<i32>} : memref<16x128xf32, #tpu.memory_space<vmem>>, vector<16x128xf32>,
    %c0_i32_10 = arith.constant 0 : i32
    %11 = arith.cmpi eq, %arg3, %c0_i32_10 : i32
    %12 = arith.extui %11 : i1 to i32
    %c0_i32_11 = arith.constant 0 : i32
    %13 = arith.cmpi ne, %12, %c0_i32_11 : i32
    scf.if %13 {
      %c0_12 = arith.constant 0 : index
      %c0_13 = arith.constant 0 : index
      %14 = vector.load %arg9[%c0_12, %c0_13] : memref<16x128xf32, #tpu.memory_space<vmem>>, vector<16x128xf32>
      %c0_14 = arith.constant 0 : index
      %c0_15 = arith.constant 0 : index
      %15 = vector.load %arg6[%c0_14, %c0_15] : memref<1x128xf32, #tpu.memory_space<vmem>>, vector<1x128xf32>
      %16 = vector.broadcast %15 : vector<1x128xf32> to vector<16x128xf32>
      %17 = arith.mulf %14, %16 : vector<16x128xf32>
      %c0_16 = arith.constant 0 : index
      %c0_17 = arith.constant 0 : index
      %18 = vector.load %arg7[%c0_16, %c0_17] : memref<1x128xf32, #tpu.memory_space<vmem>>, vector<1x128xf32>
      %19 = vector.broadcast %18 : vector<1x128xf32> to vector<16x128xf32>
      %20 = arith.addf %17, %19 : vector<16x128xf32>
      %cst_18 = arith.constant 0.000000e+00 : f32
      %21 = vector.broadcast %cst_18 : f32 to vector<16x128xf32>
      %22 = arith.maximumf %20, %21 : vector<16x128xf32>
      %c0_19 = arith.constant 0 : index
      %c0_20 = arith.constant 0 : index
      %c0_21 = arith.constant 0 : index
      %23 = vector.load %arg8[%c0_19, %c0_20, %c0_21] : memref<1x16x128xf32, #tpu.memory_space<vmem>>, vector<1x16x128xf32>
      %24 = vector.shape_cast %23 : vector<1x16x128xf32> to vector<16x128xf32>
      %25 = vector.shape_cast %22 : vector<16x128xf32> to vector<1x16x128xf32>
      tpu.vector_store %arg8[%c0_19, %c0_20, %c0_21], %25 {strides = array<i32>} : memref<1x16x128xf32, #tpu.memory_space<vmem>>, vector<1x16x128xf32>,
    } else {
    }
    return
  }
  func.func @transform_0(%arg0: i32, %arg1: i32, %arg2: i32, %arg3: i32) -> (i32, i32, i32) {
    %c0_i32 = arith.constant 0 : i32
    return %arg0, %arg1, %arg3 : i32, i32, i32
  }
  func.func @transform_1(%arg0: i32, %arg1: i32, %arg2: i32, %arg3: i32) -> (i32, i32, i32) {
    %c0_i32 = arith.constant 0 : i32
    %c0_i32_0 = arith.constant 0 : i32
    return %c0_i32, %arg3, %arg2 : i32, i32, i32
  }
  func.func @transform_2(%arg0: i32, %arg1: i32, %arg2: i32, %arg3: i32) -> (i32, i32) {
    %c0_i32 = arith.constant 0 : i32
    %c0_i32_0 = arith.constant 0 : i32
    return %c0_i32, %arg2 : i32, i32
  }
  func.func @transform_3(%arg0: i32, %arg1: i32, %arg2: i32, %arg3: i32) -> (i32, i32) {
    %c0_i32 = arith.constant 0 : i32
    %c0_i32_0 = arith.constant 0 : i32
    return %c0_i32, %arg2 : i32, i32
  }
  func.func @transform_4(%arg0: i32, %arg1: i32, %arg2: i32, %arg3: i32) -> (i32, i32, i32) {
    %c0_i32 = arith.constant 0 : i32
    return %arg0, %arg1, %arg2 : i32, i32, i32
  }
}

module attributes {stable_mosaic.version = 11 : i64} {
  func.func @_conv3x3_kernel(%arg0: i32, %arg1: i32, %arg2: i32, %arg3: memref<1x1x6x128xbf16, #tpu.memory_space<vmem>>, %arg4: memref<1x1x6x128xbf16, #tpu.memory_space<vmem>>, %arg5: memref<1x1x6x128xbf16, #tpu.memory_space<vmem>>, %arg6: memref<9x128x128xbf16, #tpu.memory_space<vmem>>, %arg7: memref<1x128xf32, #tpu.memory_space<vmem>>, %arg8: memref<1x128xf32, #tpu.memory_space<vmem>>, %arg9: memref<1x1x4x128xf32, #tpu.memory_space<vmem>>) attributes {dimension_semantics = [#tpu.dimension_semantics<parallel>, #tpu.dimension_semantics<parallel>, #tpu.dimension_semantics<parallel>], iteration_bounds = array<i64: 2, 4, 1>, scalar_prefetch = 0 : i64, scratch_operands = 0 : i64, tpu.core_type = #tpu.core_type<tc>, window_params = [{transform_indices = @transform_0, window_bounds = array<i64: 1, 1, 6, 128>}, {transform_indices = @transform_1, window_bounds = array<i64: 1, 1, 6, 128>}, {transform_indices = @transform_2, window_bounds = array<i64: 1, 1, 6, 128>}, {transform_indices = @transform_3, window_bounds = array<i64: 9, 128, 128>}, {transform_indices = @transform_4, window_bounds = array<i64: 1, 128>}, {transform_indices = @transform_5, window_bounds = array<i64: 1, 128>}, {transform_indices = @transform_6, window_bounds = array<i64: 1, 1, 4, 128>}]} {
    %c0 = arith.constant 0 : index
    %c0_0 = arith.constant 0 : index
    %c0_1 = arith.constant 0 : index
    %c0_2 = arith.constant 0 : index
    %0 = vector.load %arg3[%c0, %c0_0, %c0_1, %c0_2] : memref<1x1x6x128xbf16, #tpu.memory_space<vmem>>, vector<1x1x6x128xbf16>
    %1 = vector.shape_cast %0 : vector<1x1x6x128xbf16> to vector<6x128xbf16>
    %c0_3 = arith.constant 0 : index
    %c0_4 = arith.constant 0 : index
    %c0_5 = arith.constant 0 : index
    %c0_6 = arith.constant 0 : index
    %2 = vector.load %arg4[%c0_3, %c0_4, %c0_5, %c0_6] : memref<1x1x6x128xbf16, #tpu.memory_space<vmem>>, vector<1x1x6x128xbf16>
    %3 = vector.shape_cast %2 : vector<1x1x6x128xbf16> to vector<6x128xbf16>
    %c0_7 = arith.constant 0 : index
    %c0_8 = arith.constant 0 : index
    %c0_9 = arith.constant 0 : index
    %c0_10 = arith.constant 0 : index
    %4 = vector.load %arg5[%c0_7, %c0_8, %c0_9, %c0_10] : memref<1x1x6x128xbf16, #tpu.memory_space<vmem>>, vector<1x1x6x128xbf16>
    %5 = vector.shape_cast %4 : vector<1x1x6x128xbf16> to vector<6x128xbf16>
    %cst = arith.constant 0.000000e+00 : f32
    %6 = vector.broadcast %cst : f32 to vector<4x128xf32>
    %7 = vector.extract_strided_slice %1 {offsets = [0, 0], sizes = [4, 128], strides = [1, 1]} : vector<6x128xbf16> to vector<4x128xbf16>
    %c0_11 = arith.constant 0 : index
    %c0_12 = arith.constant 0 : index
    %c0_13 = arith.constant 0 : index
    %8 = vector.load %arg6[%c0_11, %c0_12, %c0_13] : memref<9x128x128xbf16, #tpu.memory_space<vmem>>, vector<1x128x128xbf16>
    %9 = vector.shape_cast %8 : vector<1x128x128xbf16> to vector<128x128xbf16>
    %cst_14 = arith.constant dense<0.000000e+00> : vector<4x128xf32>
    %10 = tpu.matmul %7, %9, %cst_14 {dimension_numbers = #tpu.dot_dimension_numbers<[1], [0], [0], [1], [0, 0, 1, 1], [], []>} : vector<4x128xbf16>, vector<128x128xbf16>, vector<4x128xf32> -> vector<4x128xf32>
    %11 = arith.addf %6, %10 : vector<4x128xf32>
    %12 = vector.extract_strided_slice %1 {offsets = [1, 0], sizes = [4, 128], strides = [1, 1]} : vector<6x128xbf16> to vector<4x128xbf16>
    %c1 = arith.constant 1 : index
    %c0_15 = arith.constant 0 : index
    %c0_16 = arith.constant 0 : index
    %13 = vector.load %arg6[%c1, %c0_15, %c0_16] : memref<9x128x128xbf16, #tpu.memory_space<vmem>>, vector<1x128x128xbf16>
    %14 = vector.shape_cast %13 : vector<1x128x128xbf16> to vector<128x128xbf16>
    %cst_17 = arith.constant dense<0.000000e+00> : vector<4x128xf32>
    %15 = tpu.matmul %12, %14, %cst_17 {dimension_numbers = #tpu.dot_dimension_numbers<[1], [0], [0], [1], [0, 0, 1, 1], [], []>} : vector<4x128xbf16>, vector<128x128xbf16>, vector<4x128xf32> -> vector<4x128xf32>
    %16 = arith.addf %11, %15 : vector<4x128xf32>
    %17 = vector.extract_strided_slice %1 {offsets = [2, 0], sizes = [4, 128], strides = [1, 1]} : vector<6x128xbf16> to vector<4x128xbf16>
    %c2 = arith.constant 2 : index
    %c0_18 = arith.constant 0 : index
    %c0_19 = arith.constant 0 : index
    %18 = vector.load %arg6[%c2, %c0_18, %c0_19] : memref<9x128x128xbf16, #tpu.memory_space<vmem>>, vector<1x128x128xbf16>
    %19 = vector.shape_cast %18 : vector<1x128x128xbf16> to vector<128x128xbf16>
    %cst_20 = arith.constant dense<0.000000e+00> : vector<4x128xf32>
    %20 = tpu.matmul %17, %19, %cst_20 {dimension_numbers = #tpu.dot_dimension_numbers<[1], [0], [0], [1], [0, 0, 1, 1], [], []>} : vector<4x128xbf16>, vector<128x128xbf16>, vector<4x128xf32> -> vector<4x128xf32>
    %21 = arith.addf %16, %20 : vector<4x128xf32>
    %22 = vector.extract_strided_slice %3 {offsets = [0, 0], sizes = [4, 128], strides = [1, 1]} : vector<6x128xbf16> to vector<4x128xbf16>
    %c3 = arith.constant 3 : index
    %c0_21 = arith.constant 0 : index
    %c0_22 = arith.constant 0 : index
    %23 = vector.load %arg6[%c3, %c0_21, %c0_22] : memref<9x128x128xbf16, #tpu.memory_space<vmem>>, vector<1x128x128xbf16>
    %24 = vector.shape_cast %23 : vector<1x128x128xbf16> to vector<128x128xbf16>
    %cst_23 = arith.constant dense<0.000000e+00> : vector<4x128xf32>
    %25 = tpu.matmul %22, %24, %cst_23 {dimension_numbers = #tpu.dot_dimension_numbers<[1], [0], [0], [1], [0, 0, 1, 1], [], []>} : vector<4x128xbf16>, vector<128x128xbf16>, vector<4x128xf32> -> vector<4x128xf32>
    %26 = arith.addf %21, %25 : vector<4x128xf32>
    %27 = vector.extract_strided_slice %3 {offsets = [1, 0], sizes = [4, 128], strides = [1, 1]} : vector<6x128xbf16> to vector<4x128xbf16>
    %c4 = arith.constant 4 : index
    %c0_24 = arith.constant 0 : index
    %c0_25 = arith.constant 0 : index
    %28 = vector.load %arg6[%c4, %c0_24, %c0_25] : memref<9x128x128xbf16, #tpu.memory_space<vmem>>, vector<1x128x128xbf16>
    %29 = vector.shape_cast %28 : vector<1x128x128xbf16> to vector<128x128xbf16>
    %cst_26 = arith.constant dense<0.000000e+00> : vector<4x128xf32>
    %30 = tpu.matmul %27, %29, %cst_26 {dimension_numbers = #tpu.dot_dimension_numbers<[1], [0], [0], [1], [0, 0, 1, 1], [], []>} : vector<4x128xbf16>, vector<128x128xbf16>, vector<4x128xf32> -> vector<4x128xf32>
    %31 = arith.addf %26, %30 : vector<4x128xf32>
    %32 = vector.extract_strided_slice %3 {offsets = [2, 0], sizes = [4, 128], strides = [1, 1]} : vector<6x128xbf16> to vector<4x128xbf16>
    %c5 = arith.constant 5 : index
    %c0_27 = arith.constant 0 : index
    %c0_28 = arith.constant 0 : index
    %33 = vector.load %arg6[%c5, %c0_27, %c0_28] : memref<9x128x128xbf16, #tpu.memory_space<vmem>>, vector<1x128x128xbf16>
    %34 = vector.shape_cast %33 : vector<1x128x128xbf16> to vector<128x128xbf16>
    %cst_29 = arith.constant dense<0.000000e+00> : vector<4x128xf32>
    %35 = tpu.matmul %32, %34, %cst_29 {dimension_numbers = #tpu.dot_dimension_numbers<[1], [0], [0], [1], [0, 0, 1, 1], [], []>} : vector<4x128xbf16>, vector<128x128xbf16>, vector<4x128xf32> -> vector<4x128xf32>
    %36 = arith.addf %31, %35 : vector<4x128xf32>
    %37 = vector.extract_strided_slice %5 {offsets = [0, 0], sizes = [4, 128], strides = [1, 1]} : vector<6x128xbf16> to vector<4x128xbf16>
    %c6 = arith.constant 6 : index
    %c0_30 = arith.constant 0 : index
    %c0_31 = arith.constant 0 : index
    %38 = vector.load %arg6[%c6, %c0_30, %c0_31] : memref<9x128x128xbf16, #tpu.memory_space<vmem>>, vector<1x128x128xbf16>
    %39 = vector.shape_cast %38 : vector<1x128x128xbf16> to vector<128x128xbf16>
    %cst_32 = arith.constant dense<0.000000e+00> : vector<4x128xf32>
    %40 = tpu.matmul %37, %39, %cst_32 {dimension_numbers = #tpu.dot_dimension_numbers<[1], [0], [0], [1], [0, 0, 1, 1], [], []>} : vector<4x128xbf16>, vector<128x128xbf16>, vector<4x128xf32> -> vector<4x128xf32>
    %41 = arith.addf %36, %40 : vector<4x128xf32>
    %42 = vector.extract_strided_slice %5 {offsets = [1, 0], sizes = [4, 128], strides = [1, 1]} : vector<6x128xbf16> to vector<4x128xbf16>
    %c7 = arith.constant 7 : index
    %c0_33 = arith.constant 0 : index
    %c0_34 = arith.constant 0 : index
    %43 = vector.load %arg6[%c7, %c0_33, %c0_34] : memref<9x128x128xbf16, #tpu.memory_space<vmem>>, vector<1x128x128xbf16>
    %44 = vector.shape_cast %43 : vector<1x128x128xbf16> to vector<128x128xbf16>
    %cst_35 = arith.constant dense<0.000000e+00> : vector<4x128xf32>
    %45 = tpu.matmul %42, %44, %cst_35 {dimension_numbers = #tpu.dot_dimension_numbers<[1], [0], [0], [1], [0, 0, 1, 1], [], []>} : vector<4x128xbf16>, vector<128x128xbf16>, vector<4x128xf32> -> vector<4x128xf32>
    %46 = arith.addf %41, %45 : vector<4x128xf32>
    %47 = vector.extract_strided_slice %5 {offsets = [2, 0], sizes = [4, 128], strides = [1, 1]} : vector<6x128xbf16> to vector<4x128xbf16>
    %c8 = arith.constant 8 : index
    %c0_36 = arith.constant 0 : index
    %c0_37 = arith.constant 0 : index
    %48 = vector.load %arg6[%c8, %c0_36, %c0_37] : memref<9x128x128xbf16, #tpu.memory_space<vmem>>, vector<1x128x128xbf16>
    %49 = vector.shape_cast %48 : vector<1x128x128xbf16> to vector<128x128xbf16>
    %cst_38 = arith.constant dense<0.000000e+00> : vector<4x128xf32>
    %50 = tpu.matmul %47, %49, %cst_38 {dimension_numbers = #tpu.dot_dimension_numbers<[1], [0], [0], [1], [0, 0, 1, 1], [], []>} : vector<4x128xbf16>, vector<128x128xbf16>, vector<4x128xf32> -> vector<4x128xf32>
    %51 = arith.addf %46, %50 : vector<4x128xf32>
    %c0_39 = arith.constant 0 : index
    %c0_40 = arith.constant 0 : index
    %52 = vector.load %arg7[%c0_39, %c0_40] : memref<1x128xf32, #tpu.memory_space<vmem>>, vector<1x128xf32>
    %53 = vector.broadcast %52 : vector<1x128xf32> to vector<4x128xf32>
    %54 = arith.mulf %51, %53 : vector<4x128xf32>
    %c0_41 = arith.constant 0 : index
    %c0_42 = arith.constant 0 : index
    %55 = vector.load %arg8[%c0_41, %c0_42] : memref<1x128xf32, #tpu.memory_space<vmem>>, vector<1x128xf32>
    %56 = vector.broadcast %55 : vector<1x128xf32> to vector<4x128xf32>
    %57 = arith.addf %54, %56 : vector<4x128xf32>
    %cst_43 = arith.constant 0.000000e+00 : f32
    %58 = vector.broadcast %cst_43 : f32 to vector<4x128xf32>
    %59 = arith.maximumf %57, %58 : vector<4x128xf32>
    %c0_44 = arith.constant 0 : index
    %c0_45 = arith.constant 0 : index
    %c0_46 = arith.constant 0 : index
    %c0_47 = arith.constant 0 : index
    %60 = vector.load %arg9[%c0_44, %c0_45, %c0_46, %c0_47] : memref<1x1x4x128xf32, #tpu.memory_space<vmem>>, vector<1x1x4x128xf32>
    %61 = vector.shape_cast %60 : vector<1x1x4x128xf32> to vector<4x128xf32>
    %62 = vector.shape_cast %59 : vector<4x128xf32> to vector<1x1x4x128xf32>
    tpu.vector_store %arg9[%c0_44, %c0_45, %c0_46, %c0_47], %62 {strides = array<i32>} : memref<1x1x4x128xf32, #tpu.memory_space<vmem>>, vector<1x1x4x128xf32>,
    return
  }
  func.func @transform_0(%arg0: i32, %arg1: i32, %arg2: i32) -> (i32, i32, i32, i32) {
    %c0_i32 = arith.constant 0 : i32
    %0 = arith.addi %arg1, %c0_i32 : i32
    %c0_i32_0 = arith.constant 0 : i32
    %c0_i32_1 = arith.constant 0 : i32
    %c0_i32_2 = arith.constant 0 : i32
    return %arg0, %0, %c0_i32_0, %c0_i32_1 : i32, i32, i32, i32
  }
  func.func @transform_1(%arg0: i32, %arg1: i32, %arg2: i32) -> (i32, i32, i32, i32) {
    %c1_i32 = arith.constant 1 : i32
    %0 = arith.addi %arg1, %c1_i32 : i32
    %c0_i32 = arith.constant 0 : i32
    %c0_i32_0 = arith.constant 0 : i32
    %c0_i32_1 = arith.constant 0 : i32
    return %arg0, %0, %c0_i32, %c0_i32_0 : i32, i32, i32, i32
  }
  func.func @transform_2(%arg0: i32, %arg1: i32, %arg2: i32) -> (i32, i32, i32, i32) {
    %c2_i32 = arith.constant 2 : i32
    %0 = arith.addi %arg1, %c2_i32 : i32
    %c0_i32 = arith.constant 0 : i32
    %c0_i32_0 = arith.constant 0 : i32
    %c0_i32_1 = arith.constant 0 : i32
    return %arg0, %0, %c0_i32, %c0_i32_0 : i32, i32, i32, i32
  }
  func.func @transform_3(%arg0: i32, %arg1: i32, %arg2: i32) -> (i32, i32, i32) {
    %c0_i32 = arith.constant 0 : i32
    %c0_i32_0 = arith.constant 0 : i32
    %c0_i32_1 = arith.constant 0 : i32
    return %c0_i32, %c0_i32_0, %arg2 : i32, i32, i32
  }
  func.func @transform_4(%arg0: i32, %arg1: i32, %arg2: i32) -> (i32, i32) {
    %c0_i32 = arith.constant 0 : i32
    %c0_i32_0 = arith.constant 0 : i32
    return %c0_i32, %arg2 : i32, i32
  }
  func.func @transform_5(%arg0: i32, %arg1: i32, %arg2: i32) -> (i32, i32) {
    %c0_i32 = arith.constant 0 : i32
    %c0_i32_0 = arith.constant 0 : i32
    return %c0_i32, %arg2 : i32, i32
  }
  func.func @transform_6(%arg0: i32, %arg1: i32, %arg2: i32) -> (i32, i32, i32, i32) {
    %c0_i32 = arith.constant 0 : i32
    %c0_i32_0 = arith.constant 0 : i32
    return %arg0, %arg1, %c0_i32, %arg2 : i32, i32, i32, i32
  }
}

module attributes {stable_mosaic.version = 11 : i64} {
  func.func @_mm_kernel(%arg0: i32, %arg1: i32, %arg2: i32, %arg3: i32, %arg4: memref<1x16x128xbf16, #tpu.memory_space<vmem>>, %arg5: memref<1x128x128xbf16, #tpu.memory_space<vmem>>, %arg6: memref<1x128xf32, #tpu.memory_space<vmem>>, %arg7: memref<1x128xf32, #tpu.memory_space<vmem>>, %arg8: memref<1x16x128xf32, #tpu.memory_space<vmem>>, %arg9: memref<16x128xf32, #tpu.memory_space<vmem>>) attributes {dimension_semantics = [#tpu.dimension_semantics<parallel>, #tpu.dimension_semantics<parallel>, #tpu.dimension_semantics<parallel>, #tpu.dimension_semantics<arbitrary>], iteration_bounds = array<i64: 2, 1, 1, 1>, scalar_prefetch = 0 : i64, scratch_operands = 1 : i64, tpu.core_type = #tpu.core_type<tc>, window_params = [{transform_indices = @transform_0, window_bounds = array<i64: 1, 16, 128>}, {transform_indices = @transform_1, window_bounds = array<i64: 1, 128, 128>}, {transform_indices = @transform_2, window_bounds = array<i64: 1, 128>}, {transform_indices = @transform_3, window_bounds = array<i64: 1, 128>}, {transform_indices = @transform_4, window_bounds = array<i64: 1, 16, 128>}]} {
    %c0_i32 = arith.constant 0 : i32
    %0 = arith.cmpi eq, %arg3, %c0_i32 : i32
    %1 = arith.extui %0 : i1 to i32
    %c0_i32_0 = arith.constant 0 : i32
    %2 = arith.cmpi ne, %1, %c0_i32_0 : i32
    scf.if %2 {
      %cst_12 = arith.constant 0.000000e+00 : f32
      %14 = vector.broadcast %cst_12 : f32 to vector<16x128xf32>
      %c0_13 = arith.constant 0 : index
      %c0_14 = arith.constant 0 : index
      %15 = vector.load %arg9[%c0_13, %c0_14] : memref<16x128xf32, #tpu.memory_space<vmem>>, vector<16x128xf32>
      tpu.vector_store %arg9[%c0_13, %c0_14], %14 {strides = array<i32>} : memref<16x128xf32, #tpu.memory_space<vmem>>, vector<16x128xf32>,
    } else {
    }
    %c0 = arith.constant 0 : index
    %c0_1 = arith.constant 0 : index
    %3 = vector.load %arg9[%c0, %c0_1] : memref<16x128xf32, #tpu.memory_space<vmem>>, vector<16x128xf32>
    %c0_2 = arith.constant 0 : index
    %c0_3 = arith.constant 0 : index
    %c0_4 = arith.constant 0 : index
    %4 = vector.load %arg4[%c0_2, %c0_3, %c0_4] : memref<1x16x128xbf16, #tpu.memory_space<vmem>>, vector<1x16x128xbf16>
    %5 = vector.shape_cast %4 : vector<1x16x128xbf16> to vector<16x128xbf16>
    %c0_5 = arith.constant 0 : index
    %c0_6 = arith.constant 0 : index
    %c0_7 = arith.constant 0 : index
    %6 = vector.load %arg5[%c0_5, %c0_6, %c0_7] : memref<1x128x128xbf16, #tpu.memory_space<vmem>>, vector<1x128x128xbf16>
    %7 = vector.shape_cast %6 : vector<1x128x128xbf16> to vector<128x128xbf16>
    %cst = arith.constant dense<0.000000e+00> : vector<16x128xf32>
    %8 = tpu.matmul %5, %7, %cst {dimension_numbers = #tpu.dot_dimension_numbers<[1], [0], [0], [1], [0, 0, 1, 1], [], []>} : vector<16x128xbf16>, vector<128x128xbf16>, vector<16x128xf32> -> vector<16x128xf32>
    %9 = arith.addf %3, %8 : vector<16x128xf32>
    %c0_8 = arith.constant 0 : index
    %c0_9 = arith.constant 0 : index
    %10 = vector.load %arg9[%c0_8, %c0_9] : memref<16x128xf32, #tpu.memory_space<vmem>>, vector<16x128xf32>
    tpu.vector_store %arg9[%c0_8, %c0_9], %9 {strides = array<i32>} : memref<16x128xf32, #tpu.memory_space<vmem>>, vector<16x128xf32>,
    %c0_i32_10 = arith.constant 0 : i32
    %11 = arith.cmpi eq, %arg3, %c0_i32_10 : i32
    %12 = arith.extui %11 : i1 to i32
    %c0_i32_11 = arith.constant 0 : i32
    %13 = arith.cmpi ne, %12, %c0_i32_11 : i32
    scf.if %13 {
      %c0_12 = arith.constant 0 : index
      %c0_13 = arith.constant 0 : index
      %14 = vector.load %arg9[%c0_12, %c0_13] : memref<16x128xf32, #tpu.memory_space<vmem>>, vector<16x128xf32>
      %c0_14 = arith.constant 0 : index
      %c0_15 = arith.constant 0 : index
      %15 = vector.load %arg6[%c0_14, %c0_15] : memref<1x128xf32, #tpu.memory_space<vmem>>, vector<1x128xf32>
      %16 = vector.broadcast %15 : vector<1x128xf32> to vector<16x128xf32>
      %17 = arith.mulf %14, %16 : vector<16x128xf32>
      %c0_16 = arith.constant 0 : index
      %c0_17 = arith.constant 0 : index
      %18 = vector.load %arg7[%c0_16, %c0_17] : memref<1x128xf32, #tpu.memory_space<vmem>>, vector<1x128xf32>
      %19 = vector.broadcast %18 : vector<1x128xf32> to vector<16x128xf32>
      %20 = arith.addf %17, %19 : vector<16x128xf32>
      %c0_18 = arith.constant 0 : index
      %c0_19 = arith.constant 0 : index
      %c0_20 = arith.constant 0 : index
      %21 = vector.load %arg8[%c0_18, %c0_19, %c0_20] : memref<1x16x128xf32, #tpu.memory_space<vmem>>, vector<1x16x128xf32>
      %22 = vector.shape_cast %21 : vector<1x16x128xf32> to vector<16x128xf32>
      %23 = vector.shape_cast %20 : vector<16x128xf32> to vector<1x16x128xf32>
      tpu.vector_store %arg8[%c0_18, %c0_19, %c0_20], %23 {strides = array<i32>} : memref<1x16x128xf32, #tpu.memory_space<vmem>>, vector<1x16x128xf32>,
    } else {
    }
    return
  }
  func.func @transform_0(%arg0: i32, %arg1: i32, %arg2: i32, %arg3: i32) -> (i32, i32, i32) {
    %c0_i32 = arith.constant 0 : i32
    return %arg0, %arg1, %arg3 : i32, i32, i32
  }
  func.func @transform_1(%arg0: i32, %arg1: i32, %arg2: i32, %arg3: i32) -> (i32, i32, i32) {
    %c0_i32 = arith.constant 0 : i32
    %c0_i32_0 = arith.constant 0 : i32
    return %c0_i32, %arg3, %arg2 : i32, i32, i32
  }
  func.func @transform_2(%arg0: i32, %arg1: i32, %arg2: i32, %arg3: i32) -> (i32, i32) {
    %c0_i32 = arith.constant 0 : i32
    %c0_i32_0 = arith.constant 0 : i32
    return %c0_i32, %arg2 : i32, i32
  }
  func.func @transform_3(%arg0: i32, %arg1: i32, %arg2: i32, %arg3: i32) -> (i32, i32) {
    %c0_i32 = arith.constant 0 : i32
    %c0_i32_0 = arith.constant 0 : i32
    return %c0_i32, %arg2 : i32, i32
  }
  func.func @transform_4(%arg0: i32, %arg1: i32, %arg2: i32, %arg3: i32) -> (i32, i32, i32) {
    %c0_i32 = arith.constant 0 : i32
    return %arg0, %arg1, %arg2 : i32, i32, i32
  }
}

module attributes {stable_mosaic.version = 11 : i64} {
  func.func @_ema_kernel(%arg0: i32, %arg1: i32, %arg2: i32, %arg3: memref<1x16x128xf32, #tpu.memory_space<vmem>>, %arg4: memref<1x128x128xf32, #tpu.memory_space<vmem>>, %arg5: memref<1x16x128xf32, #tpu.memory_space<vmem>>, %arg6: memref<1x128x128xf32, #tpu.memory_space<vmem>>, %arg7: memref<128x128xf32, #tpu.memory_space<vmem>>, %arg8: memref<128x128xf32, #tpu.memory_space<vmem>>, %arg9: memref<128x128xf32, #tpu.memory_space<vmem>>, %arg10: memref<1x128xf32, #tpu.memory_space<vmem>>) attributes {dimension_semantics = [#tpu.dimension_semantics<parallel>, #tpu.dimension_semantics<arbitrary>, #tpu.dimension_semantics<arbitrary>], iteration_bounds = array<i64: 2, 4, 1>, scalar_prefetch = 0 : i64, scratch_operands = 4 : i64, tpu.core_type = #tpu.core_type<tc>, window_params = [{transform_indices = @transform_0, window_bounds = array<i64: 1, 16, 128>}, {pipeline_mode = #tpu.pipeline_mode<synchronous>, transform_indices = @transform_1, window_bounds = array<i64: 1, 128, 128>}, {transform_indices = @transform_2, window_bounds = array<i64: 1, 16, 128>}, {transform_indices = @transform_3, window_bounds = array<i64: 1, 128, 128>}]} {
    %c0_i32 = arith.constant 0 : i32
    %0 = arith.cmpi eq, %arg1, %c0_i32 : i32
    %c0_i32_0 = arith.constant 0 : i32
    %1 = arith.cmpi eq, %arg2, %c0_i32_0 : i32
    %2 = arith.andi %0, %1 : i1
    %3 = arith.extui %2 : i1 to i32
    %c0_i32_1 = arith.constant 0 : i32
    %4 = arith.cmpi ne, %3, %c0_i32_1 : i32
    scf.if %4 {
      %c0_9 = arith.constant 0 : index
      %c0_10 = arith.constant 0 : index
      %c0_11 = arith.constant 0 : index
      %23 = vector.load %arg4[%c0_9, %c0_10, %c0_11] : memref<1x128x128xf32, #tpu.memory_space<vmem>>, vector<1x128x128xf32>
      %24 = vector.shape_cast %23 : vector<1x128x128xf32> to vector<128x128xf32>
      %c0_12 = arith.constant 0 : index
      %c0_13 = arith.constant 0 : index
      %25 = vector.load %arg7[%c0_12, %c0_13] : memref<128x128xf32, #tpu.memory_space<vmem>>, vector<128x128xf32>
      tpu.vector_store %arg7[%c0_12, %c0_13], %24 {strides = array<i32>} : memref<128x128xf32, #tpu.memory_space<vmem>>, vector<128x128xf32>,
    } else {
    }
    %c0 = arith.constant 0 : index
    %c0_2 = arith.constant 0 : index
    %c0_3 = arith.constant 0 : index
    %5 = vector.load %arg3[%c0, %c0_2, %c0_3] : memref<1x16x128xf32, #tpu.memory_space<vmem>>, vector<1x16x128xf32>
    %6 = vector.shape_cast %5 : vector<1x16x128xf32> to vector<16x128xf32>
    %7 = tpu.iota {dimensions = array<i32: 1>} : vector<1x128xi32>
    %c16_i32 = arith.constant 16 : i32
    %8 = vector.broadcast %c16_i32 : i32 to vector<1x128xi32>
    %9 = arith.cmpi slt, %7, %8 : vector<1x128xi32>
    %cst = arith.constant 0.000000e+00 : f32
    %cst_4 = arith.constant -1.000000e+30 : f32
    %10 = vector.broadcast %cst : f32 to vector<1x128xf32>
    %11 = vector.broadcast %cst_4 : f32 to vector<1x128xf32>
    %12 = arith.select %9, %10, %11 : vector<1x128xi1>, vector<1x128xf32>
    %c3_i32 = arith.constant 3 : i32
    %13 = arith.cmpi slt, %arg1, %c3_i32 : i32
    %c0_i32_5 = arith.constant 0 : i32
    %14 = arith.cmpi eq, %arg2, %c0_i32_5 : i32
    %15 = arith.andi %13, %14 : i1
    %16 = arith.extui %15 : i1 to i32
    %c0_i32_6 = arith.constant 0 : i32
    %17 = arith.cmpi ne, %16, %c0_i32_6 : i32
    scf.if %17 {
      %cst_9 = arith.constant 0.000000e+00 : f32
      %23 = vector.broadcast %cst_9 : f32 to vector<128x128xf32>
      %c0_10 = arith.constant 0 : index
      %c0_11 = arith.constant 0 : index
      %24 = vector.load %arg9[%c0_10, %c0_11] : memref<128x128xf32, #tpu.memory_space<vmem>>, vector<128x128xf32>
      tpu.vector_store %arg9[%c0_10, %c0_11], %23 {strides = array<i32>} : memref<128x128xf32, #tpu.memory_space<vmem>>, vector<128x128xf32>,
      %cst_12 = arith.constant 0.000000e+00 : f32
      %25 = vector.broadcast %cst_12 : f32 to vector<1x128xf32>
      %c0_13 = arith.constant 0 : index
      %c0_14 = arith.constant 0 : index
      %26 = vector.load %arg10[%c0_13, %c0_14] : memref<1x128xf32, #tpu.memory_space<vmem>>, vector<1x128xf32>
      tpu.vector_store %arg10[%c0_13, %c0_14], %25 {strides = array<i32>} : memref<1x128xf32, #tpu.memory_space<vmem>>, vector<1x128xf32>,
    } else {
    }
    %18 = arith.extui %13 : i1 to i32
    %c0_i32_7 = arith.constant 0 : i32
    %19 = arith.cmpi ne, %18, %c0_i32_7 : i32
    scf.if %19 {
      %c0_9 = arith.constant 0 : index
      %c0_10 = arith.constant 0 : index
      %23 = vector.load %arg7[%c0_9, %c0_10] : memref<128x128xf32, #tpu.memory_space<vmem>>, vector<128x128xf32>
      %cst_11 = arith.constant dense<0.000000e+00> : vector<16x128xf32>
      %24 = tpu.matmul %6, %23, %cst_11 {dimension_numbers = #tpu.dot_dimension_numbers<[1], [0], [0], [1], [0, 0, 1, 1], [], []>} : vector<16x128xf32>, vector<128x128xf32>, vector<16x128xf32> -> vector<16x128xf32>
      %25 = vector.broadcast %12 : vector<1x128xf32> to vector<16x128xf32>
      %26 = arith.addf %24, %25 : vector<16x128xf32>
      %cst_12 = arith.constant dense<0xFF800000> : vector<16xf32>
      %27 = vector.multi_reduction <maximumf>, %26, %cst_12 [1] : vector<16x128xf32> to vector<16xf32>
      %28 = vector.shape_cast %27 : vector<16xf32> to vector<16x1xf32>
      %29 = vector.broadcast %28 : vector<16x1xf32> to vector<16x128xf32>
      %30 = arith.subf %26, %29 : vector<16x128xf32>
      %31 = math.exp %30 : vector<16x128xf32>
      %cst_13 = arith.constant dense<0.000000e+00> : vector<16xf32>
      %32 = vector.multi_reduction <add>, %31, %cst_13 [1] : vector<16x128xf32> to vector<16xf32>
      %33 = vector.shape_cast %32 : vector<16xf32> to vector<16x1xf32>
      %34 = tpu.reciprocal %33 {approx = true} : vector<16x1xf32> -> vector<16x1xf32>
      %35 = vector.broadcast %34 : vector<16x1xf32> to vector<16x128xf32>
      %36 = arith.mulf %31, %35 : vector<16x128xf32>
      %c0_14 = arith.constant 0 : index
      %c0_15 = arith.constant 0 : index
      %37 = vector.load %arg10[%c0_14, %c0_15] : memref<1x128xf32, #tpu.memory_space<vmem>>, vector<1x128xf32>
      %cst_16 = arith.constant dense<0.000000e+00> : vector<128xf32>
      %38 = vector.multi_reduction <add>, %36, %cst_16 [0] : vector<16x128xf32> to vector<128xf32>
      %39 = vector.shape_cast %38 : vector<128xf32> to vector<1x128xf32>
      %40 = arith.addf %37, %39 : vector<1x128xf32>
      %c0_17 = arith.constant 0 : index
      %c0_18 = arith.constant 0 : index
      %41 = vector.load %arg10[%c0_17, %c0_18] : memref<1x128xf32, #tpu.memory_space<vmem>>, vector<1x128xf32>
      tpu.vector_store %arg10[%c0_17, %c0_18], %40 {strides = array<i32>} : memref<1x128xf32, #tpu.memory_space<vmem>>, vector<1x128xf32>,
      %c0_19 = arith.constant 0 : index
      %c0_20 = arith.constant 0 : index
      %42 = vector.load %arg9[%c0_19, %c0_20] : memref<128x128xf32, #tpu.memory_space<vmem>>, vector<128x128xf32>
      %cst_21 = arith.constant dense<0.000000e+00> : vector<128x128xf32>
      %43 = tpu.matmul %6, %36, %cst_21 {dimension_numbers = #tpu.dot_dimension_numbers<[0], [0], [1], [1], [0, 1, 1, 1], [], []>} : vector<16x128xf32>, vector<16x128xf32>, vector<128x128xf32> -> vector<128x128xf32>
      %44 = arith.addf %42, %43 : vector<128x128xf32>
      %c0_22 = arith.constant 0 : index
      %c0_23 = arith.constant 0 : index
      %45 = vector.load %arg9[%c0_22, %c0_23] : memref<128x128xf32, #tpu.memory_space<vmem>>, vector<128x128xf32>
      tpu.vector_store %arg9[%c0_22, %c0_23], %44 {strides = array<i32>} : memref<128x128xf32, #tpu.memory_space<vmem>>, vector<128x128xf32>,
      %c0_i32_24 = arith.constant 0 : i32
      %46 = arith.cmpi eq, %arg2, %c0_i32_24 : i32
      %47 = arith.extui %46 : i1 to i32
      %c0_i32_25 = arith.constant 0 : i32
      %48 = arith.cmpi ne, %47, %c0_i32_25 : i32
      scf.if %48 {
        %c2_i32 = arith.constant 2 : i32
        %49 = arith.cmpi eq, %arg1, %c2_i32 : i32
        %50 = arith.extui %49 : i1 to i32
        %c0_i32_26 = arith.constant 0 : i32
        %51 = arith.cmpi ne, %50, %c0_i32_26 : i32
        scf.if %51 {
          %c0_36 = arith.constant 0 : index
          %c0_37 = arith.constant 0 : index
          %69 = vector.load %arg7[%c0_36, %c0_37] : memref<128x128xf32, #tpu.memory_space<vmem>>, vector<128x128xf32>
          %c0_38 = arith.constant 0 : index
          %c0_39 = arith.constant 0 : index
          %70 = vector.load %arg8[%c0_38, %c0_39] : memref<128x128xf32, #tpu.memory_space<vmem>>, vector<128x128xf32>
          tpu.vector_store %arg8[%c0_38, %c0_39], %69 {strides = array<i32>} : memref<128x128xf32, #tpu.memory_space<vmem>>, vector<128x128xf32>,
        } else {
        }
        %c0_27 = arith.constant 0 : index
        %c0_28 = arith.constant 0 : index
        %52 = vector.load %arg9[%c0_27, %c0_28] : memref<128x128xf32, #tpu.memory_space<vmem>>, vector<128x128xf32>
        %c0_29 = arith.constant 0 : index
        %c0_30 = arith.constant 0 : index
        %53 = vector.load %arg10[%c0_29, %c0_30] : memref<1x128xf32, #tpu.memory_space<vmem>>, vector<1x128xf32>
        %cst_31 = arith.constant 9.99999997E-7 : f32
        %54 = vector.broadcast %cst_31 : f32 to vector<1x128xf32>
        %55 = arith.addf %54, %53 : vector<1x128xf32>
        %56 = tpu.reciprocal %55 {approx = true} : vector<1x128xf32> -> vector<1x128xf32>
        %57 = vector.broadcast %56 : vector<1x128xf32> to vector<128x128xf32>
        %58 = arith.mulf %52, %57 : vector<128x128xf32>
        %59 = arith.mulf %58, %58 : vector<128x128xf32>
        %cst_32 = arith.constant dense<0.000000e+00> : vector<128xf32>
        %60 = vector.multi_reduction <add>, %59, %cst_32 [0] : vector<128x128xf32> to vector<128xf32>
        %61 = vector.shape_cast %60 : vector<128xf32> to vector<1x128xf32>
        %62 = math.sqrt %61 : vector<1x128xf32>
        %cst_33 = arith.constant 9.99999997E-7 : f32
        %63 = vector.broadcast %cst_33 : f32 to vector<1x128xf32>
        %64 = arith.addf %63, %62 : vector<1x128xf32>
        %65 = tpu.reciprocal %64 {approx = true} : vector<1x128xf32> -> vector<1x128xf32>
        %66 = vector.broadcast %65 : vector<1x128xf32> to vector<128x128xf32>
        %67 = arith.mulf %58, %66 : vector<128x128xf32>
        %c0_34 = arith.constant 0 : index
        %c0_35 = arith.constant 0 : index
        %68 = vector.load %arg7[%c0_34, %c0_35] : memref<128x128xf32, #tpu.memory_space<vmem>>, vector<128x128xf32>
        tpu.vector_store %arg7[%c0_34, %c0_35], %67 {strides = array<i32>} : memref<128x128xf32, #tpu.memory_space<vmem>>, vector<128x128xf32>,
      } else {
      }
    } else {
    }
    %true = arith.constant true
    %20 = arith.xori %13, %true : i1
    %21 = arith.extui %20 : i1 to i32
    %c0_i32_8 = arith.constant 0 : i32
    %22 = arith.cmpi ne, %21, %c0_i32_8 : i32
    scf.if %22 {
      %c0_9 = arith.constant 0 : index
      %c0_10 = arith.constant 0 : index
      %23 = vector.load %arg8[%c0_9, %c0_10] : memref<128x128xf32, #tpu.memory_space<vmem>>, vector<128x128xf32>
      %cst_11 = arith.constant dense<0.000000e+00> : vector<16x128xf32>
      %24 = tpu.matmul %6, %23, %cst_11 {dimension_numbers = #tpu.dot_dimension_numbers<[1], [0], [0], [1], [0, 0, 1, 1], [], []>} : vector<16x128xf32>, vector<128x128xf32>, vector<16x128xf32> -> vector<16x128xf32>
      %25 = vector.broadcast %12 : vector<1x128xf32> to vector<16x128xf32>
      %26 = arith.addf %24, %25 : vector<16x128xf32>
      %cst_12 = arith.constant dense<0xFF800000> : vector<16xf32>
      %27 = vector.multi_reduction <maximumf>, %26, %cst_12 [1] : vector<16x128xf32> to vector<16xf32>
      %28 = vector.shape_cast %27 : vector<16xf32> to vector<16x1xf32>
      %29 = vector.broadcast %28 : vector<16x1xf32> to vector<16x128xf32>
      %30 = arith.subf %26, %29 : vector<16x128xf32>
      %31 = math.exp %30 : vector<16x128xf32>
      %cst_13 = arith.constant dense<0.000000e+00> : vector<16xf32>
      %32 = vector.multi_reduction <add>, %31, %cst_13 [1] : vector<16x128xf32> to vector<16xf32>
      %33 = vector.shape_cast %32 : vector<16xf32> to vector<16x1xf32>
      %34 = tpu.reciprocal %33 {approx = true} : vector<16x1xf32> -> vector<16x1xf32>
      %35 = vector.broadcast %34 : vector<16x1xf32> to vector<16x128xf32>
      %36 = arith.mulf %31, %35 : vector<16x128xf32>
      %c0_14 = arith.constant 0 : index
      %c0_15 = arith.constant 0 : index
      %37 = vector.load %arg7[%c0_14, %c0_15] : memref<128x128xf32, #tpu.memory_space<vmem>>, vector<128x128xf32>
      %cst_16 = arith.constant dense<0.000000e+00> : vector<16x128xf32>
      %38 = tpu.matmul %36, %37, %cst_16 {dimension_numbers = #tpu.dot_dimension_numbers<[1], [1], [0], [0], [0, 0, 1, 0], [], []>} : vector<16x128xf32>, vector<128x128xf32>, vector<16x128xf32> -> vector<16x128xf32>
      %cst_17 = arith.constant 0.000000e+00 : f32
      %39 = vector.broadcast %cst_17 : f32 to vector<16x128xf32>
      %40 = arith.maximumf %38, %39 : vector<16x128xf32>
      %c0_18 = arith.constant 0 : index
      %c0_19 = arith.constant 0 : index
      %c0_20 = arith.constant 0 : index
      %41 = vector.load %arg5[%c0_18, %c0_19, %c0_20] : memref<1x16x128xf32, #tpu.memory_space<vmem>>, vector<1x16x128xf32>
      %42 = vector.shape_cast %41 : vector<1x16x128xf32> to vector<16x128xf32>
      %43 = vector.shape_cast %40 : vector<16x128xf32> to vector<1x16x128xf32>
      tpu.vector_store %arg5[%c0_18, %c0_19, %c0_20], %43 {strides = array<i32>} : memref<1x16x128xf32, #tpu.memory_space<vmem>>, vector<1x16x128xf32>,
      %c0_21 = arith.constant 0 : index
      %c0_22 = arith.constant 0 : index
      %44 = vector.load %arg7[%c0_21, %c0_22] : memref<128x128xf32, #tpu.memory_space<vmem>>, vector<128x128xf32>
      %c0_23 = arith.constant 0 : index
      %c0_24 = arith.constant 0 : index
      %c0_25 = arith.constant 0 : index
      %45 = vector.load %arg6[%c0_23, %c0_24, %c0_25] : memref<1x128x128xf32, #tpu.memory_space<vmem>>, vector<1x128x128xf32>
      %46 = vector.shape_cast %45 : vector<1x128x128xf32> to vector<128x128xf32>
      %47 = vector.shape_cast %44 : vector<128x128xf32> to vector<1x128x128xf32>
      tpu.vector_store %arg6[%c0_23, %c0_24, %c0_25], %47 {strides = array<i32>} : memref<1x128x128xf32, #tpu.memory_space<vmem>>, vector<1x128x128xf32>,
    } else {
    }
    return
  }
  func.func @transform_0(%arg0: i32, %arg1: i32, %arg2: i32) -> (i32, i32, i32) {
    %c0_i32 = arith.constant 0 : i32
    %c0_i32_0 = arith.constant 0 : i32
    return %arg0, %arg2, %c0_i32 : i32, i32, i32
  }
  func.func @transform_1(%arg0: i32, %arg1: i32, %arg2: i32) -> (i32, i32, i32) {
    %c0_i32 = arith.constant 0 : i32
    %c0_i32_0 = arith.constant 0 : i32
    %c0_i32_1 = arith.constant 0 : i32
    %c0_i32_2 = arith.constant 0 : i32
    return %c0_i32, %c0_i32_0, %c0_i32_1 : i32, i32, i32
  }
  func.func @transform_2(%arg0: i32, %arg1: i32, %arg2: i32) -> (i32, i32, i32) {
    %c0_i32 = arith.constant 0 : i32
    %c0_i32_0 = arith.constant 0 : i32
    return %arg0, %arg2, %c0_i32 : i32, i32, i32
  }
  func.func @transform_3(%arg0: i32, %arg1: i32, %arg2: i32) -> (i32, i32, i32) {
    %c0_i32 = arith.constant 0 : i32
    %c0_i32_0 = arith.constant 0 : i32
    %c0_i32_1 = arith.constant 0 : i32
    return %arg0, %c0_i32, %c0_i32_0 : i32, i32, i32
  }
}

module attributes {stable_mosaic.version = 11 : i64} {
  func.func @_mm_res_kernel(%arg0: i32, %arg1: i32, %arg2: i32, %arg3: i32, %arg4: memref<1x16x128xbf16, #tpu.memory_space<vmem>>, %arg5: memref<1x128x128xbf16, #tpu.memory_space<vmem>>, %arg6: memref<1x128xf32, #tpu.memory_space<vmem>>, %arg7: memref<1x128xf32, #tpu.memory_space<vmem>>, %arg8: memref<1x16x128xf32, #tpu.memory_space<vmem>>, %arg9: memref<1x16x128xf32, #tpu.memory_space<vmem>>, %arg10: memref<16x128xf32, #tpu.memory_space<vmem>>) attributes {dimension_semantics = [#tpu.dimension_semantics<parallel>, #tpu.dimension_semantics<parallel>, #tpu.dimension_semantics<parallel>, #tpu.dimension_semantics<arbitrary>], iteration_bounds = array<i64: 2, 1, 1, 1>, scalar_prefetch = 0 : i64, scratch_operands = 1 : i64, tpu.core_type = #tpu.core_type<tc>, window_params = [{transform_indices = @transform_0, window_bounds = array<i64: 1, 16, 128>}, {transform_indices = @transform_1, window_bounds = array<i64: 1, 128, 128>}, {transform_indices = @transform_2, window_bounds = array<i64: 1, 128>}, {transform_indices = @transform_3, window_bounds = array<i64: 1, 128>}, {transform_indices = @transform_4, window_bounds = array<i64: 1, 16, 128>}, {transform_indices = @transform_5, window_bounds = array<i64: 1, 16, 128>}]} {
    %c0_i32 = arith.constant 0 : i32
    %0 = arith.cmpi eq, %arg3, %c0_i32 : i32
    %1 = arith.extui %0 : i1 to i32
    %c0_i32_0 = arith.constant 0 : i32
    %2 = arith.cmpi ne, %1, %c0_i32_0 : i32
    scf.if %2 {
      %cst_12 = arith.constant 0.000000e+00 : f32
      %14 = vector.broadcast %cst_12 : f32 to vector<16x128xf32>
      %c0_13 = arith.constant 0 : index
      %c0_14 = arith.constant 0 : index
      %15 = vector.load %arg10[%c0_13, %c0_14] : memref<16x128xf32, #tpu.memory_space<vmem>>, vector<16x128xf32>
      tpu.vector_store %arg10[%c0_13, %c0_14], %14 {strides = array<i32>} : memref<16x128xf32, #tpu.memory_space<vmem>>, vector<16x128xf32>,
    } else {
    }
    %c0 = arith.constant 0 : index
    %c0_1 = arith.constant 0 : index
    %3 = vector.load %arg10[%c0, %c0_1] : memref<16x128xf32, #tpu.memory_space<vmem>>, vector<16x128xf32>
    %c0_2 = arith.constant 0 : index
    %c0_3 = arith.constant 0 : index
    %c0_4 = arith.constant 0 : index
    %4 = vector.load %arg4[%c0_2, %c0_3, %c0_4] : memref<1x16x128xbf16, #tpu.memory_space<vmem>>, vector<1x16x128xbf16>
    %5 = vector.shape_cast %4 : vector<1x16x128xbf16> to vector<16x128xbf16>
    %c0_5 = arith.constant 0 : index
    %c0_6 = arith.constant 0 : index
    %c0_7 = arith.constant 0 : index
    %6 = vector.load %arg5[%c0_5, %c0_6, %c0_7] : memref<1x128x128xbf16, #tpu.memory_space<vmem>>, vector<1x128x128xbf16>
    %7 = vector.shape_cast %6 : vector<1x128x128xbf16> to vector<128x128xbf16>
    %cst = arith.constant dense<0.000000e+00> : vector<16x128xf32>
    %8 = tpu.matmul %5, %7, %cst {dimension_numbers = #tpu.dot_dimension_numbers<[1], [0], [0], [1], [0, 0, 1, 1], [], []>} : vector<16x128xbf16>, vector<128x128xbf16>, vector<16x128xf32> -> vector<16x128xf32>
    %9 = arith.addf %3, %8 : vector<16x128xf32>
    %c0_8 = arith.constant 0 : index
    %c0_9 = arith.constant 0 : index
    %10 = vector.load %arg10[%c0_8, %c0_9] : memref<16x128xf32, #tpu.memory_space<vmem>>, vector<16x128xf32>
    tpu.vector_store %arg10[%c0_8, %c0_9], %9 {strides = array<i32>} : memref<16x128xf32, #tpu.memory_space<vmem>>, vector<16x128xf32>,
    %c0_i32_10 = arith.constant 0 : i32
    %11 = arith.cmpi eq, %arg3, %c0_i32_10 : i32
    %12 = arith.extui %11 : i1 to i32
    %c0_i32_11 = arith.constant 0 : i32
    %13 = arith.cmpi ne, %12, %c0_i32_11 : i32
    scf.if %13 {
      %c0_12 = arith.constant 0 : index
      %c0_13 = arith.constant 0 : index
      %14 = vector.load %arg10[%c0_12, %c0_13] : memref<16x128xf32, #tpu.memory_space<vmem>>, vector<16x128xf32>
      %c0_14 = arith.constant 0 : index
      %c0_15 = arith.constant 0 : index
      %15 = vector.load %arg6[%c0_14, %c0_15] : memref<1x128xf32, #tpu.memory_space<vmem>>, vector<1x128xf32>
      %16 = vector.broadcast %15 : vector<1x128xf32> to vector<16x128xf32>
      %17 = arith.mulf %14, %16 : vector<16x128xf32>
      %c0_16 = arith.constant 0 : index
      %c0_17 = arith.constant 0 : index
      %18 = vector.load %arg7[%c0_16, %c0_17] : memref<1x128xf32, #tpu.memory_space<vmem>>, vector<1x128xf32>
      %19 = vector.broadcast %18 : vector<1x128xf32> to vector<16x128xf32>
      %20 = arith.addf %17, %19 : vector<16x128xf32>
      %c0_18 = arith.constant 0 : index
      %c0_19 = arith.constant 0 : index
      %c0_20 = arith.constant 0 : index
      %21 = vector.load %arg8[%c0_18, %c0_19, %c0_20] : memref<1x16x128xf32, #tpu.memory_space<vmem>>, vector<1x16x128xf32>
      %22 = vector.shape_cast %21 : vector<1x16x128xf32> to vector<16x128xf32>
      %23 = arith.addf %20, %22 : vector<16x128xf32>
      %cst_21 = arith.constant 0.000000e+00 : f32
      %24 = vector.broadcast %cst_21 : f32 to vector<16x128xf32>
      %25 = arith.maximumf %23, %24 : vector<16x128xf32>
      %c0_22 = arith.constant 0 : index
      %c0_23 = arith.constant 0 : index
      %c0_24 = arith.constant 0 : index
      %26 = vector.load %arg9[%c0_22, %c0_23, %c0_24] : memref<1x16x128xf32, #tpu.memory_space<vmem>>, vector<1x16x128xf32>
      %27 = vector.shape_cast %26 : vector<1x16x128xf32> to vector<16x128xf32>
      %28 = vector.shape_cast %25 : vector<16x128xf32> to vector<1x16x128xf32>
      tpu.vector_store %arg9[%c0_22, %c0_23, %c0_24], %28 {strides = array<i32>} : memref<1x16x128xf32, #tpu.memory_space<vmem>>, vector<1x16x128xf32>,
    } else {
    }
    return
  }
  func.func @transform_0(%arg0: i32, %arg1: i32, %arg2: i32, %arg3: i32) -> (i32, i32, i32) {
    %c0_i32 = arith.constant 0 : i32
    return %arg0, %arg1, %arg3 : i32, i32, i32
  }
  func.func @transform_1(%arg0: i32, %arg1: i32, %arg2: i32, %arg3: i32) -> (i32, i32, i32) {
    %c0_i32 = arith.constant 0 : i32
    %c0_i32_0 = arith.constant 0 : i32
    return %c0_i32, %arg3, %arg2 : i32, i32, i32
  }
  func.func @transform_2(%arg0: i32, %arg1: i32, %arg2: i32, %arg3: i32) -> (i32, i32) {
    %c0_i32 = arith.constant 0 : i32
    %c0_i32_0 = arith.constant 0 : i32
    return %c0_i32, %arg2 : i32, i32
  }
  func.func @transform_3(%arg0: i32, %arg1: i32, %arg2: i32, %arg3: i32) -> (i32, i32) {
    %c0_i32 = arith.constant 0 : i32
    %c0_i32_0 = arith.constant 0 : i32
    return %c0_i32, %arg2 : i32, i32
  }
  func.func @transform_4(%arg0: i32, %arg1: i32, %arg2: i32, %arg3: i32) -> (i32, i32, i32) {
    %c0_i32 = arith.constant 0 : i32
    return %arg0, %arg1, %arg2 : i32, i32, i32
  }
  func.func @transform_5(%arg0: i32, %arg1: i32, %arg2: i32, %arg3: i32) -> (i32, i32, i32) {
    %c0_i32 = arith.constant 0 : i32
    return %arg0, %arg1, %arg2 : i32, i32, i32
  }
}

module attributes {stable_mosaic.version = 11 : i64} {
  func.func @_mm_kernel(%arg0: i32, %arg1: i32, %arg2: i32, %arg3: i32, %arg4: memref<1x16x128xbf16, #tpu.memory_space<vmem>>, %arg5: memref<1x128x128xbf16, #tpu.memory_space<vmem>>, %arg6: memref<1x128xf32, #tpu.memory_space<vmem>>, %arg7: memref<1x128xf32, #tpu.memory_space<vmem>>, %arg8: memref<1x16x128xf32, #tpu.memory_space<vmem>>, %arg9: memref<16x128xf32, #tpu.memory_space<vmem>>) attributes {dimension_semantics = [#tpu.dimension_semantics<parallel>, #tpu.dimension_semantics<parallel>, #tpu.dimension_semantics<parallel>, #tpu.dimension_semantics<arbitrary>], iteration_bounds = array<i64: 2, 1, 1, 1>, scalar_prefetch = 0 : i64, scratch_operands = 1 : i64, tpu.core_type = #tpu.core_type<tc>, window_params = [{transform_indices = @transform_0, window_bounds = array<i64: 1, 16, 128>}, {transform_indices = @transform_1, window_bounds = array<i64: 1, 128, 128>}, {transform_indices = @transform_2, window_bounds = array<i64: 1, 128>}, {transform_indices = @transform_3, window_bounds = array<i64: 1, 128>}, {transform_indices = @transform_4, window_bounds = array<i64: 1, 16, 128>}]} {
    %c0_i32 = arith.constant 0 : i32
    %0 = arith.cmpi eq, %arg3, %c0_i32 : i32
    %1 = arith.extui %0 : i1 to i32
    %c0_i32_0 = arith.constant 0 : i32
    %2 = arith.cmpi ne, %1, %c0_i32_0 : i32
    scf.if %2 {
      %cst_12 = arith.constant 0.000000e+00 : f32
      %14 = vector.broadcast %cst_12 : f32 to vector<16x128xf32>
      %c0_13 = arith.constant 0 : index
      %c0_14 = arith.constant 0 : index
      %15 = vector.load %arg9[%c0_13, %c0_14] : memref<16x128xf32, #tpu.memory_space<vmem>>, vector<16x128xf32>
      tpu.vector_store %arg9[%c0_13, %c0_14], %14 {strides = array<i32>} : memref<16x128xf32, #tpu.memory_space<vmem>>, vector<16x128xf32>,
    } else {
    }
    %c0 = arith.constant 0 : index
    %c0_1 = arith.constant 0 : index
    %3 = vector.load %arg9[%c0, %c0_1] : memref<16x128xf32, #tpu.memory_space<vmem>>, vector<16x128xf32>
    %c0_2 = arith.constant 0 : index
    %c0_3 = arith.constant 0 : index
    %c0_4 = arith.constant 0 : index
    %4 = vector.load %arg4[%c0_2, %c0_3, %c0_4] : memref<1x16x128xbf16, #tpu.memory_space<vmem>>, vector<1x16x128xbf16>
    %5 = vector.shape_cast %4 : vector<1x16x128xbf16> to vector<16x128xbf16>
    %c0_5 = arith.constant 0 : index
    %c0_6 = arith.constant 0 : index
    %c0_7 = arith.constant 0 : index
    %6 = vector.load %arg5[%c0_5, %c0_6, %c0_7] : memref<1x128x128xbf16, #tpu.memory_space<vmem>>, vector<1x128x128xbf16>
    %7 = vector.shape_cast %6 : vector<1x128x128xbf16> to vector<128x128xbf16>
    %cst = arith.constant dense<0.000000e+00> : vector<16x128xf32>
    %8 = tpu.matmul %5, %7, %cst {dimension_numbers = #tpu.dot_dimension_numbers<[1], [0], [0], [1], [0, 0, 1, 1], [], []>} : vector<16x128xbf16>, vector<128x128xbf16>, vector<16x128xf32> -> vector<16x128xf32>
    %9 = arith.addf %3, %8 : vector<16x128xf32>
    %c0_8 = arith.constant 0 : index
    %c0_9 = arith.constant 0 : index
    %10 = vector.load %arg9[%c0_8, %c0_9] : memref<16x128xf32, #tpu.memory_space<vmem>>, vector<16x128xf32>
    tpu.vector_store %arg9[%c0_8, %c0_9], %9 {strides = array<i32>} : memref<16x128xf32, #tpu.memory_space<vmem>>, vector<16x128xf32>,
    %c0_i32_10 = arith.constant 0 : i32
    %11 = arith.cmpi eq, %arg3, %c0_i32_10 : i32
    %12 = arith.extui %11 : i1 to i32
    %c0_i32_11 = arith.constant 0 : i32
    %13 = arith.cmpi ne, %12, %c0_i32_11 : i32
    scf.if %13 {
      %c0_12 = arith.constant 0 : index
      %c0_13 = arith.constant 0 : index
      %14 = vector.load %arg9[%c0_12, %c0_13] : memref<16x128xf32, #tpu.memory_space<vmem>>, vector<16x128xf32>
      %c0_14 = arith.constant 0 : index
      %c0_15 = arith.constant 0 : index
      %15 = vector.load %arg6[%c0_14, %c0_15] : memref<1x128xf32, #tpu.memory_space<vmem>>, vector<1x128xf32>
      %16 = vector.broadcast %15 : vector<1x128xf32> to vector<16x128xf32>
      %17 = arith.mulf %14, %16 : vector<16x128xf32>
      %c0_16 = arith.constant 0 : index
      %c0_17 = arith.constant 0 : index
      %18 = vector.load %arg7[%c0_16, %c0_17] : memref<1x128xf32, #tpu.memory_space<vmem>>, vector<1x128xf32>
      %19 = vector.broadcast %18 : vector<1x128xf32> to vector<16x128xf32>
      %20 = arith.addf %17, %19 : vector<16x128xf32>
      %c0_18 = arith.constant 0 : index
      %c0_19 = arith.constant 0 : index
      %c0_20 = arith.constant 0 : index
      %21 = vector.load %arg8[%c0_18, %c0_19, %c0_20] : memref<1x16x128xf32, #tpu.memory_space<vmem>>, vector<1x16x128xf32>
      %22 = vector.shape_cast %21 : vector<1x16x128xf32> to vector<16x128xf32>
      %23 = vector.shape_cast %20 : vector<16x128xf32> to vector<1x16x128xf32>
      tpu.vector_store %arg8[%c0_18, %c0_19, %c0_20], %23 {strides = array<i32>} : memref<1x16x128xf32, #tpu.memory_space<vmem>>, vector<1x16x128xf32>,
    } else {
    }
    return
  }
  func.func @transform_0(%arg0: i32, %arg1: i32, %arg2: i32, %arg3: i32) -> (i32, i32, i32) {
    %c0_i32 = arith.constant 0 : i32
    return %arg0, %arg1, %arg3 : i32, i32, i32
  }
  func.func @transform_1(%arg0: i32, %arg1: i32, %arg2: i32, %arg3: i32) -> (i32, i32, i32) {
    %c0_i32 = arith.constant 0 : i32
    %c0_i32_0 = arith.constant 0 : i32
    return %c0_i32, %arg3, %arg2 : i32, i32, i32
  }
  func.func @transform_2(%arg0: i32, %arg1: i32, %arg2: i32, %arg3: i32) -> (i32, i32) {
    %c0_i32 = arith.constant 0 : i32
    %c0_i32_0 = arith.constant 0 : i32
    return %c0_i32, %arg2 : i32, i32
  }
  func.func @transform_3(%arg0: i32, %arg1: i32, %arg2: i32, %arg3: i32) -> (i32, i32) {
    %c0_i32 = arith.constant 0 : i32
    %c0_i32_0 = arith.constant 0 : i32
    return %c0_i32, %arg2 : i32, i32
  }
  func.func @transform_4(%arg0: i32, %arg1: i32, %arg2: i32, %arg3: i32) -> (i32, i32, i32) {
    %c0_i32 = arith.constant 0 : i32
    return %arg0, %arg1, %arg2 : i32, i32, i32
  }
}

module attributes {stable_mosaic.version = 11 : i64} {
  func.func @_conv3x3_kernel(%arg0: i32, %arg1: i32, %arg2: i32, %arg3: memref<1x1x6x128xbf16, #tpu.memory_space<vmem>>, %arg4: memref<1x1x6x128xbf16, #tpu.memory_space<vmem>>, %arg5: memref<1x1x6x128xbf16, #tpu.memory_space<vmem>>, %arg6: memref<9x128x128xbf16, #tpu.memory_space<vmem>>, %arg7: memref<1x128xf32, #tpu.memory_space<vmem>>, %arg8: memref<1x128xf32, #tpu.memory_space<vmem>>, %arg9: memref<1x1x4x128xf32, #tpu.memory_space<vmem>>) attributes {dimension_semantics = [#tpu.dimension_semantics<parallel>, #tpu.dimension_semantics<parallel>, #tpu.dimension_semantics<parallel>], iteration_bounds = array<i64: 2, 4, 1>, scalar_prefetch = 0 : i64, scratch_operands = 0 : i64, tpu.core_type = #tpu.core_type<tc>, window_params = [{transform_indices = @transform_0, window_bounds = array<i64: 1, 1, 6, 128>}, {transform_indices = @transform_1, window_bounds = array<i64: 1, 1, 6, 128>}, {transform_indices = @transform_2, window_bounds = array<i64: 1, 1, 6, 128>}, {transform_indices = @transform_3, window_bounds = array<i64: 9, 128, 128>}, {transform_indices = @transform_4, window_bounds = array<i64: 1, 128>}, {transform_indices = @transform_5, window_bounds = array<i64: 1, 128>}, {transform_indices = @transform_6, window_bounds = array<i64: 1, 1, 4, 128>}]} {
    %c0 = arith.constant 0 : index
    %c0_0 = arith.constant 0 : index
    %c0_1 = arith.constant 0 : index
    %c0_2 = arith.constant 0 : index
    %0 = vector.load %arg3[%c0, %c0_0, %c0_1, %c0_2] : memref<1x1x6x128xbf16, #tpu.memory_space<vmem>>, vector<1x1x6x128xbf16>
    %1 = vector.shape_cast %0 : vector<1x1x6x128xbf16> to vector<6x128xbf16>
    %c0_3 = arith.constant 0 : index
    %c0_4 = arith.constant 0 : index
    %c0_5 = arith.constant 0 : index
    %c0_6 = arith.constant 0 : index
    %2 = vector.load %arg4[%c0_3, %c0_4, %c0_5, %c0_6] : memref<1x1x6x128xbf16, #tpu.memory_space<vmem>>, vector<1x1x6x128xbf16>
    %3 = vector.shape_cast %2 : vector<1x1x6x128xbf16> to vector<6x128xbf16>
    %c0_7 = arith.constant 0 : index
    %c0_8 = arith.constant 0 : index
    %c0_9 = arith.constant 0 : index
    %c0_10 = arith.constant 0 : index
    %4 = vector.load %arg5[%c0_7, %c0_8, %c0_9, %c0_10] : memref<1x1x6x128xbf16, #tpu.memory_space<vmem>>, vector<1x1x6x128xbf16>
    %5 = vector.shape_cast %4 : vector<1x1x6x128xbf16> to vector<6x128xbf16>
    %cst = arith.constant 0.000000e+00 : f32
    %6 = vector.broadcast %cst : f32 to vector<4x128xf32>
    %7 = vector.extract_strided_slice %1 {offsets = [0, 0], sizes = [4, 128], strides = [1, 1]} : vector<6x128xbf16> to vector<4x128xbf16>
    %c0_11 = arith.constant 0 : index
    %c0_12 = arith.constant 0 : index
    %c0_13 = arith.constant 0 : index
    %8 = vector.load %arg6[%c0_11, %c0_12, %c0_13] : memref<9x128x128xbf16, #tpu.memory_space<vmem>>, vector<1x128x128xbf16>
    %9 = vector.shape_cast %8 : vector<1x128x128xbf16> to vector<128x128xbf16>
    %cst_14 = arith.constant dense<0.000000e+00> : vector<4x128xf32>
    %10 = tpu.matmul %7, %9, %cst_14 {dimension_numbers = #tpu.dot_dimension_numbers<[1], [0], [0], [1], [0, 0, 1, 1], [], []>} : vector<4x128xbf16>, vector<128x128xbf16>, vector<4x128xf32> -> vector<4x128xf32>
    %11 = arith.addf %6, %10 : vector<4x128xf32>
    %12 = vector.extract_strided_slice %1 {offsets = [1, 0], sizes = [4, 128], strides = [1, 1]} : vector<6x128xbf16> to vector<4x128xbf16>
    %c1 = arith.constant 1 : index
    %c0_15 = arith.constant 0 : index
    %c0_16 = arith.constant 0 : index
    %13 = vector.load %arg6[%c1, %c0_15, %c0_16] : memref<9x128x128xbf16, #tpu.memory_space<vmem>>, vector<1x128x128xbf16>
    %14 = vector.shape_cast %13 : vector<1x128x128xbf16> to vector<128x128xbf16>
    %cst_17 = arith.constant dense<0.000000e+00> : vector<4x128xf32>
    %15 = tpu.matmul %12, %14, %cst_17 {dimension_numbers = #tpu.dot_dimension_numbers<[1], [0], [0], [1], [0, 0, 1, 1], [], []>} : vector<4x128xbf16>, vector<128x128xbf16>, vector<4x128xf32> -> vector<4x128xf32>
    %16 = arith.addf %11, %15 : vector<4x128xf32>
    %17 = vector.extract_strided_slice %1 {offsets = [2, 0], sizes = [4, 128], strides = [1, 1]} : vector<6x128xbf16> to vector<4x128xbf16>
    %c2 = arith.constant 2 : index
    %c0_18 = arith.constant 0 : index
    %c0_19 = arith.constant 0 : index
    %18 = vector.load %arg6[%c2, %c0_18, %c0_19] : memref<9x128x128xbf16, #tpu.memory_space<vmem>>, vector<1x128x128xbf16>
    %19 = vector.shape_cast %18 : vector<1x128x128xbf16> to vector<128x128xbf16>
    %cst_20 = arith.constant dense<0.000000e+00> : vector<4x128xf32>
    %20 = tpu.matmul %17, %19, %cst_20 {dimension_numbers = #tpu.dot_dimension_numbers<[1], [0], [0], [1], [0, 0, 1, 1], [], []>} : vector<4x128xbf16>, vector<128x128xbf16>, vector<4x128xf32> -> vector<4x128xf32>
    %21 = arith.addf %16, %20 : vector<4x128xf32>
    %22 = vector.extract_strided_slice %3 {offsets = [0, 0], sizes = [4, 128], strides = [1, 1]} : vector<6x128xbf16> to vector<4x128xbf16>
    %c3 = arith.constant 3 : index
    %c0_21 = arith.constant 0 : index
    %c0_22 = arith.constant 0 : index
    %23 = vector.load %arg6[%c3, %c0_21, %c0_22] : memref<9x128x128xbf16, #tpu.memory_space<vmem>>, vector<1x128x128xbf16>
    %24 = vector.shape_cast %23 : vector<1x128x128xbf16> to vector<128x128xbf16>
    %cst_23 = arith.constant dense<0.000000e+00> : vector<4x128xf32>
    %25 = tpu.matmul %22, %24, %cst_23 {dimension_numbers = #tpu.dot_dimension_numbers<[1], [0], [0], [1], [0, 0, 1, 1], [], []>} : vector<4x128xbf16>, vector<128x128xbf16>, vector<4x128xf32> -> vector<4x128xf32>
    %26 = arith.addf %21, %25 : vector<4x128xf32>
    %27 = vector.extract_strided_slice %3 {offsets = [1, 0], sizes = [4, 128], strides = [1, 1]} : vector<6x128xbf16> to vector<4x128xbf16>
    %c4 = arith.constant 4 : index
    %c0_24 = arith.constant 0 : index
    %c0_25 = arith.constant 0 : index
    %28 = vector.load %arg6[%c4, %c0_24, %c0_25] : memref<9x128x128xbf16, #tpu.memory_space<vmem>>, vector<1x128x128xbf16>
    %29 = vector.shape_cast %28 : vector<1x128x128xbf16> to vector<128x128xbf16>
    %cst_26 = arith.constant dense<0.000000e+00> : vector<4x128xf32>
    %30 = tpu.matmul %27, %29, %cst_26 {dimension_numbers = #tpu.dot_dimension_numbers<[1], [0], [0], [1], [0, 0, 1, 1], [], []>} : vector<4x128xbf16>, vector<128x128xbf16>, vector<4x128xf32> -> vector<4x128xf32>
    %31 = arith.addf %26, %30 : vector<4x128xf32>
    %32 = vector.extract_strided_slice %3 {offsets = [2, 0], sizes = [4, 128], strides = [1, 1]} : vector<6x128xbf16> to vector<4x128xbf16>
    %c5 = arith.constant 5 : index
    %c0_27 = arith.constant 0 : index
    %c0_28 = arith.constant 0 : index
    %33 = vector.load %arg6[%c5, %c0_27, %c0_28] : memref<9x128x128xbf16, #tpu.memory_space<vmem>>, vector<1x128x128xbf16>
    %34 = vector.shape_cast %33 : vector<1x128x128xbf16> to vector<128x128xbf16>
    %cst_29 = arith.constant dense<0.000000e+00> : vector<4x128xf32>
    %35 = tpu.matmul %32, %34, %cst_29 {dimension_numbers = #tpu.dot_dimension_numbers<[1], [0], [0], [1], [0, 0, 1, 1], [], []>} : vector<4x128xbf16>, vector<128x128xbf16>, vector<4x128xf32> -> vector<4x128xf32>
    %36 = arith.addf %31, %35 : vector<4x128xf32>
    %37 = vector.extract_strided_slice %5 {offsets = [0, 0], sizes = [4, 128], strides = [1, 1]} : vector<6x128xbf16> to vector<4x128xbf16>
    %c6 = arith.constant 6 : index
    %c0_30 = arith.constant 0 : index
    %c0_31 = arith.constant 0 : index
    %38 = vector.load %arg6[%c6, %c0_30, %c0_31] : memref<9x128x128xbf16, #tpu.memory_space<vmem>>, vector<1x128x128xbf16>
    %39 = vector.shape_cast %38 : vector<1x128x128xbf16> to vector<128x128xbf16>
    %cst_32 = arith.constant dense<0.000000e+00> : vector<4x128xf32>
    %40 = tpu.matmul %37, %39, %cst_32 {dimension_numbers = #tpu.dot_dimension_numbers<[1], [0], [0], [1], [0, 0, 1, 1], [], []>} : vector<4x128xbf16>, vector<128x128xbf16>, vector<4x128xf32> -> vector<4x128xf32>
    %41 = arith.addf %36, %40 : vector<4x128xf32>
    %42 = vector.extract_strided_slice %5 {offsets = [1, 0], sizes = [4, 128], strides = [1, 1]} : vector<6x128xbf16> to vector<4x128xbf16>
    %c7 = arith.constant 7 : index
    %c0_33 = arith.constant 0 : index
    %c0_34 = arith.constant 0 : index
    %43 = vector.load %arg6[%c7, %c0_33, %c0_34] : memref<9x128x128xbf16, #tpu.memory_space<vmem>>, vector<1x128x128xbf16>
    %44 = vector.shape_cast %43 : vector<1x128x128xbf16> to vector<128x128xbf16>
    %cst_35 = arith.constant dense<0.000000e+00> : vector<4x128xf32>
    %45 = tpu.matmul %42, %44, %cst_35 {dimension_numbers = #tpu.dot_dimension_numbers<[1], [0], [0], [1], [0, 0, 1, 1], [], []>} : vector<4x128xbf16>, vector<128x128xbf16>, vector<4x128xf32> -> vector<4x128xf32>
    %46 = arith.addf %41, %45 : vector<4x128xf32>
    %47 = vector.extract_strided_slice %5 {offsets = [2, 0], sizes = [4, 128], strides = [1, 1]} : vector<6x128xbf16> to vector<4x128xbf16>
    %c8 = arith.constant 8 : index
    %c0_36 = arith.constant 0 : index
    %c0_37 = arith.constant 0 : index
    %48 = vector.load %arg6[%c8, %c0_36, %c0_37] : memref<9x128x128xbf16, #tpu.memory_space<vmem>>, vector<1x128x128xbf16>
    %49 = vector.shape_cast %48 : vector<1x128x128xbf16> to vector<128x128xbf16>
    %cst_38 = arith.constant dense<0.000000e+00> : vector<4x128xf32>
    %50 = tpu.matmul %47, %49, %cst_38 {dimension_numbers = #tpu.dot_dimension_numbers<[1], [0], [0], [1], [0, 0, 1, 1], [], []>} : vector<4x128xbf16>, vector<128x128xbf16>, vector<4x128xf32> -> vector<4x128xf32>
    %51 = arith.addf %46, %50 : vector<4x128xf32>
    %c0_39 = arith.constant 0 : index
    %c0_40 = arith.constant 0 : index
    %52 = vector.load %arg7[%c0_39, %c0_40] : memref<1x128xf32, #tpu.memory_space<vmem>>, vector<1x128xf32>
    %53 = vector.broadcast %52 : vector<1x128xf32> to vector<4x128xf32>
    %54 = arith.mulf %51, %53 : vector<4x128xf32>
    %c0_41 = arith.constant 0 : index
    %c0_42 = arith.constant 0 : index
    %55 = vector.load %arg8[%c0_41, %c0_42] : memref<1x128xf32, #tpu.memory_space<vmem>>, vector<1x128xf32>
    %56 = vector.broadcast %55 : vector<1x128xf32> to vector<4x128xf32>
    %57 = arith.addf %54, %56 : vector<4x128xf32>
    %cst_43 = arith.constant 0.000000e+00 : f32
    %58 = vector.broadcast %cst_43 : f32 to vector<4x128xf32>
    %59 = arith.maximumf %57, %58 : vector<4x128xf32>
    %c0_44 = arith.constant 0 : index
    %c0_45 = arith.constant 0 : index
    %c0_46 = arith.constant 0 : index
    %c0_47 = arith.constant 0 : index
    %60 = vector.load %arg9[%c0_44, %c0_45, %c0_46, %c0_47] : memref<1x1x4x128xf32, #tpu.memory_space<vmem>>, vector<1x1x4x128xf32>
    %61 = vector.shape_cast %60 : vector<1x1x4x128xf32> to vector<4x128xf32>
    %62 = vector.shape_cast %59 : vector<4x128xf32> to vector<1x1x4x128xf32>
    tpu.vector_store %arg9[%c0_44, %c0_45, %c0_46, %c0_47], %62 {strides = array<i32>} : memref<1x1x4x128xf32, #tpu.memory_space<vmem>>, vector<1x1x4x128xf32>,
    return
  }
  func.func @transform_0(%arg0: i32, %arg1: i32, %arg2: i32) -> (i32, i32, i32, i32) {
    %c0_i32 = arith.constant 0 : i32
    %0 = arith.addi %arg1, %c0_i32 : i32
    %c0_i32_0 = arith.constant 0 : i32
    %c0_i32_1 = arith.constant 0 : i32
    %c0_i32_2 = arith.constant 0 : i32
    return %arg0, %0, %c0_i32_0, %c0_i32_1 : i32, i32, i32, i32
  }
  func.func @transform_1(%arg0: i32, %arg1: i32, %arg2: i32) -> (i32, i32, i32, i32) {
    %c1_i32 = arith.constant 1 : i32
    %0 = arith.addi %arg1, %c1_i32 : i32
    %c0_i32 = arith.constant 0 : i32
    %c0_i32_0 = arith.constant 0 : i32
    %c0_i32_1 = arith.constant 0 : i32
    return %arg0, %0, %c0_i32, %c0_i32_0 : i32, i32, i32, i32
  }
  func.func @transform_2(%arg0: i32, %arg1: i32, %arg2: i32) -> (i32, i32, i32, i32) {
    %c2_i32 = arith.constant 2 : i32
    %0 = arith.addi %arg1, %c2_i32 : i32
    %c0_i32 = arith.constant 0 : i32
    %c0_i32_0 = arith.constant 0 : i32
    %c0_i32_1 = arith.constant 0 : i32
    return %arg0, %0, %c0_i32, %c0_i32_0 : i32, i32, i32, i32
  }
  func.func @transform_3(%arg0: i32, %arg1: i32, %arg2: i32) -> (i32, i32, i32) {
    %c0_i32 = arith.constant 0 : i32
    %c0_i32_0 = arith.constant 0 : i32
    %c0_i32_1 = arith.constant 0 : i32
    return %c0_i32, %c0_i32_0, %arg2 : i32, i32, i32
  }
  func.func @transform_4(%arg0: i32, %arg1: i32, %arg2: i32) -> (i32, i32) {
    %c0_i32 = arith.constant 0 : i32
    %c0_i32_0 = arith.constant 0 : i32
    return %c0_i32, %arg2 : i32, i32
  }
  func.func @transform_5(%arg0: i32, %arg1: i32, %arg2: i32) -> (i32, i32) {
    %c0_i32 = arith.constant 0 : i32
    %c0_i32_0 = arith.constant 0 : i32
    return %c0_i32, %arg2 : i32, i32
  }
  func.func @transform_6(%arg0: i32, %arg1: i32, %arg2: i32) -> (i32, i32, i32, i32) {
    %c0_i32 = arith.constant 0 : i32
    %c0_i32_0 = arith.constant 0 : i32
    return %arg0, %arg1, %c0_i32, %arg2 : i32, i32, i32, i32
  }
}

module attributes {stable_mosaic.version = 11 : i64} {
  func.func @_mm_kernel(%arg0: i32, %arg1: i32, %arg2: i32, %arg3: i32, %arg4: memref<1x32x128xbf16, #tpu.memory_space<vmem>>, %arg5: memref<1x128x128xbf16, #tpu.memory_space<vmem>>, %arg6: memref<1x128xf32, #tpu.memory_space<vmem>>, %arg7: memref<1x128xf32, #tpu.memory_space<vmem>>, %arg8: memref<1x32x128xf32, #tpu.memory_space<vmem>>, %arg9: memref<32x128xf32, #tpu.memory_space<vmem>>) attributes {dimension_semantics = [#tpu.dimension_semantics<parallel>, #tpu.dimension_semantics<parallel>, #tpu.dimension_semantics<parallel>, #tpu.dimension_semantics<arbitrary>], iteration_bounds = array<i64: 8, 1, 1, 1>, scalar_prefetch = 0 : i64, scratch_operands = 1 : i64, tpu.core_type = #tpu.core_type<tc>, window_params = [{transform_indices = @transform_0, window_bounds = array<i64: 1, 32, 128>}, {transform_indices = @transform_1, window_bounds = array<i64: 1, 128, 128>}, {transform_indices = @transform_2, window_bounds = array<i64: 1, 128>}, {transform_indices = @transform_3, window_bounds = array<i64: 1, 128>}, {transform_indices = @transform_4, window_bounds = array<i64: 1, 32, 128>}]} {
    %c0_i32 = arith.constant 0 : i32
    %0 = arith.cmpi eq, %arg3, %c0_i32 : i32
    %1 = arith.extui %0 : i1 to i32
    %c0_i32_0 = arith.constant 0 : i32
    %2 = arith.cmpi ne, %1, %c0_i32_0 : i32
    scf.if %2 {
      %cst_12 = arith.constant 0.000000e+00 : f32
      %14 = vector.broadcast %cst_12 : f32 to vector<32x128xf32>
      %c0_13 = arith.constant 0 : index
      %c0_14 = arith.constant 0 : index
      %15 = vector.load %arg9[%c0_13, %c0_14] : memref<32x128xf32, #tpu.memory_space<vmem>>, vector<32x128xf32>
      tpu.vector_store %arg9[%c0_13, %c0_14], %14 {strides = array<i32>} : memref<32x128xf32, #tpu.memory_space<vmem>>, vector<32x128xf32>,
    } else {
    }
    %c0 = arith.constant 0 : index
    %c0_1 = arith.constant 0 : index
    %3 = vector.load %arg9[%c0, %c0_1] : memref<32x128xf32, #tpu.memory_space<vmem>>, vector<32x128xf32>
    %c0_2 = arith.constant 0 : index
    %c0_3 = arith.constant 0 : index
    %c0_4 = arith.constant 0 : index
    %4 = vector.load %arg4[%c0_2, %c0_3, %c0_4] : memref<1x32x128xbf16, #tpu.memory_space<vmem>>, vector<1x32x128xbf16>
    %5 = vector.shape_cast %4 : vector<1x32x128xbf16> to vector<32x128xbf16>
    %c0_5 = arith.constant 0 : index
    %c0_6 = arith.constant 0 : index
    %c0_7 = arith.constant 0 : index
    %6 = vector.load %arg5[%c0_5, %c0_6, %c0_7] : memref<1x128x128xbf16, #tpu.memory_space<vmem>>, vector<1x128x128xbf16>
    %7 = vector.shape_cast %6 : vector<1x128x128xbf16> to vector<128x128xbf16>
    %cst = arith.constant dense<0.000000e+00> : vector<32x128xf32>
    %8 = tpu.matmul %5, %7, %cst {dimension_numbers = #tpu.dot_dimension_numbers<[1], [0], [0], [1], [0, 0, 1, 1], [], []>} : vector<32x128xbf16>, vector<128x128xbf16>, vector<32x128xf32> -> vector<32x128xf32>
    %9 = arith.addf %3, %8 : vector<32x128xf32>
    %c0_8 = arith.constant 0 : index
    %c0_9 = arith.constant 0 : index
    %10 = vector.load %arg9[%c0_8, %c0_9] : memref<32x128xf32, #tpu.memory_space<vmem>>, vector<32x128xf32>
    tpu.vector_store %arg9[%c0_8, %c0_9], %9 {strides = array<i32>} : memref<32x128xf32, #tpu.memory_space<vmem>>, vector<32x128xf32>,
    %c0_i32_10 = arith.constant 0 : i32
    %11 = arith.cmpi eq, %arg3, %c0_i32_10 : i32
    %12 = arith.extui %11 : i1 to i32
    %c0_i32_11 = arith.constant 0 : i32
    %13 = arith.cmpi ne, %12, %c0_i32_11 : i32
    scf.if %13 {
      %c0_12 = arith.constant 0 : index
      %c0_13 = arith.constant 0 : index
      %14 = vector.load %arg9[%c0_12, %c0_13] : memref<32x128xf32, #tpu.memory_space<vmem>>, vector<32x128xf32>
      %c0_14 = arith.constant 0 : index
      %c0_15 = arith.constant 0 : index
      %15 = vector.load %arg6[%c0_14, %c0_15] : memref<1x128xf32, #tpu.memory_space<vmem>>, vector<1x128xf32>
      %16 = vector.broadcast %15 : vector<1x128xf32> to vector<32x128xf32>
      %17 = arith.mulf %14, %16 : vector<32x128xf32>
      %c0_16 = arith.constant 0 : index
      %c0_17 = arith.constant 0 : index
      %18 = vector.load %arg7[%c0_16, %c0_17] : memref<1x128xf32, #tpu.memory_space<vmem>>, vector<1x128xf32>
      %19 = vector.broadcast %18 : vector<1x128xf32> to vector<32x128xf32>
      %20 = arith.addf %17, %19 : vector<32x128xf32>
      %c0_18 = arith.constant 0 : index
      %c0_19 = arith.constant 0 : index
      %c0_20 = arith.constant 0 : index
      %21 = vector.load %arg8[%c0_18, %c0_19, %c0_20] : memref<1x32x128xf32, #tpu.memory_space<vmem>>, vector<1x32x128xf32>
      %22 = vector.shape_cast %21 : vector<1x32x128xf32> to vector<32x128xf32>
      %23 = vector.shape_cast %20 : vector<32x128xf32> to vector<1x32x128xf32>
      tpu.vector_store %arg8[%c0_18, %c0_19, %c0_20], %23 {strides = array<i32>} : memref<1x32x128xf32, #tpu.memory_space<vmem>>, vector<1x32x128xf32>,
    } else {
    }
    return
  }
  func.func @transform_0(%arg0: i32, %arg1: i32, %arg2: i32, %arg3: i32) -> (i32, i32, i32) {
    %c0_i32 = arith.constant 0 : i32
    %c0_i32_0 = arith.constant 0 : i32
    return %c0_i32, %arg1, %arg3 : i32, i32, i32
  }
  func.func @transform_1(%arg0: i32, %arg1: i32, %arg2: i32, %arg3: i32) -> (i32, i32, i32) {
    %c0_i32 = arith.constant 0 : i32
    return %arg0, %arg3, %arg2 : i32, i32, i32
  }
  func.func @transform_2(%arg0: i32, %arg1: i32, %arg2: i32, %arg3: i32) -> (i32, i32) {
    %c0_i32 = arith.constant 0 : i32
    %c0_i32_0 = arith.constant 0 : i32
    return %c0_i32, %arg2 : i32, i32
  }
  func.func @transform_3(%arg0: i32, %arg1: i32, %arg2: i32, %arg3: i32) -> (i32, i32) {
    %c0_i32 = arith.constant 0 : i32
    %c0_i32_0 = arith.constant 0 : i32
    return %c0_i32, %arg2 : i32, i32
  }
  func.func @transform_4(%arg0: i32, %arg1: i32, %arg2: i32, %arg3: i32) -> (i32, i32, i32) {
    %c0_i32 = arith.constant 0 : i32
    return %arg0, %arg1, %arg2 : i32, i32, i32
  }
}

module attributes {stable_mosaic.version = 11 : i64} {
  func.func @_mm_kernel(%arg0: i32, %arg1: i32, %arg2: i32, %arg3: i32, %arg4: memref<1x32x128xbf16, #tpu.memory_space<vmem>>, %arg5: memref<1x128x256xbf16, #tpu.memory_space<vmem>>, %arg6: memref<1x256xf32, #tpu.memory_space<vmem>>, %arg7: memref<1x256xf32, #tpu.memory_space<vmem>>, %arg8: memref<1x32x256xf32, #tpu.memory_space<vmem>>, %arg9: memref<32x256xf32, #tpu.memory_space<vmem>>) attributes {dimension_semantics = [#tpu.dimension_semantics<parallel>, #tpu.dimension_semantics<parallel>, #tpu.dimension_semantics<parallel>, #tpu.dimension_semantics<arbitrary>], iteration_bounds = array<i64: 2, 1, 16, 1>, scalar_prefetch = 0 : i64, scratch_operands = 1 : i64, tpu.core_type = #tpu.core_type<tc>, window_params = [{transform_indices = @transform_0, window_bounds = array<i64: 1, 32, 128>}, {transform_indices = @transform_1, window_bounds = array<i64: 1, 128, 256>}, {transform_indices = @transform_2, window_bounds = array<i64: 1, 256>}, {transform_indices = @transform_3, window_bounds = array<i64: 1, 256>}, {transform_indices = @transform_4, window_bounds = array<i64: 1, 32, 256>}]} {
    %c0_i32 = arith.constant 0 : i32
    %0 = arith.cmpi eq, %arg3, %c0_i32 : i32
    %1 = arith.extui %0 : i1 to i32
    %c0_i32_0 = arith.constant 0 : i32
    %2 = arith.cmpi ne, %1, %c0_i32_0 : i32
    scf.if %2 {
      %cst_12 = arith.constant 0.000000e+00 : f32
      %14 = vector.broadcast %cst_12 : f32 to vector<32x256xf32>
      %c0_13 = arith.constant 0 : index
      %c0_14 = arith.constant 0 : index
      %15 = vector.load %arg9[%c0_13, %c0_14] : memref<32x256xf32, #tpu.memory_space<vmem>>, vector<32x256xf32>
      tpu.vector_store %arg9[%c0_13, %c0_14], %14 {strides = array<i32>} : memref<32x256xf32, #tpu.memory_space<vmem>>, vector<32x256xf32>,
    } else {
    }
    %c0 = arith.constant 0 : index
    %c0_1 = arith.constant 0 : index
    %3 = vector.load %arg9[%c0, %c0_1] : memref<32x256xf32, #tpu.memory_space<vmem>>, vector<32x256xf32>
    %c0_2 = arith.constant 0 : index
    %c0_3 = arith.constant 0 : index
    %c0_4 = arith.constant 0 : index
    %4 = vector.load %arg4[%c0_2, %c0_3, %c0_4] : memref<1x32x128xbf16, #tpu.memory_space<vmem>>, vector<1x32x128xbf16>
    %5 = vector.shape_cast %4 : vector<1x32x128xbf16> to vector<32x128xbf16>
    %c0_5 = arith.constant 0 : index
    %c0_6 = arith.constant 0 : index
    %c0_7 = arith.constant 0 : index
    %6 = vector.load %arg5[%c0_5, %c0_6, %c0_7] : memref<1x128x256xbf16, #tpu.memory_space<vmem>>, vector<1x128x256xbf16>
    %7 = vector.shape_cast %6 : vector<1x128x256xbf16> to vector<128x256xbf16>
    %cst = arith.constant dense<0.000000e+00> : vector<32x256xf32>
    %8 = tpu.matmul %5, %7, %cst {dimension_numbers = #tpu.dot_dimension_numbers<[1], [0], [0], [1], [0, 0, 1, 1], [], []>} : vector<32x128xbf16>, vector<128x256xbf16>, vector<32x256xf32> -> vector<32x256xf32>
    %9 = arith.addf %3, %8 : vector<32x256xf32>
    %c0_8 = arith.constant 0 : index
    %c0_9 = arith.constant 0 : index
    %10 = vector.load %arg9[%c0_8, %c0_9] : memref<32x256xf32, #tpu.memory_space<vmem>>, vector<32x256xf32>
    tpu.vector_store %arg9[%c0_8, %c0_9], %9 {strides = array<i32>} : memref<32x256xf32, #tpu.memory_space<vmem>>, vector<32x256xf32>,
    %c0_i32_10 = arith.constant 0 : i32
    %11 = arith.cmpi eq, %arg3, %c0_i32_10 : i32
    %12 = arith.extui %11 : i1 to i32
    %c0_i32_11 = arith.constant 0 : i32
    %13 = arith.cmpi ne, %12, %c0_i32_11 : i32
    scf.if %13 {
      %c0_12 = arith.constant 0 : index
      %c0_13 = arith.constant 0 : index
      %14 = vector.load %arg9[%c0_12, %c0_13] : memref<32x256xf32, #tpu.memory_space<vmem>>, vector<32x256xf32>
      %c0_14 = arith.constant 0 : index
      %c0_15 = arith.constant 0 : index
      %15 = vector.load %arg6[%c0_14, %c0_15] : memref<1x256xf32, #tpu.memory_space<vmem>>, vector<1x256xf32>
      %16 = vector.broadcast %15 : vector<1x256xf32> to vector<32x256xf32>
      %17 = arith.mulf %14, %16 : vector<32x256xf32>
      %c0_16 = arith.constant 0 : index
      %c0_17 = arith.constant 0 : index
      %18 = vector.load %arg7[%c0_16, %c0_17] : memref<1x256xf32, #tpu.memory_space<vmem>>, vector<1x256xf32>
      %19 = vector.broadcast %18 : vector<1x256xf32> to vector<32x256xf32>
      %20 = arith.addf %17, %19 : vector<32x256xf32>
      %c0_18 = arith.constant 0 : index
      %c0_19 = arith.constant 0 : index
      %c0_20 = arith.constant 0 : index
      %21 = vector.load %arg8[%c0_18, %c0_19, %c0_20] : memref<1x32x256xf32, #tpu.memory_space<vmem>>, vector<1x32x256xf32>
      %22 = vector.shape_cast %21 : vector<1x32x256xf32> to vector<32x256xf32>
      %23 = vector.shape_cast %20 : vector<32x256xf32> to vector<1x32x256xf32>
      tpu.vector_store %arg8[%c0_18, %c0_19, %c0_20], %23 {strides = array<i32>} : memref<1x32x256xf32, #tpu.memory_space<vmem>>, vector<1x32x256xf32>,
    } else {
    }
    return
  }
  func.func @transform_0(%arg0: i32, %arg1: i32, %arg2: i32, %arg3: i32) -> (i32, i32, i32) {
    %c0_i32 = arith.constant 0 : i32
    %c0_i32_0 = arith.constant 0 : i32
    return %c0_i32, %arg1, %arg3 : i32, i32, i32
  }
  func.func @transform_1(%arg0: i32, %arg1: i32, %arg2: i32, %arg3: i32) -> (i32, i32, i32) {
    %c0_i32 = arith.constant 0 : i32
    return %arg0, %arg3, %arg2 : i32, i32, i32
  }
  func.func @transform_2(%arg0: i32, %arg1: i32, %arg2: i32, %arg3: i32) -> (i32, i32) {
    %c0_i32 = arith.constant 0 : i32
    %c0_i32_0 = arith.constant 0 : i32
    return %c0_i32, %arg2 : i32, i32
  }
  func.func @transform_3(%arg0: i32, %arg1: i32, %arg2: i32, %arg3: i32) -> (i32, i32) {
    %c0_i32 = arith.constant 0 : i32
    %c0_i32_0 = arith.constant 0 : i32
    return %c0_i32, %arg2 : i32, i32
  }
  func.func @transform_4(%arg0: i32, %arg1: i32, %arg2: i32, %arg3: i32) -> (i32, i32, i32) {
    %c0_i32 = arith.constant 0 : i32
    return %arg0, %arg1, %arg2 : i32, i32, i32
  }
}

</mosaic_0001>

<bundles_post_ra>
// kernel: a_call__.9
= control target key start
LH: loop header
LB: loop body
LE: loop exit
PB: predicated region body
PF: predicated region fallthrough
CT: control target
= control target key end

     0   :  { %9 = vsyncpa [#allocation4], 0  ;;  %s986_s0 = inlined_call_operand.vmem [shape: bf16[2,16,128], index: 0, kind: input, shape index: {}]   ;;  %s987_s1 = inlined_call_operand.hbm [shape: bf16[1,128,128], index: 1, kind: input, shape index: {}]   ;;  %s988_s2 = inlined_call_operand.hbm [shape: f32[1,128], index: 2, kind: input, shape index: {}]   ;;  %s989_s3 = inlined_call_operand.vmem [shape: f32[1,128], index: 3, kind: input, shape index: {}]   ;;  %s990_s4 = inlined_call_operand.vmem [shape: f32[2,16,128], index: 4, kind: output, shape index: {}]  }
   0x1   :  { %10 = vsyncpa [#allocation6], 0  ;;  %s865_s15 = smov 0   ;;  %s867_s16 = smov 0  }
   0x2   :  { %s869_s17 = smov 0  }
   0x3 LB: > { %s630_s18 = sadd.s32 4294967295, %s832_s17   ;;  %s42_s19 = sadd.s32 1, %s828_s16  ;;  %s832_s17 = sphi %s869_s17, %s16_s17   ;;  %s828_s16 = sphi %s867_s16, %s1000_s16   ;;  %s824_s15 = sphi %s865_s15, %s999_s15  }
   0x4   : > { %p44_p0 = scmp.ge.s32.totalorder %s42_s19, 2  ;;  %p632_p1 = scmp.ge.s32.totalorder %s832_s17, 1 }
   0x5   : > { %p187_p2 = scmp.lt.s32.totalorder %s832_s17, 3  ;;  %p890_p4 = scmp.eq.s32.totalorder %s630_s18, 0 }
   0x6   : > { %s1002_s19 = smov (%p44_p0, %s42_s19), 0  ;;  %s834_s22 = smov [#allocation3]  }
   0x7   : > { %p886_p3 = pnand %p632_p1, %p187_p2  ;;  %s203_s23 = sshll.u32 %s834_s22, 4  ;;  %s204_s23 = int_to_ptr.vmem [resolvable:$true] %s203_s23 }
   0x8   : > { %s995_s21 = scalar_select %p890_p4, 1, 0 }
   0x9   : > { %s994_s20 = scalar_select %p886_p3, 1, 0 }
   0xa   : > { %p696_p5 = pneg %p886_p3  ;;  %s835_s25 = smov [#allocation5]  }
   0xb   : > { %s219_s26 = sshll.u32 %s835_s25, 4  ;;  %s746_s29 = scalar_lea.hbm %s987_s1, 1024  ;;  %s902_s26 = int_to_ptr.vmem [resolvable:$true] %s219_s26 }
   0xc   : > { %p898_p6 = pnand %p890_p4, %p696_p5  ;;  %p747_p7 = scmp.ne.s32.totalorder %s987_s1, %s746_s29 }
   0xd   : > { %p753_p11 = scmp.lt.u32.totalorder %s746_s29, %s987_s1 }
   0xe   : > { %p748_p8 = pneg %p898_p6 }
  0x10   : > { %p749_p9 = pnand %p748_p8, %p747_p7 }
  0x12   : > { %p750_p10 = pneg %p749_p9 }
  0x14   : > { %p755_p12 = pnand %p753_p11, %p750_p10 }
  0x16   : > { %758 = shalt.err (!%p755_p12)
}
  0x17   : > { %s759_s8 = scalar_lea.vmem %s204_s23, 1024  ;;  %p767_p2 = scmp.lt.s32.totalorder %s204_s23, %s204_s23 }
  0x18   : > { %p760_p13 = scmp.ne.s32.totalorder %s204_s23, %s759_s8  ;;  %p768_p5 = scmp.lt.s32.totalorder %s759_s8, %s759_s8 }
  0x1a   : > { %p762_p0 = pnand %p760_p13, %p748_p8  ;;  %p769_p4 = por %p768_p5, %p767_p2 }
  0x1c   : > { %p763_p1 = pneg %p762_p0 }
  0x1e   : > { %p770_p3 = pnand %p769_p4, %p763_p1 }
  0x20   : > { %773 = shalt.err (!%p770_p3)
}
  0x21   : > { %s836_s9 = smov 64   ;;  %s837_s10 = smov 4  }
  0x22   : > { %699 = dma.hbm_to_vmem [thread:$0]  (!%p898_p6), %s987_s1, 1024, %s204_s23, [#allocation4], %s836_s9, %s836_s9, %s837_s10  }
  0x23   : > { %s774_s18 = scalar_lea.hbm %s988_s2, 16 }
  0x24   : > { %p775_p7 = scmp.ne.s32.totalorder %s988_s2, %s774_s18  ;;  %p781_p9 = scmp.lt.u32.totalorder %s774_s18, %s988_s2 }
  0x26   : > { %p777_p3 = pnand %p775_p7, %p748_p8 }
  0x28   : > { %p778_p4 = pneg %p777_p3 }
  0x2a   : > { %p783_p10 = pnand %p781_p9, %p778_p4 }
  0x2c   : > { %786 = shalt.err (!%p783_p10)
}
  0x2d   : > { %s787_s23 = scalar_lea.vmem %s902_s26, 16  ;;  %s794_s29 = scalar_lea.vmem %s902_s26, 32 }
  0x2e   : > { %p788_p11 = scmp.ne.s32.totalorder %s902_s26, %s787_s23  ;;  %p795_p0 = scmp.lt.s32.totalorder %s902_s26, %s902_s26 }
  0x2f   : > { %p796_p1 = scmp.lt.s32.totalorder %s794_s29, %s787_s23 }
  0x30   : > { %p790_p12 = pnand %p788_p11, %p748_p8 }
  0x31   : > { %p797_p2 = por %p796_p1, %p795_p0 }
  0x32   : > { %p791_p13 = pneg %p790_p12 }
  0x34   : > { %p798_p5 = pnand %p797_p2, %p791_p13 }
  0x36   : > { %801 = shalt.err (!%p798_p5)
}
  0x37   : > { %702 = dma.hbm_to_vmem [thread:$0]  (!%p898_p6), %s988_s2, 16, %s902_s26, [#allocation6]  }
  0x38   : > { %p997_p7 = scmp.ne.s32.totalorder %s994_s20, 0 }
  0x39   : > { %p998_p8 = scmp.ne.s32.totalorder (!%p997_p7), %s995_s21, 0 }
  0x3a   : > { %254 = sbr.rel (%p997_p7) target bundleno = 322 (0x142), region = 36 }
  0x41   : > { %815 = dma.done.wait (%p998_p8), [#allocation4], 1024  }
  0x42   : > { %817 = vsyncadd (%p998_p8), [#allocation4], 4294966272 }
  0x43   : > { %819 = dma.done.wait (%p998_p8), [#allocation6], 16  }
  0x44   : > { %821 = vsyncadd (%p998_p8), [#allocation6], 4294967280  ;;  %v838_v0 = vmov 0.0   ;;  %vm839_vm0 = vmmov 0   ;;  %p302_p6 = scmp.lt.s32.totalorder %s824_s15, 1  ;;  %v737_v1 = vld [vmem:[#allocation3] sm:$0xff]  }
  0x45   : > { %668 = vmatprep.subr.bf16.mxu0 %v838_v0  ;;  %684 = vmatprep.mubr.msk.bf16.mxu0 %vm839_vm0, %v838_v0  ;;  %v738_v2 = vld [vmem:[#allocation3 + $0x8] sm:$0xff]   ;;  %v739_v3 = vld [vmem:[#allocation3 + $0x10] sm:$0xff]   ;;  %v740_v4 = vld [vmem:[#allocation3 + $0x18] sm:$0xff]  }
  0x46   : > { %s1004_s15 = smov (!%p302_p6, %s824_s15), 1  ;;  %669 = vmatpush3.bf16.msra.mxu0 %v737_v1  ;;  %v741_v5 = vld [vmem:[#allocation3 + $0x20] sm:$0xff]   ;;  %v742_v6 = vld [vmem:[#allocation3 + $0x28] sm:$0xff]   ;;  %v743_v7 = vld [vmem:[#allocation3 + $0x30] sm:$0xff]  }
  0x47   : > { %670 = vmatprep.subr.bf16.mxu0 %v838_v0  ;;  %s657_s20 = sshll.u32 %s1004_s15, 3  ;;  %v744_v8 = vld [vmem:[#allocation3 + $0x38] sm:$0xff]   ;;  %v653_v10 = vld [vmem:[#allocation5] ss:$0 sm:$0xff]  ;;  %s658_s8 = sshll.u32 %s1004_s15, 4 }
  0x48   : > { %s312_s26 = scalar_lea.vmem %s986_s0, %s657_s20  ;;  %v654_v12 = vld [vmem:[%s989_s3] ss:$0 sm:$0xff]  ;;  %s329_s11 = scalar_lea.vmem %s990_s4, %s658_s8 }
  0x49   : > { %v745_v9 = vld [vmem:[%s312_s26] sm:$0xff]  }
  0x4a   : > { %671 = vmatpush3.bf16.msra.mxu0 %v738_v2 }
  0x4b   : > { %672 = vmatprep.subr.bf16.mxu0 %v838_v0 }
  0x4e   : > { %673 = vmatpush3.bf16.msra.mxu0 %v739_v3 }
  0x4f   : > { %674 = vmatprep.subr.bf16.mxu0 %v838_v0 }
  0x52   : > { %675 = vmatpush3.bf16.msra.mxu0 %v740_v4 }
  0x53   : > { %676 = vmatprep.subr.bf16.mxu0 %v838_v0 }
  0x56   : > { %677 = vmatpush3.bf16.msra.mxu0 %v741_v5 }
  0x57   : > { %678 = vmatprep.subr.bf16.mxu0 %v838_v0 }
  0x5a   : > { %679 = vmatpush3.bf16.msra.mxu0 %v742_v6 }
  0x5b   : > { %680 = vmatprep.subr.bf16.mxu0 %v838_v0 }
  0x5e   : > { %681 = vmatpush3.bf16.msra.mxu0 %v743_v7 }
  0x5f   : > { %682 = vmatprep.subr.bf16.mxu0 %v838_v0 }
  0x62   : > { %683 = vmatpush3.bf16.msra.mxu0 %v744_v8 }
  0x65   : > { %685 = vmatmul.mubr.bf16.vlgmr.msra.gmra.mrb[0].mxu0 %v745_v9 }
 0x138   : > { %v446_v11 = vpop.f32.mrb[0].mxu0 }
 0x139   : > { %v469_v13 = vmul.f32 %v653_v10, %v446_v11  ;;  %v686_v14 = vpop.f32.mrb[1].mxu0 }
 0x13a   : > { %v449_v15 = vpop.f32.mrb[2].mxu0 }
 0x13b   : > { %v478_v16 = vadd.f32 %v654_v12, %v469_v13  ;;  %v470_v17 = vmul.f32 %v653_v10, %v449_v15  ;;  %v687_v18 = vpop.f32.mrb[3].mxu0 }
 0x13d   : > { %v480_v19 = vmax.f32 %v478_v16, 0.0  ;;  %v479_v20 = vadd.f32 %v654_v12, %v470_v17 }
 0x13f   : > { %482 = vst [vmem:[%s329_s11] sm:$0xff] %v480_v19  ;;  %v481_v21 = vmax.f32 %v479_v20, 0.0 }
 0x141   : > { %483 = vst [vmem:[%s329_s11 + $0x8] sm:$0xff] %v481_v21 }
 0x142 PF: > { %s16_s17 = sadd.s32 1, %s832_s17   ;;  %s999_s15 = smov %s828_s16 }
 0x143   : > { %p13_p3 = scmp.ge.s32.totalorder %s16_s17, 4   ;;  %s1000_s16 = smov %s1002_s19 }
 0x145   :  { %15 = sbr.rel (!%p13_p3) target bundleno = 3 (0x3), region = 88 }
 0x14c   :  { %520 = vsyncpa [#allocation4], 1 }
 0x14d   :  { %522 = vsyncpa [#allocation4 + $0x1], 1 }
 0x14e   :  { %523 = vsyncpa [#allocation6], 1 }

// kernel: a_call__.11
= control target key start
LH: loop header
LB: loop body
LE: loop exit
PB: predicated region body
PF: predicated region fallthrough
CT: control target
= control target key end

     0   :  { %9 = vsyncpa [#allocation4], 0  ;;  %s813_s15 = smov 0   ;;  %s815_s16 = smov 0   ;;  %s899_s0 = inlined_call_operand.vmem [shape: bf16[2,16,128], index: 0, kind: input, shape index: {}]   ;;  %s900_s1 = inlined_call_operand.hbm [shape: bf16[1,128,128], index: 1, kind: input, shape index: {}]   ;;  %s901_s2 = inlined_call_operand.vmem [shape: f32[1,128], index: 2, kind: input, shape index: {}]   ;;  %s902_s3 = inlined_call_operand.vmem [shape: f32[1,128], index: 3, kind: input, shape index: {}]   ;;  %s903_s4 = inlined_call_operand.vmem [shape: f32[2,16,128], index: 4, kind: output, shape index: {}]  }
   0x1   :  { %s817_s17 = smov 0  }
   0x2 LB: > { %s622_s18 = sadd.s32 4294967295, %s781_s17   ;;  %s41_s19 = sadd.s32 1, %s777_s16  ;;  %s781_s17 = sphi %s817_s17, %s15_s17   ;;  %s777_s16 = sphi %s815_s16, %s913_s16   ;;  %s773_s15 = sphi %s813_s15, %s912_s15  }
   0x3   : > { %p43_p0 = scmp.ge.s32.totalorder %s41_s19, 2  ;;  %p624_p1 = scmp.ge.s32.totalorder %s781_s17, 1 }
   0x4   : > { %p186_p2 = scmp.lt.s32.totalorder %s781_s17, 3  ;;  %p838_p4 = scmp.eq.s32.totalorder %s622_s18, 0 }
   0x5   : > { %s915_s19 = smov (%p43_p0, %s41_s19), 0  ;;  %s783_s22 = smov [#allocation3]  }
   0x6   : > { %p834_p3 = pnand %p624_p1, %p186_p2  ;;  %s202_s23 = sshll.u32 %s783_s22, 4  ;;  %s203_s23 = int_to_ptr.vmem [resolvable:$true] %s202_s23 }
   0x7   : > { %s908_s21 = scalar_select %p838_p4, 1, 0 }
   0x8   : > { %s907_s20 = scalar_select %p834_p3, 1, 0 }
   0x9   : > { %p683_p5 = pneg %p834_p3  ;;  %s727_s27 = scalar_lea.hbm %s900_s1, 1024 }
   0xa   : > { %p728_p7 = scmp.ne.s32.totalorder %s900_s1, %s727_s27  ;;  %p734_p11 = scmp.lt.u32.totalorder %s727_s27, %s900_s1 }
   0xb   : > { %p846_p6 = pnand %p838_p4, %p683_p5 }
   0xd   : > { %p729_p8 = pneg %p846_p6 }
   0xf   : > { %p730_p9 = pnand %p729_p8, %p728_p7 }
  0x11   : > { %p731_p10 = pneg %p730_p9 }
  0x13   : > { %p736_p12 = pnand %p734_p11, %p731_p10 }
  0x15   : > { %739 = shalt.err (!%p736_p12)
}
  0x16   : > { %s740_s6 = scalar_lea.vmem %s203_s23, 1024  ;;  %p748_p2 = scmp.lt.s32.totalorder %s203_s23, %s203_s23 }
  0x17   : > { %p741_p13 = scmp.ne.s32.totalorder %s203_s23, %s740_s6  ;;  %p749_p5 = scmp.lt.s32.totalorder %s740_s6, %s740_s6 }
  0x19   : > { %p743_p0 = pnand %p741_p13, %p729_p8  ;;  %p750_p4 = por %p749_p5, %p748_p2 }
  0x1b   : > { %p744_p1 = pneg %p743_p0 }
  0x1d   : > { %p751_p3 = pnand %p750_p4, %p744_p1 }
  0x1f   : > { %754 = shalt.err (!%p751_p3)
}
  0x20   : > { %s784_s7 = smov 64   ;;  %s785_s8 = smov 4  }
  0x21   : > { %686 = dma.hbm_to_vmem [thread:$0]  (!%p846_p6), %s900_s1, 1024, %s203_s23, [#allocation4], %s784_s7, %s784_s7, %s785_s8  }
  0x22   : > { %p910_p7 = scmp.ne.s32.totalorder %s907_s20, 0 }
  0x23   : > { %p911_p9 = scmp.ne.s32.totalorder (!%p910_p7), %s908_s21, 0 }
  0x24   : > { %246 = sbr.rel (%p910_p7) target bundleno = 296 (0x128), region = 36 }
  0x2b   : > { %768 = dma.done.wait (%p911_p9), [#allocation4], 1024  }
  0x2c   : > { %770 = vsyncadd (%p911_p9), [#allocation4], 4294966272  ;;  %v786_v0 = vmov 0.0   ;;  %vm787_vm0 = vmmov 0   ;;  %p293_p3 = scmp.lt.s32.totalorder %s773_s15, 1  ;;  %v718_v1 = vld [vmem:[#allocation3] sm:$0xff]  }
  0x2d   : > { %659 = vmatprep.subr.bf16.mxu0 %v786_v0  ;;  %675 = vmatprep.mubr.msk.bf16.mxu0 %vm787_vm0, %v786_v0  ;;  %v719_v2 = vld [vmem:[#allocation3 + $0x8] sm:$0xff]   ;;  %v720_v3 = vld [vmem:[#allocation3 + $0x10] sm:$0xff]   ;;  %v721_v4 = vld [vmem:[#allocation3 + $0x18] sm:$0xff]  }
  0x2e   : > { %s917_s15 = smov (!%p293_p3, %s773_s15), 1  ;;  %660 = vmatpush3.bf16.msra.mxu0 %v718_v1  ;;  %v722_v5 = vld [vmem:[#allocation3 + $0x20] sm:$0xff]   ;;  %v723_v6 = vld [vmem:[#allocation3 + $0x28] sm:$0xff]   ;;  %v724_v7 = vld [vmem:[#allocation3 + $0x30] sm:$0xff]  }
  0x2f   : > { %661 = vmatprep.subr.bf16.mxu0 %v786_v0  ;;  %s648_s11 = sshll.u32 %s917_s15, 3  ;;  %v725_v8 = vld [vmem:[#allocation3 + $0x38] sm:$0xff]   ;;  %v644_v10 = vld [vmem:[%s901_s2] ss:$0 sm:$0xff]  ;;  %s649_s21 = sshll.u32 %s917_s15, 4 }
  0x30   : > { %s303_s14 = scalar_lea.vmem %s899_s0, %s648_s11  ;;  %v645_v12 = vld [vmem:[%s902_s3] ss:$0 sm:$0xff]  ;;  %s323_s26 = scalar_lea.vmem %s903_s4, %s649_s21 }
  0x31   : > { %v726_v9 = vld [vmem:[%s303_s14] sm:$0xff]  }
  0x32   : > { %662 = vmatpush3.bf16.msra.mxu0 %v719_v2 }
  0x33   : > { %663 = vmatprep.subr.bf16.mxu0 %v786_v0 }
  0x36   : > { %664 = vmatpush3.bf16.msra.mxu0 %v720_v3 }
  0x37   : > { %665 = vmatprep.subr.bf16.mxu0 %v786_v0 }
  0x3a   : > { %666 = vmatpush3.bf16.msra.mxu0 %v721_v4 }
  0x3b   : > { %667 = vmatprep.subr.bf16.mxu0 %v786_v0 }
  0x3e   : > { %668 = vmatpush3.bf16.msra.mxu0 %v722_v5 }
  0x3f   : > { %669 = vmatprep.subr.bf16.mxu0 %v786_v0 }
  0x42   : > { %670 = vmatpush3.bf16.msra.mxu0 %v723_v6 }
  0x43   : > { %671 = vmatprep.subr.bf16.mxu0 %v786_v0 }
  0x46   : > { %672 = vmatpush3.bf16.msra.mxu0 %v724_v7 }
  0x47   : > { %673 = vmatprep.subr.bf16.mxu0 %v786_v0 }
  0x4a   : > { %674 = vmatpush3.bf16.msra.mxu0 %v725_v8 }
  0x4d   : > { %676 = vmatmul.mubr.bf16.vlgmr.msra.gmra.mrb[0].mxu0 %v726_v9 }
 0x120   : > { %v440_v11 = vpop.f32.mrb[0].mxu0 }
 0x121   : > { %v463_v13 = vmul.f32 %v644_v10, %v440_v11  ;;  %v677_v14 = vpop.f32.mrb[1].mxu0 }
 0x122   : > { %v443_v15 = vpop.f32.mrb[2].mxu0 }
 0x123   : > { %v472_v16 = vadd.f32 %v645_v12, %v463_v13  ;;  %v464_v17 = vmul.f32 %v644_v10, %v443_v15  ;;  %v678_v18 = vpop.f32.mrb[3].mxu0 }
 0x125   : > { %474 = vst [vmem:[%s323_s26] sm:$0xff] %v472_v16  ;;  %v473_v19 = vadd.f32 %v645_v12, %v464_v17 }
 0x127   : > { %475 = vst [vmem:[%s323_s26 + $0x8] sm:$0xff] %v473_v19 }
 0x128 PF: > { %s15_s17 = sadd.s32 1, %s781_s17   ;;  %s912_s15 = smov %s777_s16 }
 0x129   : > { %p12_p4 = scmp.ge.s32.totalorder %s15_s17, 4   ;;  %s913_s16 = smov %s915_s19 }
 0x12b   :  { %14 = sbr.rel (!%p12_p4) target bundleno = 2 (0x2), region = 86 }
 0x132   :  { %512 = vsyncpa [#allocation4], 1 }
 0x133   :  { %514 = vsyncpa [#allocation4 + $0x1], 1 }

// kernel: a_call__.12
= control target key start
LH: loop header
LB: loop body
LE: loop exit
PB: predicated region body
PF: predicated region fallthrough
CT: control target
= control target key end

     0   :  { %9 = vsyncpa [#allocation7], 0  ;;  %s1764_s12 = smov 0   ;;  %s1766_s13 = smov 0   ;;  %s1976_s0 = inlined_call_operand.vmem [shape: f32[2,16,128], index: 0, kind: input, shape index: {}]   ;;  %s1977_s1 = inlined_call_operand.hbm [shape: f32[1,128,128], index: 1, kind: input, shape index: {}]   ;;  %s1978_s2 = inlined_call_operand.vmem [shape: f32[2,16,128], index: 2, kind: output, shape index: {0}]   ;;  %s1979_s3 = inlined_call_operand.vmem [shape: f32[2,128,128], index: 3, kind: output, shape index: {1}]  }
   0x1   :  { %s1768_s14 = smov 0   ;;  %s1770_s15 = smov 0  }
   0x2   :  { %s1772_s16 = smov 0  }
   0x3 LB: > { %s1243_s17 = sadd.s32 4294967295, %s1737_s16   ;;  %s30_s18 = sadd.s32 1, %s1729_s14  ;;  %s1737_s16 = sphi %s1772_s16, %s15_s16   ;;  %s1733_s15 = sphi %s1770_s15, %s1991_s15   ;;  %s1729_s14 = sphi %s1768_s14, %s1990_s14   ;;  %s1725_s13 = sphi %s1766_s13, %s1989_s13   ;;  %s1721_s12 = sphi %s1764_s12, %s1988_s12  }
   0x4   : > { %p32_p0 = scmp.ge.s32.totalorder %s30_s18, 4  ;;  %s34_s19 = sadd.s32 1, %s1733_s15 }
   0x5   : > { %p1245_p1 = scmp.ge.s32.totalorder %s1737_s16, 1  ;;  %p142_p2 = scmp.lt.s32.totalorder %s1737_s16, 9 }
   0x6   : > { %s1993_s18 = smov (%p32_p0, %s30_s18), 0  ;;  %s1995_s19 = smov (!%p32_p0, %s34_s19), %s1733_s15 }
   0x7   : > { %p1797_p3 = pnand %p1245_p1, %p142_p2  ;;  %p36_p4 = scmp.ge.s32.totalorder %s1995_s19, 2 }
   0x8   : > { %p1801_p5 = scmp.eq.s32.totalorder %s1243_s17, 0  ;;  %s1739_s22 = smov [#allocation6]  }
   0x9   : > { %s1983_s20 = scalar_select %p1797_p3, 1, 0 }
   0xa   : > { %s1984_s21 = scalar_select %p1801_p5, 1, 0 }
   0xb   : > { %p1593_p6 = pneg %p1797_p3  ;;  %s1997_s19 = smov (%p36_p4, %s1995_s19), 0 }
   0xc   : > { %s154_s23 = sshll.u32 %s1739_s22, 4  ;;  %s1667_s27 = scalar_lea.hbm %s1977_s1, 2048  ;;  %s155_s23 = int_to_ptr.vmem [resolvable:$true] %s154_s23 }
   0xd   : > { %p1811_p7 = pnand %p1801_p5, %p1593_p6  ;;  %p1668_p8 = scmp.ne.s32.totalorder %s1977_s1, %s1667_s27 }
   0xe   : > { %p1674_p12 = scmp.lt.u32.totalorder %s1667_s27, %s1977_s1 }
   0xf   : > { %p1669_p9 = pneg %p1811_p7 }
  0x11   : > { %p1670_p10 = pnand %p1669_p9, %p1668_p8 }
  0x13   : > { %p1671_p11 = pneg %p1670_p10 }
  0x15   : > { %p1676_p13 = pnand %p1674_p12, %p1671_p11 }
  0x17   : > { %1679 = shalt.err (!%p1676_p13)
}
  0x18   : > { %s1680_s5 = scalar_lea.vmem %s155_s23, 2048  ;;  %p1688_p4 = scmp.lt.s32.totalorder %s155_s23, %s155_s23 }
  0x19   : > { %p1681_p0 = scmp.ne.s32.totalorder %s155_s23, %s1680_s5  ;;  %p1689_p6 = scmp.lt.s32.totalorder %s1680_s5, %s1680_s5 }
  0x1b   : > { %p1683_p1 = pnand %p1681_p0, %p1669_p9  ;;  %p1690_p5 = por %p1689_p6, %p1688_p4 }
  0x1d   : > { %p1684_p2 = pneg %p1683_p1 }
  0x1f   : > { %p1691_p3 = pnand %p1690_p5, %p1684_p2 }
  0x21   : > { %1694 = shalt.err (!%p1691_p3)
}
  0x22   : > { %s1740_s6 = smov 128   ;;  %s1741_s7 = smov 8  }
  0x23   : > { %1596 = dma.hbm_to_vmem [thread:$0]  (!%p1811_p7), %s1977_s1, 2048, %s155_s23, [#allocation7], %s1740_s6, %s1740_s6, %s1741_s7  }
  0x24   : > { %p1986_p8 = scmp.ne.s32.totalorder %s1983_s20, 0 }
  0x25   : > { %p1987_p10 = scmp.ne.s32.totalorder (!%p1986_p8), %s1984_s21, 0 }
  0x26   : > { %183 = sbr.rel (%p1986_p8) target bundleno = 1767 (0x6e7), region = 28 }
  0x2d   : > { %1716 = dma.done.wait (%p1987_p10), [#allocation7], 2048  }
  0x2e   : > { %1718 = vsyncadd (%p1987_p10), [#allocation7], 4294965248  ;;  %p221_p3 = scmp.lt.s32.totalorder %s1725_s13, 1  ;;  %p245_p5 = scmp.eq.s32.totalorder %s1721_s12, 0 }
  0x2f   : > { %v251_v0 = vld [vmem:[#allocation6] sm:$0xff] (%p245_p5)  ;;  %v252_v1 = vld [vmem:[#allocation6 + $0x8] sm:$0xff] (%p245_p5)  ;;  %v253_v2 = vld [vmem:[#allocation6 + $0x10] sm:$0xff] (%p245_p5) }
  0x30   : > { %s1999_s13 = smov (!%p221_p3, %s1725_s13), 1  ;;  %250 = sbr.rel (!%p245_p5) target bundleno = 57 (0x39), region = 36 }
  0x31   : > { %s1279_s10 = sshll.u32 %s1999_s13, 4  ;;  %s1281_s11 = sshll.u32 %s1999_s13, 7  ;;  %267 = vst [vmem:[#allocation2] sm:$0xff] (%p245_p5), %v251_v0  ;;  %268 = vst [vmem:[#allocation2 + $0x8] sm:$0xff] (%p245_p5), %v252_v1  ;;  %v254_v3 = vld [vmem:[#allocation6 + $0x18] sm:$0xff] (%p245_p5)  ;;  %v255_v4 = vld [vmem:[#allocation6 + $0x20] sm:$0xff] (%p245_p5) }
  0x32   : > { %s1843_s23 = scalar_lea.vmem %s1976_s0, %s1279_s10  ;;  %s1848_s25 = scalar_lea.vmem %s1978_s2, %s1279_s10  ;;  %269 = vst [vmem:[#allocation2 + $0x10] sm:$0xff] (%p245_p5), %v253_v2  ;;  %v256_v5 = vld [vmem:[#allocation6 + $0x28] sm:$0xff] (%p245_p5)  ;;  %270 = vst [vmem:[#allocation2 + $0x18] sm:$0xff] (%p245_p5), %v254_v3  ;;  %v257_v6 = vld [vmem:[#allocation6 + $0x30] sm:$0xff] (%p245_p5) }
  0x33   : > { %s1853_s27 = scalar_lea.vmem %s1979_s3, %s1281_s11  ;;  %271 = vst [vmem:[#allocation2 + $0x20] sm:$0xff] (%p245_p5), %v255_v4  ;;  %272 = vst [vmem:[#allocation2 + $0x28] sm:$0xff] (%p245_p5), %v256_v5  ;;  %v258_v7 = vld [vmem:[#allocation6 + $0x38] sm:$0xff] (%p245_p5)  ;;  %v259_v8 = vld [vmem:[#allocation6 + $0x40] sm:$0xff] (%p245_p5) }
  0x34   : > { %273 = vst [vmem:[#allocation2 + $0x30] sm:$0xff] (%p245_p5), %v257_v6  ;;  %274 = vst [vmem:[#allocation2 + $0x38] sm:$0xff] (%p245_p5), %v258_v7  ;;  %v260_v9 = vld [vmem:[#allocation6 + $0x48] sm:$0xff] (%p245_p5)  ;;  %v261_v10 = vld [vmem:[#allocation6 + $0x50] sm:$0xff] (%p245_p5) }
  0x35   : > { %275 = vst [vmem:[#allocation2 + $0x40] sm:$0xff] (%p245_p5), %v259_v8  ;;  %v262_v11 = vld [vmem:[#allocation6 + $0x58] sm:$0xff] (%p245_p5)  ;;  %276 = vst [vmem:[#allocation2 + $0x48] sm:$0xff] (%p245_p5), %v260_v9  ;;  %v263_v12 = vld [vmem:[#allocation6 + $0x60] sm:$0xff] (%p245_p5) }
  0x36   : > { %277 = vst [vmem:[#allocation2 + $0x50] sm:$0xff] (%p245_p5), %v261_v10  ;;  %278 = vst [vmem:[#allocation2 + $0x58] sm:$0xff] (%p245_p5), %v262_v11  ;;  %v264_v13 = vld [vmem:[#allocation6 + $0x68] sm:$0xff] (%p245_p5)  ;;  %v265_v14 = vld [vmem:[#allocation6 + $0x70] sm:$0xff] (%p245_p5) }
  0x37   : > { %279 = vst [vmem:[#allocation2 + $0x60] sm:$0xff] %v263_v12  ;;  %280 = vst [vmem:[#allocation2 + $0x68] sm:$0xff] %v264_v13  ;;  %v266_v15 = vld [vmem:[#allocation6 + $0x78] sm:$0xff] }
  0x38   : > { %281 = vst [vmem:[#allocation2 + $0x70] sm:$0xff] %v265_v14  ;;  %282 = vst [vmem:[#allocation2 + $0x78] sm:$0xff] %v266_v15 }
  0x39 PF: > { %v1856_v16 = vld [vmem:[%s1843_s23] sm:$0xff]  ;;  %v1859_v17 = vld [vmem:[%s1843_s23 + $0x8] sm:$0xff]  ;;  %v285_v18 = vlaneseq  ;;  %p289_p7 = scmp.lt.s32.totalorder %s1721_s12, 3  ;;  %v1742_v20 = vmov -1e+30  }
  0x3a   : > { %v1743_v22 = vmov (%p289_p7), 0.0  }
  0x3b   : > { %v286_v19 = vand.u32 127, %v285_v18  ;;  %293 = sbr.rel (!%p289_p7) target bundleno = 68 (0x44), region = 40  ;;  %294 = vst [vmem:[#allocation4] sm:$0xff] (%p289_p7), %v1743_v22  ;;  %295 = vst [vmem:[#allocation4 + $0x8] sm:$0xff] (%p289_p7), %v1743_v22 }
  0x3c   : > { %296 = vst [vmem:[#allocation4 + $0x10] sm:$0xff] (%p289_p7), %v1743_v22  ;;  %297 = vst [vmem:[#allocation4 + $0x18] sm:$0xff] (%p289_p7), %v1743_v22 }
  0x3d   : > { %vm287_vm0 = vcmp.lt.s32.totalorder %v286_v19, 16  ;;  %298 = vst [vmem:[#allocation4 + $0x20] sm:$0xff] (%p289_p7), %v1743_v22  ;;  %299 = vst [vmem:[#allocation4 + $0x28] sm:$0xff] (%p289_p7), %v1743_v22 }
  0x3e   : > { %v1863_v21 = vsel %vm287_vm0, 0.0, %v1742_v20  ;;  %300 = vst [vmem:[#allocation4 + $0x30] sm:$0xff] (%p289_p7), %v1743_v22  ;;  %301 = vst [vmem:[#allocation4 + $0x38] sm:$0xff] (%p289_p7), %v1743_v22 }
  0x3f   : > { %302 = vst [vmem:[#allocation4 + $0x40] sm:$0xff] (%p289_p7), %v1743_v22  ;;  %303 = vst [vmem:[#allocation4 + $0x48] sm:$0xff] (%p289_p7), %v1743_v22 }
  0x40   : > { %304 = vst [vmem:[#allocation4 + $0x50] sm:$0xff] (%p289_p7), %v1743_v22  ;;  %305 = vst [vmem:[#allocation4 + $0x58] sm:$0xff] (%p289_p7), %v1743_v22 }
  0x41   : > { %306 = vst [vmem:[#allocation4 + $0x60] sm:$0xff] (%p289_p7), %v1743_v22  ;;  %307 = vst [vmem:[#allocation4 + $0x68] sm:$0xff] (%p289_p7), %v1743_v22 }
  0x42   : > { %308 = vst [vmem:[#allocation4 + $0x70] sm:$0xff] %v1743_v22  ;;  %309 = vst [vmem:[#allocation4 + $0x78] sm:$0xff] %v1743_v22 }
  0x43   : > { %310 = vst [vmem:[#allocation5] sm:$0x1] %v1743_v22 }
  0x44 PF: > { %p1258_p9 = scmp.ge.s32.totalorder %s1721_s12, 3 }
  0x45   : > { %v314_v23 = vld [vmem:[#allocation2] sm:$0xff] (!%p1258_p9)  ;;  %v315_v24 = vld [vmem:[#allocation2 + $0x8] sm:$0xff] (!%p1258_p9)  ;;  %v316_v25 = vld [vmem:[#allocation2 + $0x10] sm:$0xff] (!%p1258_p9)  ;;  %1388 = vmatprep.mubr.f32.mxu0 (!%p1258_p9), %v1856_v16  ;;  %vm481_vm1 = vcmask (!%p1258_p9), 130048   ;;  %p1275_p11 = scmp.ne.s32.totalorder (!%p1258_p9), %s1721_s12, 2 }
  0x46   : > { %313 = sbr.rel (%p1258_p9) target bundleno = 985 (0x3d9), region = 44  ;;  %v1489_v26 = vpack.c.bf16 (!%p1258_p9), %v315_v24, %v314_v23  ;;  %v317_v27 = vld [vmem:[#allocation2 + $0x18] sm:$0xff] (!%p1258_p9)  ;;  %v318_v29 = vld [vmem:[#allocation2 + $0x20] sm:$0xff] (!%p1258_p9)  ;;  %v319_v30 = vld [vmem:[#allocation2 + $0x28] sm:$0xff] (!%p1258_p9) }
  0x47   : > { %v1493_v28 = vpack.c.bf16 (!%p1258_p9), %v317_v27, %v316_v25  ;;  %v1497_v31 = vpack.c.bf16 (!%p1258_p9), %v319_v30, %v318_v29  ;;  %v320_v32 = vld [vmem:[#allocation2 + $0x30] sm:$0xff] (!%p1258_p9)  ;;  %v321_v33 = vld [vmem:[#allocation2 + $0x38] sm:$0xff] (!%p1258_p9)  ;;  %v322_v35 = vld [vmem:[#allocation2 + $0x40] sm:$0xff] (!%p1258_p9) }
  0x48   : > { %1490 = vmatprep.subr.bf16.mxu0 (!%p1258_p9), %v1489_v26  ;;  %v1501_v34 = vpack.c.bf16 (!%p1258_p9), %v321_v33, %v320_v32  ;;  %v323_v36 = vld [vmem:[#allocation2 + $0x48] sm:$0xff] (!%p1258_p9)  ;;  %v324_v38 = vld [vmem:[#allocation2 + $0x50] sm:$0xff] (!%p1258_p9)  ;;  %v325_v39 = vld [vmem:[#allocation2 + $0x58] sm:$0xff] (!%p1258_p9) }
  0x49   : > { %1492 = vmatpush3.bf16.msra.mxu0 (!%p1258_p9), %v1489_v26  ;;  %v1505_v37 = vpack.c.bf16 (!%p1258_p9), %v323_v36, %v322_v35  ;;  %v1509_v40 = vpack.c.bf16 (!%p1258_p9), %v325_v39, %v324_v38  ;;  %v326_v41 = vld [vmem:[#allocation2 + $0x60] sm:$0xff] (!%p1258_p9)  ;;  %v327_v42 = vld [vmem:[#allocation2 + $0x68] sm:$0xff] (!%p1258_p9)  ;;  %v328_v44 = vld [vmem:[#allocation2 + $0x70] sm:$0xff] (!%p1258_p9) }
  0x4a   : > { %1494 = vmatprep.subr.bf16.mxu0 (!%p1258_p9), %v1493_v28  ;;  %v1513_v43 = vpack.c.bf16 (!%p1258_p9), %v327_v42, %v326_v41  ;;  %v329_v45 = vld [vmem:[#allocation2 + $0x78] sm:$0xff] (!%p1258_p9)  ;;  %v423_v24 = vld [vmem:[#allocation5] sm:$0x1] (!%p1258_p9)  ;;  %v435_v38 = vld [vmem:[#allocation4 + $0x10] sm:$0xff] (!%p1258_p9) }
  0x4b   : > { %v1517_v46 = vpack.c.bf16 (!%p1258_p9), %v329_v45, %v328_v44  ;;  %v433_v32 = vld [vmem:[#allocation4] sm:$0xff] (!%p1258_p9) }
  0x4c   : > { %v437_v44 = vld [vmem:[#allocation4 + $0x20] sm:$0xff] (!%p1258_p9) }
  0x4d   : > { %1496 = vmatpush3.bf16.msra.mxu0 %v1493_v28 }
  0x4e   : > { %1498 = vmatprep.subr.bf16.mxu0 %v1497_v31 }
  0x51   : > { %1500 = vmatpush3.bf16.msra.mxu0 %v1497_v31  ;;  %v434_v31 = vld [vmem:[#allocation4 + $0x8] sm:$0xff] }
  0x52   : > { %1502 = vmatprep.subr.bf16.mxu0 %v1501_v34 }
  0x55   : > { %1504 = vmatpush3.bf16.msra.mxu0 %v1501_v34 }
  0x56   : > { %1506 = vmatprep.subr.bf16.mxu0 %v1505_v37 }
  0x59   : > { %1508 = vmatpush3.bf16.msra.mxu0 %v1505_v37  ;;  %v436_v37 = vld [vmem:[#allocation4 + $0x18] sm:$0xff] }
  0x5a   : > { %1510 = vmatprep.subr.bf16.mxu0 %v1509_v40 }
  0x5d   : > { %1512 = vmatpush3.bf16.msra.mxu0 %v1509_v40 }
  0x5e   : > { %1514 = vmatprep.subr.bf16.mxu0 %v1513_v43 }
  0x61   : > { %1516 = vmatpush3.bf16.msra.mxu0 %v1513_v43  ;;  %v438_v43 = vld [vmem:[#allocation4 + $0x28] sm:$0xff] }
  0x62   : > { %1518 = vmatprep.subr.bf16.mxu0 %v1517_v46 }
  0x65   : > { %1520 = vmatpush3.bf16.msra.mxu0 %v1517_v46 }
  0x68   : > { %1389 = vmatmul.mubr.f32.vlgmr.msra.gmra.mrb[0].mxu0 %v1859_v17 }
 0x13b   : > { %v1390_v47 = vpop.f32.mrb[0].mxu0 }
 0x13c   : > { %v396_v48 = vpop.f32.mrb[1].mxu0  ;;  %v402_v50 = vadd.f32 %v1390_v47, %v1863_v21 }
 0x13d   : > { %v397_v49 = vadd.f32 %v396_v48, %v1863_v21 }
 0x13f   : > { %405 = vmax.xlane.f32.xlu0 %v397_v49 }
 0x143   : > { %407 = vmax.xlane.f32.xlu0 %v402_v50 }
 0x170   : > { %449 = vxpose.xlu0.b32.start [1/2] (short) %v1856_v16, 128 }
 0x174   : > { %450 = vxpose.xlu0.b32.end [2/2] (short) %v1859_v17, 128 }
 0x1cc   : > { %v406_v51 = vpop.xlane.xlu0 %405 }
 0x1cd   : > { %v409_v52 = vsub.f32 %v397_v49, %v406_v51  ;;  %v440_v49 = vld [vmem:[#allocation4 + $0x38] sm:$0xff] }
 0x1cf   : > { %v411_v53 = vmul.f32 1.442695, %v409_v52 }
 0x1d0   : > { %v408_v54 = vpop.xlane.xlu0 %407 }
 0x1d1   : > { %1645 = vpow2.f32 %v411_v53  ;;  %v410_v55 = vsub.f32 %v402_v50, %v408_v54  ;;  %v439_v50 = vld [vmem:[#allocation4 + $0x30] sm:$0xff] }
 0x1d3   : > { %v413_v56 = vmul.f32 1.442695, %v410_v55  ;;  %v442_v55 = vld [vmem:[#allocation4 + $0x48] sm:$0xff] }
 0x1d5   : > { %1647 = vpow2.f32 %v413_v56  ;;  %v441_v56 = vld [vmem:[#allocation4 + $0x40] sm:$0xff] }
 0x1db   : > { %v1646_v57 = vpop.eup %1645 }
 0x1dc   : > { %415 = vadd.xlane.f32.xlu1 %v1646_v57 }
 0x1df   : > { %v1648_v58 = vpop.eup %1647 }
 0x1e0   : > { %417 = vadd.xlane.f32.xlu1 %v1648_v58 }
 0x1f0   : > { %v465_v59 = vpop.trf.xlu0 }
 0x1f1   : > { %1395 = vmatprep.mubr.msk.f32.mxu1 %vm481_vm1, %v465_v59 }
 0x1f4   : > { %v466_v60 = vpop.trf.xlu0 }
 0x1f8   : > { %v467_v61 = vpop.trf.xlu0 }
 0x1fc   : > { %v468_v62 = vpop.trf.xlu0 }
 0x200   : > { %v469_v63 = vpop.trf.xlu0 }
 0x204   : > { %v470_v0 = vpop.trf.xlu0 }
 0x208   : > { %v471_v1 = vpop.trf.xlu0 }
 0x20c   : > { %v472_v3 = vpop.trf.xlu0 }
 0x210   : > { %v473_v5 = vpop.trf.xlu0 }
 0x214   : > { %v474_v7 = vpop.trf.xlu0 }
 0x218   : > { %v475_v13 = vpop.trf.xlu0 }
 0x21c   : > { %v476_v20 = vpop.trf.xlu0 }
 0x220   : > { %v477_v26 = vpop.trf.xlu0 }
 0x224   : > { %v478_v28 = vpop.trf.xlu0 }
 0x228   : > { %v479_v29 = vpop.trf.xlu0 }
 0x22c   : > { %v480_v30 = vpop.trf.xlu0 }
 0x269   : > { %v416_v2 = vpop.xlane.xlu1 %415 }
 0x26a   : > { %1649 = vrcp.f32 %v416_v2 }
 0x26d   : > { %v418_v4 = vpop.xlane.xlu1 %417 }
 0x26e   : > { %1651 = vrcp.f32 %v418_v4  ;;  %v445_v4 = vld [vmem:[#allocation4 + $0x60] sm:$0xff] }
 0x274   : > { %v1650_v6 = vpop.eup %1649 }
 0x275   : > { %v421_v9 = vmul.f32 %v1650_v6, %v1646_v57 }
 0x278   : > { %v1652_v8 = vpop.eup %1651 }
 0x279   : > { %v422_v10 = vmul.f32 %v1652_v8, %v1648_v58 }
 0x27b   : > { %v424_v11 = vadd.f32 %v422_v10, %v421_v9  ;;  %v1521_v12 = vpack.c.bf16 %v422_v10, %v421_v9  ;;  %v448_v9 = vld [vmem:[#allocation4 + $0x78] sm:$0xff]  ;;  %v447_v10 = vld [vmem:[#allocation4 + $0x70] sm:$0xff] }
 0x27d   : > { %v425_v14 = vrot.slane %v424_v11, 4  ;;  %1522 = vmatprep.subr.bf16.mxu1 %v1521_v12 }
 0x27e   : > { %1524 = vmatpush3.bf16.msra.mxu1 %v1521_v12 }
 0x27f   : > { %v426_v15 = vadd.f32 %v425_v14, %v424_v11 }
 0x281   : > { %v427_v19 = vrot.slane %v426_v15, 2  ;;  %1396 = vmatmul.mubr.msk.f32.vlgmr.msra.gmra.mrb[0].mxu1 %vm481_vm1, %v466_v60 }
 0x282   : > { %1398 = vmatprep.mubr.msk.f32.mxu1 %vm481_vm1, %v467_v61  ;;  %v444_v61 = vld [vmem:[#allocation4 + $0x58] sm:$0xff] }
 0x283   : > { %v428_v22 = vadd.f32 %v427_v19, %v426_v15  ;;  %v714_v15 = vld [vmem:[#allocation2] sm:$0xff] (!%p1275_p11)  ;;  %v715_v19 = vld [vmem:[#allocation2 + $0x8] sm:$0xff] (!%p1275_p11) }
 0x284   : > { %730 = vst [vmem:[#allocation3] sm:$0xff] (!%p1275_p11), %v714_v15  ;;  %731 = vst [vmem:[#allocation3 + $0x8] sm:$0xff] (!%p1275_p11), %v715_v19 }
 0x285   : > { %v429_v23 = vrot.slane %v428_v22, 1  ;;  %1399 = vmatmul.mubr.msk.f32.gmra.mrb[2].mxu1 %vm481_vm1, %v468_v62  ;;  %v443_v62 = vld [vmem:[#allocation4 + $0x50] sm:$0xff] }
 0x286   : > { %1401 = vmatprep.mubr.msk.f32.mxu1 %vm481_vm1, %v469_v63 }
 0x287   : > { %v430_v25 = vadd.f32 %v429_v23, %v428_v22  ;;  %v717_v22 = vld [vmem:[#allocation2 + $0x18] sm:$0xff] (!%p1275_p11)  ;;  %v718_v23 = vld [vmem:[#allocation2 + $0x20] sm:$0xff] (!%p1275_p11) }
 0x288   : > { %733 = vst [vmem:[#allocation3 + $0x18] sm:$0xff] (!%p1275_p11), %v717_v22  ;;  %734 = vst [vmem:[#allocation3 + $0x20] sm:$0xff] (!%p1275_p11), %v718_v23 }
 0x289   : > { %v431_v27 = vadd.f32 %v430_v25, %v423_v24  ;;  %1402 = vmatmul.mubr.msk.f32.gmra.mrb[4].mxu1 %vm481_vm1, %v470_v0  ;;  %v719_v24 = vld [vmem:[#allocation2 + $0x28] sm:$0xff] (!%p1275_p11)  ;;  %v720_v25 = vld [vmem:[#allocation2 + $0x30] sm:$0xff] (!%p1275_p11) }
 0x28a   : > { %1404 = vmatprep.mubr.msk.f32.mxu1 %vm481_vm1, %v471_v1  ;;  %735 = vst [vmem:[#allocation3 + $0x28] sm:$0xff] (!%p1275_p11), %v719_v24  ;;  %736 = vst [vmem:[#allocation3 + $0x30] sm:$0xff] (!%p1275_p11), %v720_v25 }
 0x28b   : > { %432 = vst [vmem:[#allocation5] sm:$0x1] %v431_v27  ;;  %v722_v27 = vld [vmem:[#allocation2 + $0x40] sm:$0xff] (!%p1275_p11) }
 0x28c   : > { %738 = vst [vmem:[#allocation3 + $0x40] sm:$0xff] (!%p1275_p11), %v722_v27 }
 0x28d   : > { %1405 = vmatmul.mubr.msk.f32.gmra.mrb[6].mxu1 %vm481_vm1, %v472_v3  ;;  %v446_v3 = vld [vmem:[#allocation4 + $0x68] sm:$0xff] }
 0x28e   : > { %1407 = vmatprep.mubr.msk.f32.mxu1 %vm481_vm1, %v473_v5 }
 0x291   : > { %1408 = vmatmul.mubr.msk.f32.gmra.mrb[8].mxu1 %vm481_vm1, %v474_v7 }
 0x292   : > { %1410 = vmatprep.mubr.msk.f32.mxu1 %vm481_vm1, %v475_v13 }
 0x295   : > { %1411 = vmatmul.mubr.msk.f32.gmra.mrb[10].mxu1 %vm481_vm1, %v476_v20  ;;  %v716_v20 = vld [vmem:[#allocation2 + $0x10] sm:$0xff] (!%p1275_p11) }
 0x296   : > { %1413 = vmatprep.mubr.msk.f32.mxu1 %vm481_vm1, %v477_v26  ;;  %732 = vst [vmem:[#allocation3 + $0x10] sm:$0xff] (!%p1275_p11), %v716_v20  ;;  %v721_v26 = vld [vmem:[#allocation2 + $0x38] sm:$0xff] (!%p1275_p11) }
 0x297   : > { %737 = vst [vmem:[#allocation3 + $0x38] sm:$0xff] (!%p1275_p11), %v721_v26 }
 0x299   : > { %1414 = vmatmul.mubr.msk.f32.gmra.mrb[12].mxu1 %vm481_vm1, %v478_v28  ;;  %v723_v28 = vld [vmem:[#allocation2 + $0x48] sm:$0xff] (!%p1275_p11) }
 0x29a   : > { %1416 = vmatprep.mubr.msk.f32.mxu1 %vm481_vm1, %v479_v29  ;;  %v724_v29 = vld [vmem:[#allocation2 + $0x50] sm:$0xff] (!%p1275_p11)  ;;  %739 = vst [vmem:[#allocation3 + $0x48] sm:$0xff] (!%p1275_p11), %v723_v28 }
 0x29b   : > { %740 = vst [vmem:[#allocation3 + $0x50] sm:$0xff] (!%p1275_p11), %v724_v29 }
 0x29d   : > { %1417 = vmatmul.mubr.msk.f32.gmra.mrb[14].mxu1 %vm481_vm1, %v480_v30  ;;  %v725_v30 = vld [vmem:[#allocation2 + $0x58] sm:$0xff] (!%p1275_p11) }
 0x29e   : > { %741 = vst [vmem:[#allocation3 + $0x58] sm:$0xff] (!%p1275_p11), %v725_v30 }
 0x354   : > { %v1397_v33 = vpop.f32.mrb[0].mxu1 }
 0x355   : > { %v676_v34 = vadd.f32 %v1397_v33, %v434_v31  ;;  %v596_v35 = vpop.f32.mrb[1].mxu1  ;;  %v726_v31 = vld [vmem:[#allocation2 + $0x60] sm:$0xff] (!%p1275_p11)  ;;  %v728_v33 = vld [vmem:[#allocation2 + $0x70] sm:$0xff] (!%p1275_p11) }
 0x356   : > { %v675_v36 = vadd.f32 %v596_v35, %v433_v32  ;;  %v727_v32 = vld [vmem:[#allocation2 + $0x68] sm:$0xff] (!%p1275_p11)  ;;  %742 = vst [vmem:[#allocation3 + $0x60] sm:$0xff] (!%p1275_p11), %v726_v31  ;;  %744 = vst [vmem:[#allocation3 + $0x70] sm:$0xff] (!%p1275_p11), %v728_v33 }
 0x357   : > { %692 = vst [vmem:[#allocation4 + $0x8] sm:$0xff] %v676_v34  ;;  %743 = vst [vmem:[#allocation3 + $0x68] sm:$0xff] (!%p1275_p11), %v727_v32  ;;  %v729_v34 = vld [vmem:[#allocation2 + $0x78] sm:$0xff] (!%p1275_p11) }
 0x358   : > { %691 = vst [vmem:[#allocation4] sm:$0xff] %v675_v36  ;;  %v1400_v39 = vpop.f32.mrb[2].mxu1  ;;  %745 = vst [vmem:[#allocation3 + $0x78] sm:$0xff] (!%p1275_p11), %v729_v34 }
 0x359   : > { %v678_v40 = vadd.f32 %v1400_v39, %v436_v37  ;;  %v606_v41 = vpop.f32.mrb[3].mxu1 }
 0x35a   : > { %v677_v42 = vadd.f32 %v606_v41, %v435_v38 }
 0x35b   : > { %694 = vst [vmem:[#allocation4 + $0x18] sm:$0xff] %v678_v40 }
 0x35c   : > { %693 = vst [vmem:[#allocation4 + $0x10] sm:$0xff] %v677_v42  ;;  %v1403_v45 = vpop.f32.mrb[4].mxu1 }
 0x35d   : > { %v680_v46 = vadd.f32 %v1403_v45, %v438_v43  ;;  %v616_v47 = vpop.f32.mrb[5].mxu1 }
 0x35e   : > { %v679_v48 = vadd.f32 %v616_v47, %v437_v44 }
 0x35f   : > { %696 = vst [vmem:[#allocation4 + $0x28] sm:$0xff] %v680_v46 }
 0x360   : > { %695 = vst [vmem:[#allocation4 + $0x20] sm:$0xff] %v679_v48  ;;  %v1406_v51 = vpop.f32.mrb[6].mxu1 }
 0x361   : > { %v682_v52 = vadd.f32 %v1406_v51, %v440_v49  ;;  %v626_v53 = vpop.f32.mrb[7].mxu1 }
 0x362   : > { %v681_v54 = vadd.f32 %v626_v53, %v439_v50 }
 0x363   : > { %698 = vst [vmem:[#allocation4 + $0x38] sm:$0xff] %v682_v52 }
 0x364   : > { %697 = vst [vmem:[#allocation4 + $0x30] sm:$0xff] %v681_v54  ;;  %v1409_v57 = vpop.f32.mrb[8].mxu1 }
 0x365   : > { %v684_v58 = vadd.f32 %v1409_v57, %v442_v55  ;;  %v636_v59 = vpop.f32.mrb[9].mxu1 }
 0x366   : > { %v683_v60 = vadd.f32 %v636_v59, %v441_v56 }
 0x367   : > { %700 = vst [vmem:[#allocation4 + $0x48] sm:$0xff] %v684_v58 }
 0x368   : > { %699 = vst [vmem:[#allocation4 + $0x40] sm:$0xff] %v683_v60  ;;  %v1412_v63 = vpop.f32.mrb[10].mxu1 }
 0x369   : > { %v686_v0 = vadd.f32 %v1412_v63, %v444_v61  ;;  %v646_v1 = vpop.f32.mrb[11].mxu1 }
 0x36a   : > { %v685_v2 = vadd.f32 %v646_v1, %v443_v62 }
 0x36b   : > { %702 = vst [vmem:[#allocation4 + $0x58] sm:$0xff] %v686_v0 }
 0x36c   : > { %701 = vst [vmem:[#allocation4 + $0x50] sm:$0xff] %v685_v2  ;;  %v1415_v5 = vpop.f32.mrb[12].mxu1 }
 0x36d   : > { %v688_v6 = vadd.f32 %v1415_v5, %v446_v3  ;;  %v656_v7 = vpop.f32.mrb[13].mxu1 }
 0x36e   : > { %v687_v8 = vadd.f32 %v656_v7, %v445_v4  ;;  %713 = sbr.rel (%p1275_p11) target bundleno = 885 (0x375), region = 52 }
 0x36f   : > { %704 = vst [vmem:[#allocation4 + $0x68] sm:$0xff] %v688_v6 }
 0x370   : > { %703 = vst [vmem:[#allocation4 + $0x60] sm:$0xff] %v687_v8  ;;  %v1418_v11 = vpop.f32.mrb[14].mxu1 }
 0x371   : > { %v690_v12 = vadd.f32 %v1418_v11, %v448_v9  ;;  %v666_v13 = vpop.f32.mrb[15].mxu1 }
 0x372   : > { %v689_v14 = vadd.f32 %v666_v13, %v447_v10 }
 0x373   : > { %706 = vst [vmem:[#allocation4 + $0x78] sm:$0xff] %v690_v12 }
 0x374   : > { %705 = vst [vmem:[#allocation4 + $0x70] sm:$0xff] %v689_v14 }
 0x375 PF: > { %v762_v35 = vld [vmem:[#allocation5] sm:$0x1]  ;;  %v767_v37 = vshrl.u32 %v285_v18, 7  ;;  %v747_v41 = vld [vmem:[#allocation4 + $0x8] sm:$0xff]  ;;  %v748_v43 = vld [vmem:[#allocation4 + $0x10] sm:$0xff] }
 0x376   : > { %v763_v36 = vadd.f32 1e-06, %v762_v35  ;;  %v746_v40 = vld [vmem:[#allocation4] sm:$0xff]  ;;  %v749_v46 = vld [vmem:[#allocation4 + $0x18] sm:$0xff]  ;;  %v751_v51 = vld [vmem:[#allocation4 + $0x28] sm:$0xff] }
 0x377   : > { %v768_v38 = vsub.s32 0, %v767_v37  ;;  %v750_v48 = vld [vmem:[#allocation4 + $0x20] sm:$0xff]  ;;  %v752_v54 = vld [vmem:[#allocation4 + $0x30] sm:$0xff]  ;;  %v753_v58 = vld [vmem:[#allocation4 + $0x38] sm:$0xff] }
 0x378   : > { %1653 = vrcp.f32 %v763_v36  ;;  %v754_v62 = vld [vmem:[#allocation4 + $0x40] sm:$0xff]  ;;  %v755_v2 = vld [vmem:[#allocation4 + $0x48] sm:$0xff]  ;;  %v756_v6 = vld [vmem:[#allocation4 + $0x50] sm:$0xff] }
 0x379   : > { %v757_v10 = vld [vmem:[#allocation4 + $0x58] sm:$0xff]  ;;  %v758_v14 = vld [vmem:[#allocation4 + $0x60] sm:$0xff]  ;;  %v759_v22 = vld [vmem:[#allocation4 + $0x68] sm:$0xff] }
 0x37a   : > { %v761_v30 = vld [vmem:[#allocation4 + $0x78] sm:$0xff] }
 0x37b   : > { %v760_v26 = vld [vmem:[#allocation4 + $0x70] sm:$0xff] }
 0x382   : > { %v1654_v39 = vpop.eup %1653 }
 0x383   : > { %v769_v42 = vrot.slane %v1654_v39, %v768_v38 }
 0x385   : > { %v1892_v44 = vmul.f32 %v769_v42, %v746_v40  ;;  %v1894_v45 = vmul.f32 %v769_v42, %v747_v41  ;;  %v1896_v47 = vmul.f32 %v769_v42, %v748_v43  ;;  %v1898_v49 = vmul.f32 %v769_v42, %v749_v46 }
 0x386   : > { %v1904_v52 = vmul.f32 %v769_v42, %v750_v48  ;;  %v1908_v55 = vmul.f32 %v769_v42, %v751_v51  ;;  %v1912_v59 = vmul.f32 %v769_v42, %v752_v54  ;;  %v1916_v63 = vmul.f32 %v769_v42, %v753_v58 }
 0x387   : > { %v787_v50 = vmul.f32 %v1892_v44, %v1892_v44  ;;  %v788_v18 = vmul.f32 %v1894_v45, %v1894_v45  ;;  %v789_v53 = vmul.f32 %v1896_v47, %v1896_v47  ;;  %v790_v56 = vmul.f32 %v1898_v49, %v1898_v49 }
 0x388   : > { %v791_v60 = vmul.f32 %v1904_v52, %v1904_v52  ;;  %v792_v0 = vmul.f32 %v1908_v55, %v1908_v55  ;;  %v1920_v3 = vmul.f32 %v769_v42, %v754_v62  ;;  %v793_v4 = vmul.f32 %v1912_v59, %v1912_v59 }
 0x389   : > { %v803_v57 = vadd.f32 %v788_v18, %v787_v50  ;;  %v780_v7 = vmul.f32 %v769_v42, %v755_v2  ;;  %v794_v8 = vmul.f32 %v1916_v63, %v1916_v63  ;;  %v781_v11 = vmul.f32 %v769_v42, %v756_v6 }
 0x38a   : > { %v795_v12 = vmul.f32 %v1920_v3, %v1920_v3  ;;  %v782_v15 = vmul.f32 %v769_v42, %v757_v10  ;;  %v783_v23 = vmul.f32 %v769_v42, %v758_v14  ;;  %v784_v27 = vmul.f32 %v769_v42, %v759_v22 }
 0x38b   : > { %v804_v61 = vadd.f32 %v803_v57, %v789_v53  ;;  %v796_v19 = vmul.f32 %v780_v7, %v780_v7  ;;  %v797_v24 = vmul.f32 %v781_v11, %v781_v11  ;;  %v785_v31 = vmul.f32 %v769_v42, %v760_v26 }
 0x38c   : > { %v798_v28 = vmul.f32 %v782_v15, %v782_v15  ;;  %v799_v32 = vmul.f32 %v783_v23, %v783_v23  ;;  %v786_v34 = vmul.f32 %v769_v42, %v761_v30  ;;  %v800_v35 = vmul.f32 %v784_v27, %v784_v27 }
 0x38d   : > { %v805_v1 = vadd.f32 %v804_v61, %v790_v56  ;;  %v801_v37 = vmul.f32 %v785_v31, %v785_v31 }
 0x38e   : > { %v802_v39 = vmul.f32 %v786_v34, %v786_v34 }
 0x38f   : > { %v806_v5 = vadd.f32 %v805_v1, %v791_v60 }
 0x391   : > { %v807_v9 = vadd.f32 %v806_v5, %v792_v0 }
 0x393   : > { %v808_v13 = vadd.f32 %v807_v9, %v793_v4 }
 0x395   : > { %v809_v20 = vadd.f32 %v808_v13, %v794_v8 }
 0x397   : > { %v810_v25 = vadd.f32 %v809_v20, %v795_v12 }
 0x399   : > { %v811_v29 = vadd.f32 %v810_v25, %v796_v19 }
 0x39b   : > { %v812_v33 = vadd.f32 %v811_v29, %v797_v24 }
 0x39d   : > { %v813_v36 = vadd.f32 %v812_v33, %v798_v28 }
 0x39f   : > { %v814_v38 = vadd.f32 %v813_v36, %v799_v32 }
 0x3a1   : > { %v815_v40 = vadd.f32 %v814_v38, %v800_v35 }
 0x3a3   : > { %v816_v41 = vadd.f32 %v815_v40, %v801_v37 }
 0x3a5   : > { %v817_v43 = vadd.f32 %v816_v41, %v802_v39 }
 0x3a7   : > { %v818_v46 = vrot.slane %v817_v43, 4 }
 0x3a9   : > { %v819_v48 = vadd.f32 %v818_v46, %v817_v43 }
 0x3ab   : > { %v820_v50 = vrot.slane %v819_v48, 2 }
 0x3ad   : > { %v821_v18 = vadd.f32 %v820_v50, %v819_v48 }
 0x3af   : > { %v822_v51 = vrot.slane %v821_v18, 1 }
 0x3b1   : > { %v823_v53 = vadd.f32 %v822_v51, %v821_v18 }
 0x3b3   : > { %1655 = vrsqrt.f32 %v823_v53  ;;  %vm826_vm2 = vcmp.eq.f32.partialorder %v823_v53, inf  ;;  %v829_v56 = vand.u32 2147483648, %v823_v53  ;;  %vm828_vm3 = vcmp.eq.f32.partialorder %v823_v53, 0.0 }
 0x3bd   : > { %v1656_v54 = vpop.eup %1655 }
 0x3be   : > { %v825_v57 = vmul.f32 %v1656_v54, %v823_v53 }
 0x3c0   : > { %v827_v42 = vsel %vm826_vm2, %v823_v53, %v825_v57 }
 0x3c1   : > { %v830_v58 = vsel %vm828_vm3, %v829_v56, %v827_v42 }
 0x3c2   : > { %v831_v60 = vadd.f32 1e-06, %v830_v58 }
 0x3c4   : > { %1657 = vrcp.f32 %v831_v60 }
 0x3ce   : > { %v1658_v61 = vpop.eup %1657 }
 0x3cf   : > { %v833_v62 = vmul.f32 %v1658_v61, %v1892_v44  ;;  %v834_v0 = vmul.f32 %v1658_v61, %v1894_v45  ;;  %v835_v1 = vmul.f32 %v1658_v61, %v1896_v47  ;;  %v836_v2 = vmul.f32 %v1658_v61, %v1898_v49 }
 0x3d0   : > { %v837_v4 = vmul.f32 %v1658_v61, %v1904_v52  ;;  %v838_v5 = vmul.f32 %v1658_v61, %v1908_v55  ;;  %v839_v6 = vmul.f32 %v1658_v61, %v1912_v59  ;;  %v840_v8 = vmul.f32 %v1658_v61, %v1916_v63 }
 0x3d1   : > { %849 = vst [vmem:[#allocation2] sm:$0xff] %v833_v62  ;;  %850 = vst [vmem:[#allocation2 + $0x8] sm:$0xff] %v834_v0  ;;  %v841_v44 = vmul.f32 %v1658_v61, %v1920_v3  ;;  %v842_v9 = vmul.f32 %v1658_v61, %v780_v7  ;;  %v843_v45 = vmul.f32 %v1658_v61, %v781_v11 }
 0x3d2   : > { %851 = vst [vmem:[#allocation2 + $0x10] sm:$0xff] %v835_v1  ;;  %852 = vst [vmem:[#allocation2 + $0x18] sm:$0xff] %v836_v2  ;;  %v844_v10 = vmul.f32 %v1658_v61, %v782_v15  ;;  %v845_v47 = vmul.f32 %v1658_v61, %v783_v23  ;;  %v846_v49 = vmul.f32 %v1658_v61, %v784_v27 }
 0x3d3   : > { %853 = vst [vmem:[#allocation2 + $0x20] sm:$0xff] %v837_v4  ;;  %854 = vst [vmem:[#allocation2 + $0x28] sm:$0xff] %v838_v5  ;;  %v847_v52 = vmul.f32 %v1658_v61, %v785_v31  ;;  %v848_v55 = vmul.f32 %v1658_v61, %v786_v34 }
 0x3d4   : > { %855 = vst [vmem:[#allocation2 + $0x30] sm:$0xff] %v839_v6  ;;  %856 = vst [vmem:[#allocation2 + $0x38] sm:$0xff] %v840_v8 }
 0x3d5   : > { %857 = vst [vmem:[#allocation2 + $0x40] sm:$0xff] %v841_v44  ;;  %858 = vst [vmem:[#allocation2 + $0x48] sm:$0xff] %v842_v9 }
 0x3d6   : > { %859 = vst [vmem:[#allocation2 + $0x50] sm:$0xff] %v843_v45  ;;  %860 = vst [vmem:[#allocation2 + $0x58] sm:$0xff] %v844_v10 }
 0x3d7   : > { %861 = vst [vmem:[#allocation2 + $0x60] sm:$0xff] %v845_v47  ;;  %862 = vst [vmem:[#allocation2 + $0x68] sm:$0xff] %v846_v49 }
 0x3d8   : > { %863 = vst [vmem:[#allocation2 + $0x70] sm:$0xff] %v847_v52  ;;  %864 = vst [vmem:[#allocation2 + $0x78] sm:$0xff] %v848_v55 }
 0x3d9 PF: > { %868 = sbr.rel (%p289_p7) target bundleno = 1767 (0x6e7), region = 56  ;;  %v869_v59 = vld [vmem:[#allocation3] sm:$0xff] (!%p289_p7)  ;;  %v870_v63 = vld [vmem:[#allocation3 + $0x8] sm:$0xff] (!%p289_p7)  ;;  %v871_v3 = vld [vmem:[#allocation3 + $0x10] sm:$0xff] (!%p289_p7)  ;;  %1451 = vmatprep.mubr.f32.mxu0 (!%p289_p7), %v1856_v16 }
 0x3da   : > { %v1525_v7 = vpack.c.bf16 (!%p289_p7), %v870_v63, %v869_v59  ;;  %v872_v11 = vld [vmem:[#allocation3 + $0x18] sm:$0xff] (!%p289_p7)  ;;  %v873_v13 = vld [vmem:[#allocation3 + $0x20] sm:$0xff] (!%p289_p7)  ;;  %v874_v14 = vld [vmem:[#allocation3 + $0x28] sm:$0xff] (!%p289_p7) }
 0x3db   : > { %v1529_v12 = vpack.c.bf16 (!%p289_p7), %v872_v11, %v871_v3  ;;  %v1533_v15 = vpack.c.bf16 (!%p289_p7), %v874_v14, %v873_v13  ;;  %v875_v19 = vld [vmem:[#allocation3 + $0x30] sm:$0xff] (!%p289_p7)  ;;  %v876_v20 = vld [vmem:[#allocation3 + $0x38] sm:$0xff] (!%p289_p7)  ;;  %v877_v23 = vld [vmem:[#allocation3 + $0x40] sm:$0xff] (!%p289_p7) }
 0x3dc   : > { %1526 = vmatprep.subr.bf16.mxu0 (!%p289_p7), %v1525_v7  ;;  %v1537_v22 = vpack.c.bf16 (!%p289_p7), %v876_v20, %v875_v19  ;;  %v878_v24 = vld [vmem:[#allocation3 + $0x48] sm:$0xff] (!%p289_p7)  ;;  %v879_v16 = vld [vmem:[#allocation3 + $0x50] sm:$0xff] (!%p289_p7)  ;;  %v880_v26 = vld [vmem:[#allocation3 + $0x58] sm:$0xff] (!%p289_p7) }
 0x3dd   : > { %1528 = vmatpush3.bf16.msra.mxu0 (!%p289_p7), %v1525_v7  ;;  %v1541_v25 = vpack.c.bf16 (!%p289_p7), %v878_v24, %v877_v23  ;;  %v1545_v27 = vpack.c.bf16 (!%p289_p7), %v880_v26, %v879_v16  ;;  %v881_v28 = vld [vmem:[#allocation3 + $0x60] sm:$0xff] (!%p289_p7)  ;;  %v882_v29 = vld [vmem:[#allocation3 + $0x68] sm:$0xff] (!%p289_p7)  ;;  %v883_v31 = vld [vmem:[#allocation3 + $0x70] sm:$0xff] (!%p289_p7) }
 0x3de   : > { %1530 = vmatprep.subr.bf16.mxu0 (!%p289_p7), %v1529_v12  ;;  %v1549_v30 = vpack.c.bf16 (!%p289_p7), %v882_v29, %v881_v28  ;;  %v884_v32 = vld [vmem:[#allocation3 + $0x78] sm:$0xff] (!%p289_p7)  ;;  %v978_v38 = vld [vmem:[#allocation2] sm:$0xff] (!%p289_p7)  ;;  %v979_v39 = vld [vmem:[#allocation2 + $0x8] sm:$0xff] (!%p289_p7) }
 0x3df   : > { %v1553_v33 = vpack.c.bf16 (!%p289_p7), %v884_v32, %v883_v31  ;;  %v980_v40 = vld [vmem:[#allocation2 + $0x10] sm:$0xff] (!%p289_p7)  ;;  %v1557_v41 = vpack.c.bf16 (!%p289_p7), %v979_v39, %v978_v38  ;;  %v981_v43 = vld [vmem:[#allocation2 + $0x18] sm:$0xff] (!%p289_p7)  ;;  %v982_v46 = vld [vmem:[#allocation2 + $0x20] sm:$0xff] (!%p289_p7)  ;;  %1089 = vst [vmem:[%s1853_s27] sm:$0xff] (!%p289_p7), %v978_v38 }
 0x3e0   : > { %1090 = vst [vmem:[%s1853_s27 + $0x8] sm:$0xff] %v979_v39  ;;  %1091 = vst [vmem:[%s1853_s27 + $0x10] sm:$0xff] %v980_v40  ;;  %v1561_v48 = vpack.c.bf16 %v981_v43, %v980_v40  ;;  %v985_v50 = vld [vmem:[#allocation2 + $0x38] sm:$0xff]  ;;  %v986_v18 = vld [vmem:[#allocation2 + $0x40] sm:$0xff] }
 0x3e1   : > { %1532 = vmatpush3.bf16.msra.mxu0 %v1529_v12  ;;  %1092 = vst [vmem:[%s1853_s27 + $0x18] sm:$0xff] %v981_v43  ;;  %1093 = vst [vmem:[%s1853_s27 + $0x20] sm:$0xff] %v982_v46  ;;  %1558 = vmatprep.subr.bf16.mxu1 %v1557_v41  ;;  %v987_v51 = vld [vmem:[#allocation2 + $0x48] sm:$0xff]  ;;  %v988_v53 = vld [vmem:[#allocation2 + $0x50] sm:$0xff] }
 0x3e2   : > { %1534 = vmatprep.subr.bf16.mxu0 %v1533_v15  ;;  %v989_v54 = vld [vmem:[#allocation2 + $0x58] sm:$0xff]  ;;  %1096 = vst [vmem:[%s1853_s27 + $0x38] sm:$0xff] %v985_v50  ;;  %1097 = vst [vmem:[%s1853_s27 + $0x40] sm:$0xff] %v986_v18  ;;  %1560 = vmatpush3.bf16.xpose.msra.mxu1 %v1557_v41  ;;  %v1573_v42 = vpack.c.bf16 %v987_v51, %v986_v18  ;;  %v990_v6 = vld [vmem:[#allocation2 + $0x60] sm:$0xff] }
 0x3e3   : > { %1098 = vst [vmem:[%s1853_s27 + $0x48] sm:$0xff] %v987_v51  ;;  %1099 = vst [vmem:[%s1853_s27 + $0x50] sm:$0xff] %v988_v53  ;;  %1562 = vmatprep.subr.bf16.mxu1 %v1561_v48  ;;  %v1577_v58 = vpack.c.bf16 %v989_v54, %v988_v53  ;;  %v991_v8 = vld [vmem:[#allocation2 + $0x68] sm:$0xff]  ;;  %v992_v9 = vld [vmem:[#allocation2 + $0x70] sm:$0xff] }
 0x3e4   : > { %1100 = vst [vmem:[%s1853_s27 + $0x58] sm:$0xff] %v989_v54  ;;  %v1581_v44 = vpack.c.bf16 %v991_v8, %v990_v6  ;;  %1101 = vst [vmem:[%s1853_s27 + $0x60] sm:$0xff] %v990_v6  ;;  %v993_v45 = vld [vmem:[#allocation2 + $0x78] sm:$0xff] }
 0x3e5   : > { %1536 = vmatpush3.bf16.msra.mxu0 %v1533_v15  ;;  %1102 = vst [vmem:[%s1853_s27 + $0x68] sm:$0xff] %v991_v8  ;;  %v1585_v10 = vpack.c.bf16 %v993_v45, %v992_v9  ;;  %1103 = vst [vmem:[%s1853_s27 + $0x70] sm:$0xff] %v992_v9 }
 0x3e6   : > { %1538 = vmatprep.subr.bf16.mxu0 %v1537_v22  ;;  %1104 = vst [vmem:[%s1853_s27 + $0x78] sm:$0xff] %v993_v45 }
 0x3e9   : > { %1540 = vmatpush3.bf16.msra.mxu0 %v1537_v22 }
 0x3ea   : > { %1542 = vmatprep.subr.bf16.mxu0 %v1541_v25  ;;  %1564 = vmatpush3.bf16.xpose.msra.mxu1 %v1561_v48 }
 0x3ed   : > { %1544 = vmatpush3.bf16.msra.mxu0 %v1541_v25 }
 0x3ee   : > { %1546 = vmatprep.subr.bf16.mxu0 %v1545_v27 }
 0x3f1   : > { %1548 = vmatpush3.bf16.msra.mxu0 %v1545_v27 }
 0x3f2   : > { %1550 = vmatprep.subr.bf16.mxu0 %v1549_v30 }
 0x3f5   : > { %1552 = vmatpush3.bf16.msra.mxu0 %v1549_v30 }
 0x3f6   : > { %1554 = vmatprep.subr.bf16.mxu0 %v1553_v33 }
 0x3f9   : > { %1556 = vmatpush3.bf16.msra.mxu0 %v1553_v33 }
 0x3fc   : > { %1452 = vmatmul.mubr.f32.vlgmr.msra.gmra.mrb[0].mxu0 %v1859_v17  ;;  %v983_v17 = vld [vmem:[#allocation2 + $0x28] sm:$0xff] }
 0x3fd   : > { %1094 = vst [vmem:[%s1853_s27 + $0x28] sm:$0xff] %v983_v17  ;;  %v1565_v56 = vpack.c.bf16 %v983_v17, %v982_v46 }
 0x3ff   : > { %1566 = vmatprep.subr.bf16.mxu1 %v1565_v56 }
 0x400   : > { %1568 = vmatpush3.bf16.xpose.msra.mxu1 %v1565_v56 }
 0x4cf   : > { %v1453_v34 = vpop.f32.mrb[0].mxu0 }
 0x4d0   : > { %v951_v35 = vpop.f32.mrb[1].mxu0  ;;  %v957_v37 = vadd.f32 %v1453_v34, %v1863_v21 }
 0x4d1   : > { %v952_v36 = vadd.f32 %v951_v35, %v1863_v21  ;;  %v984_v21 = vld [vmem:[#allocation2 + $0x30] sm:$0xff] }
 0x4d2   : > { %1095 = vst [vmem:[%s1853_s27 + $0x30] sm:$0xff] %v984_v21  ;;  %v1569_v57 = vpack.c.bf16 %v985_v50, %v984_v21 }
 0x4d3   : > { %960 = vmax.xlane.f32.xlu0 %v952_v36 }
 0x4d4   : > { %1570 = vmatprep.subr.bf16.mxu1 %v1569_v57 }
 0x4d5   : > { %1572 = vmatpush3.bf16.xpose.msra.mxu1 %v1569_v57 }
 0x4d6   : > { %1574 = vmatprep.subr.bf16.mxu1 %v1573_v42 }
 0x4d7   : > { %962 = vmax.xlane.f32.xlu0 %v957_v37 }
 0x4dd   : > { %1576 = vmatpush3.bf16.xpose.msra.mxu1 %v1573_v42 }
 0x4de   : > { %1578 = vmatprep.subr.bf16.mxu1 %v1577_v58 }
 0x4e5   : > { %1580 = vmatpush3.bf16.xpose.msra.mxu1 %v1577_v58 }
 0x4e6   : > { %1582 = vmatprep.subr.bf16.mxu1 %v1581_v44 }
 0x4ed   : > { %1584 = vmatpush3.bf16.xpose.msra.mxu1 %v1581_v44 }
 0x4ee   : > { %1586 = vmatprep.subr.bf16.mxu1 %v1585_v10 }
 0x4f5   : > { %1588 = vmatpush3.bf16.xpose.msra.mxu1 %v1585_v10 }
 0x560   : > { %v961_v60 = vpop.xlane.xlu0 %960 }
 0x561   : > { %v964_v61 = vsub.f32 %v952_v36, %v961_v60 }
 0x563   : > { %v966_v62 = vmul.f32 1.442695, %v964_v61 }
 0x564   : > { %v963_v0 = vpop.xlane.xlu0 %962 }
 0x565   : > { %1659 = vpow2.f32 %v966_v62  ;;  %v965_v1 = vsub.f32 %v957_v37, %v963_v0 }
 0x567   : > { %v968_v2 = vmul.f32 1.442695, %v965_v1 }
 0x569   : > { %1661 = vpow2.f32 %v968_v2 }
 0x56f   : > { %v1660_v4 = vpop.eup %1659 }
 0x570   : > { %970 = vadd.xlane.f32.xlu1 %v1660_v4 }
 0x573   : > { %v1662_v5 = vpop.eup %1661 }
 0x574   : > { %972 = vadd.xlane.f32.xlu1 %v1662_v5 }
 0x5fd   : > { %v971_v47 = vpop.xlane.xlu1 %970 }
 0x5fe   : > { %1663 = vrcp.f32 %v971_v47 }
 0x601   : > { %v973_v49 = vpop.xlane.xlu1 %972 }
 0x602   : > { %1665 = vrcp.f32 %v973_v49 }
 0x608   : > { %v1664_v52 = vpop.eup %1663 }
 0x609   : > { %v976_v55 = vmul.f32 %v1664_v52, %v1660_v4 }
 0x60b   : > { %1486 = vmatprep.mubr.f32.mxu1 %v976_v55 }
 0x60c   : > { %v1666_v59 = vpop.eup %1665 }
 0x60d   : > { %v977_v63 = vmul.f32 %v1666_v59, %v1662_v5 }
 0x60f   : > { %1487 = vmatmul.mubr.f32.vlgmr.msra.gmra.mrb[0].mxu1 %v977_v63 }
 0x6e2   : > { %v1488_v3 = vpop.f32.mrb[0].mxu1 }
 0x6e3   : > { %v1070_v7 = vmax.f32 %v1488_v3, 0.0  ;;  %v1060_v11 = vpop.f32.mrb[1].mxu1 }
 0x6e4   : > { %v1069_v12 = vmax.f32 %v1060_v11, 0.0 }
 0x6e5   : > { %1072 = vst [vmem:[%s1848_s25 + $0x8] sm:$0xff] %v1070_v7 }
 0x6e6   : > { %1071 = vst [vmem:[%s1848_s25] sm:$0xff] %v1069_v12 }
 0x6e7 PF: > { %s15_s16 = sadd.s32 1, %s1737_s16   ;;  %s1988_s12 = smov %s1729_s14 }
 0x6e8   : > { %p12_p12 = scmp.ge.s32.totalorder %s15_s16, 10   ;;  %s1989_s13 = smov %s1733_s15 }
 0x6e9   : > { %s1990_s14 = smov %s1993_s18  ;;  %s1991_s15 = smov %s1997_s19 }
 0x6ea   :  { %14 = sbr.rel (!%p12_p12) target bundleno = 3 (0x3), region = 99 }
 0x6f1   :  { %1151 = vsyncpa [#allocation7], 1 }
 0x6f2   :  { %1153 = vsyncpa [#allocation7 + $0x1], 1 }

// kernel: a_call__.10
= control target key start
LH: loop header
LB: loop body
LE: loop exit
PB: predicated region body
PF: predicated region fallthrough
CT: control target
= control target key end

     0   :  { %11 = vsyncpa [#allocation3], 0  ;;  %s2546_s0 = inlined_call_operand.vmem [shape: bf16[2,6,6,128], index: 0, kind: input, shape index: {}, may-alias: {0,1,2}]   ;;  %s2547_s1 = inlined_call_operand.vmem [shape: bf16[2,6,6,128], index: 1, kind: input, shape index: {}, may-alias: {0,1,2}]   ;;  %s2548_s2 = inlined_call_operand.vmem [shape: bf16[2,6,6,128], index: 2, kind: input, shape index: {}, may-alias: {0,1,2}]   ;;  %s2549_s3 = inlined_call_operand.hbm [shape: bf16[9,128,128], index: 3, kind: input, shape index: {}]   ;;  %s2550_s4 = inlined_call_operand.hbm [shape: f32[1,128], index: 4, kind: input, shape index: {}]   ;;  %s2551_s5 = inlined_call_operand.vmem [shape: f32[1,128], index: 5, kind: input, shape index: {}]   ;;  %s2552_s6 = inlined_call_operand.vmem [shape: f32[2,4,4,128], index: 6, kind: output, shape index: {}]  }
   0x1   :  { %12 = vsyncpa [#allocation5], 0  ;;  %s2286_s21 = smov 0   ;;  %s2288_s22 = smov 0  }
   0x2   :  { %s2290_s23 = smov 0   ;;  %s2292_s24 = smov 0  }
   0x3   :  { %s2294_s25 = smov 0  }
   0x4 LB: > { %s1616_s26 = sadd.s32 4294967295, %s2243_s25   ;;  %s33_s27 = sadd.s32 1, %s2235_s23  ;;  %s2243_s25 = sphi %s2294_s25, %s18_s25   ;;  %s2239_s24 = sphi %s2292_s24, %s2564_s24   ;;  %s2235_s23 = sphi %s2290_s23, %s2563_s23   ;;  %s2231_s22 = sphi %s2288_s22, %s2562_s22   ;;  %s2227_s21 = sphi %s2286_s21, %s2561_s21  }
   0x5   : > { %p35_p0 = scmp.ge.s32.totalorder %s33_s27, 4  ;;  %s37_s28 = sadd.s32 1, %s2239_s24 }
   0x6   : > { %p1618_p1 = scmp.ge.s32.totalorder %s2243_s25, 1  ;;  %p238_p2 = scmp.lt.s32.totalorder %s2243_s25, 9 }
   0x7   : > { %s2566_s27 = smov (%p35_p0, %s33_s27), 0  ;;  %s2568_s28 = smov (!%p35_p0, %s37_s28), %s2239_s24 }
   0x8   : > { %p2319_p3 = pnand %p1618_p1, %p238_p2  ;;  %p39_p4 = scmp.ge.s32.totalorder %s2568_s28, 2 }
   0x9   : > { %p2323_p5 = scmp.eq.s32.totalorder %s1616_s26, 0  ;;  %s2245_s7 = smov [#allocation2]  }
   0xa   : > { %s2556_s29 = scalar_select %p2319_p3, 1, 0 }
   0xb   : > { %s2557_s30 = scalar_select %p2323_p5, 1, 0 }
   0xc   : > { %p2009_p6 = pneg %p2319_p3  ;;  %s2570_s28 = smov (%p39_p4, %s2568_s28), 0 }
   0xd   : > { %s252_s8 = sshll.u32 %s2245_s7, 4  ;;  %s2141_s12 = scalar_lea.hbm %s2549_s3, 9216  ;;  %s253_s8 = int_to_ptr.vmem [resolvable:$true] %s252_s8 }
   0xe   : > { %p2333_p7 = pnand %p2323_p5, %p2009_p6  ;;  %p2142_p8 = scmp.ne.s32.totalorder %s2549_s3, %s2141_s12 }
   0xf   : > { %p2148_p12 = scmp.lt.u32.totalorder %s2141_s12, %s2549_s3 }
  0x10   : > { %p2143_p9 = pneg %p2333_p7 }
  0x12   : > { %p2144_p10 = pnand %p2143_p9, %p2142_p8 }
  0x14   : > { %p2145_p11 = pneg %p2144_p10 }
  0x16   : > { %p2150_p13 = pnand %p2148_p12, %p2145_p11 }
  0x18   : > { %2153 = shalt.err (!%p2150_p13)
}
  0x19   : > { %s2154_s17 = scalar_lea.vmem %s253_s8, 9216  ;;  %p2162_p4 = scmp.lt.s32.totalorder %s253_s8, %s253_s8 }
  0x1a   : > { %p2155_p0 = scmp.ne.s32.totalorder %s253_s8, %s2154_s17  ;;  %p2163_p6 = scmp.lt.s32.totalorder %s2154_s17, %s2154_s17 }
  0x1c   : > { %p2157_p1 = pnand %p2155_p0, %p2143_p9  ;;  %p2164_p5 = por %p2163_p6, %p2162_p4 }
  0x1e   : > { %p2158_p2 = pneg %p2157_p1 }
  0x20   : > { %p2165_p3 = pnand %p2164_p5, %p2158_p2 }
  0x22   : > { %2168 = shalt.err (!%p2165_p3)
}
  0x23   : > { %s2246_s18 = smov 64   ;;  %s2247_s19 = smov 4  }
  0x24   : > { %2012 = dma.hbm_to_vmem [thread:$0]  (!%p2333_p7), %s2549_s3, 9216, %s253_s8, [#allocation3], %s2246_s18, %s2246_s18, %s2247_s19  }
  0x25   : > { %s2248_s7 = smov [#allocation4]   ;;  %s2169_s13 = scalar_lea.hbm %s2550_s4, 16 }
  0x26   : > { %s268_s10 = sshll.u32 %s2248_s7, 4  ;;  %p2170_p3 = scmp.ne.s32.totalorder %s2550_s4, %s2169_s13  ;;  %s269_s10 = int_to_ptr.vmem [resolvable:$true] %s268_s10 }
  0x27   : > { %p2176_p10 = scmp.lt.u32.totalorder %s2169_s13, %s2550_s4 }
  0x28   : > { %p2172_p5 = pnand %p2170_p3, %p2143_p9 }
  0x2a   : > { %p2173_p8 = pneg %p2172_p5 }
  0x2c   : > { %p2178_p11 = pnand %p2176_p10, %p2173_p8 }
  0x2e   : > { %2181 = shalt.err (!%p2178_p11)
}
  0x2f   : > { %s2182_s8 = scalar_lea.vmem %s269_s10, 16  ;;  %s2189_s18 = scalar_lea.vmem %s269_s10, 32 }
  0x30   : > { %p2183_p12 = scmp.ne.s32.totalorder %s269_s10, %s2182_s8  ;;  %p2190_p1 = scmp.lt.s32.totalorder %s269_s10, %s269_s10 }
  0x31   : > { %p2191_p2 = scmp.lt.s32.totalorder %s2189_s18, %s2182_s8 }
  0x32   : > { %p2185_p13 = pnand %p2183_p12, %p2143_p9 }
  0x33   : > { %p2192_p4 = por %p2191_p2, %p2190_p1 }
  0x34   : > { %p2186_p0 = pneg %p2185_p13 }
  0x36   : > { %p2193_p6 = pnand %p2192_p4, %p2186_p0 }
  0x38   : > { %2196 = shalt.err (!%p2193_p6)
}
  0x39   : > { %2015 = dma.hbm_to_vmem [thread:$0]  (!%p2333_p7), %s2550_s4, 16, %s269_s10, [#allocation5]  }
  0x3a   : > { %p2559_p3 = scmp.ne.s32.totalorder %s2556_s29, 0 }
  0x3b   : > { %p2560_p5 = scmp.ne.s32.totalorder (!%p2559_p3), %s2557_s30, 0 }
  0x3c   : > { %324 = sbr.rel (%p2559_p3) target bundleno = 453 (0x1c5), region = 44 }
  0x43   : > { %2218 = dma.done.wait (%p2560_p5), [#allocation3], 9216  }
  0x44   : > { %2220 = vsyncadd (%p2560_p5), [#allocation3], 4294958080 }
  0x45   : > { %2222 = dma.done.wait (%p2560_p5), [#allocation5], 16  }
  0x46   : > { %2224 = vsyncadd (%p2560_p5), [#allocation5], 4294967280  ;;  %v2249_v0 = vmov 0.0   ;;  %vm2250_vm0 = vmmov 0   ;;  %p388_p7 = scmp.lt.s32.totalorder %s2231_s22, 1  ;;  %s396_s29 = sadd.s32 1, %s2227_s21 }
  0x47   : > { %1791 = vmatprep.subr.bf16.mxu1 %v2249_v0  ;;  %1871 = vmatprep.subr.bf16.mxu0 %v2249_v0  ;;  %p390_p9 = scmp.lt.s32.totalorder %s2227_s21, 5  ;;  %v2066_v1 = vld [vmem:[#allocation2 + $0x40] sm:$0xff]   ;;  %p399_p8 = scmp.lt.s32.totalorder %s396_s29, 5  ;;  %v2068_v3 = vld [vmem:[#allocation2 + $0x48] sm:$0xff]   ;;  %v2070_v5 = vld [vmem:[#allocation2 + $0x50] sm:$0xff]  }
  0x48   : > { %1807 = vmatprep.mubr.msk.bf16.mxu1 %vm2250_vm0, %v2249_v0  ;;  %1887 = vmatprep.mubr.msk.bf16.mxu0 %vm2250_vm0, %v2249_v0  ;;  %s2572_s22 = smov (!%p388_p7, %s2231_s22), 1  ;;  %v2067_v2 = vld [vmem:[#allocation2 + $0x100] sm:$0xff]   ;;  %v2069_v4 = vld [vmem:[#allocation2 + $0x108] sm:$0xff]   ;;  %v2071_v6 = vld [vmem:[#allocation2 + $0x110] sm:$0xff]   ;;  %s406_s8 = sadd.s32 2, %s2227_s21 }
  0x49   : > { %1792 = vmatpush3.bf16.msra.mxu1 %v2066_v1  ;;  %s391_s30 = scalar_select %p390_p9, %s2227_s21, 5  ;;  %1872 = vmatpush3.bf16.msra.mxu0 %v2067_v2  ;;  %v2072_v7 = vld [vmem:[#allocation2 + $0x58] sm:$0xff]   ;;  %v2074_v9 = vld [vmem:[#allocation2 + $0x60] sm:$0xff]   ;;  %v2076_v14 = vld [vmem:[#allocation2 + $0x68] sm:$0xff]  }
  0x4a   : > { %1793 = vmatprep.subr.bf16.mxu1 %v2249_v0  ;;  %s2404_s9 = smul.u32 6, %s2572_s22  ;;  %1873 = vmatprep.subr.bf16.mxu0 %v2249_v0  ;;  %s2574_s29 = smov (!%p399_p8, %s396_s29), 5  ;;  %v2073_v8 = vld [vmem:[#allocation2 + $0x118] sm:$0xff]   ;;  %v2075_v10 = vld [vmem:[#allocation2 + $0x120] sm:$0xff]   ;;  %v2077_v16 = vld [vmem:[#allocation2 + $0x128] sm:$0xff]  }
  0x4b   : > { %v2078_v18 = vld [vmem:[#allocation2 + $0x70] sm:$0xff]   ;;  %v2080_v21 = vld [vmem:[#allocation2 + $0x78] sm:$0xff]   ;;  %v2083_v28 = vld [vmem:[#allocation2] sm:$0xff]   ;;  %p409_p10 = scmp.lt.s32.totalorder %s406_s8, 5  ;;  %p421_p11 = scmp.lt.s32.totalorder %s2227_s21, 3 }
  0x4c   : > { %s393_s26 = sadd.s32 %s2404_s9, %s391_s30  ;;  %s402_s7 = sadd.s32 %s2404_s9, %s2574_s29  ;;  %v2079_v20 = vld [vmem:[#allocation2 + $0x130] sm:$0xff]   ;;  %v2081_v26 = vld [vmem:[#allocation2 + $0x138] sm:$0xff]   ;;  %v2085_v30 = vld [vmem:[#allocation2 + $0x140] sm:$0xff]  }
  0x4d   : > { %1794 = vmatpush3.bf16.msra.mxu1 %v2068_v3  ;;  %1874 = vmatpush3.bf16.msra.mxu0 %v2069_v4  ;;  %s1626_s10 = sshll.u32 %s393_s26, 2  ;;  %s1627_s11 = sshll.u32 %s402_s7, 2  ;;  %v2086_v31 = vld [vmem:[#allocation2 + $0x8] sm:$0xff]   ;;  %v2088_v33 = vld [vmem:[#allocation2 + $0x10] sm:$0xff]   ;;  %v2090_v35 = vld [vmem:[#allocation2 + $0x18] sm:$0xff]  }
  0x4e   : > { %1795 = vmatprep.subr.bf16.mxu1 %v2249_v0  ;;  %1875 = vmatprep.subr.bf16.mxu0 %v2249_v0  ;;  %s395_s14 = scalar_lea.vmem %s2546_s0, %s1626_s10  ;;  %s404_s17 = scalar_lea.vmem %s2547_s1, %s1627_s11  ;;  %v2087_v32 = vld [vmem:[#allocation2 + $0x148] sm:$0xff]   ;;  %v2089_v34 = vld [vmem:[#allocation2 + $0x150] sm:$0xff]   ;;  %v2091_v36 = vld [vmem:[#allocation2 + $0x158] sm:$0xff]  }
  0x4f   : > { %v2421_v11 = vld [vmem:[%s395_s14] sm:$0x7]  ;;  %v2094_v39 = vld [vmem:[#allocation2 + $0x28] sm:$0xff]   ;;  %v2096_v41 = vld [vmem:[#allocation2 + $0x30] sm:$0xff]   ;;  %s2576_s8 = smov (!%p409_p10, %s406_s8), 5  ;;  %s2578_s21 = smov (!%p421_p11, %s2227_s21), 3 }
  0x50   : > { %v2425_v12 = vcombine.low %v2421_v11, %v2421_v11  ;;  %v2427_v13 = vld [vmem:[%s404_s17] sm:$0x7]  ;;  %v2095_v40 = vld [vmem:[#allocation2 + $0x168] sm:$0xff]   ;;  %v2097_v42 = vld [vmem:[#allocation2 + $0x170] sm:$0xff]   ;;  %s412_s18 = sadd.s32 %s2404_s9, %s2576_s8  ;;  %s1629_s9 = sshll.u32 %s2572_s22, 2 }
  0x51   : > { %1796 = vmatpush3.bf16.msra.mxu1 %v2070_v5  ;;  %1876 = vmatpush3.bf16.msra.mxu0 %v2071_v6  ;;  %v2431_v15 = vcombine.low %v2427_v13, %v2427_v13  ;;  %v2092_v37 = vld [vmem:[#allocation2 + $0x20] sm:$0xff]   ;;  %v2098_v43 = vld [vmem:[#allocation2 + $0x38] sm:$0xff]   ;;  %v2102_v48 = vld [vmem:[#allocation2 + $0x88] sm:$0xff]   ;;  %s1628_s19 = sshll.u32 %s412_s18, 2  ;;  %s427_s26 = sadd.s32 %s1629_s9, %s2578_s21 }
  0x52   : > { %1797 = vmatprep.subr.bf16.mxu1 %v2249_v0  ;;  %1877 = vmatprep.subr.bf16.mxu0 %v2249_v0  ;;  %v473_v17 = vshll.u32 %v2425_v12, 16  ;;  %v471_v22 = vshrl.u32 %v2425_v12, 16  ;;  %v2093_v38 = vld [vmem:[#allocation2 + $0x160] sm:$0xff]   ;;  %v2099_v44 = vld [vmem:[#allocation2 + $0x178] sm:$0xff]   ;;  %v2103_v49 = vld [vmem:[#allocation2 + $0x188] sm:$0xff]   ;;  %s414_s30 = scalar_lea.vmem %s2548_s2, %s1628_s19  ;;  %v671_v62 = vrot.slane %v2425_v12, 1 }
  0x53   : > { %v891_v19 = vshll.u32 %v2431_v15, 16  ;;  %v889_v24 = vshrl.u32 %v2431_v15, 16  ;;  %v2100_v45 = vld [vmem:[#allocation2 + $0x80] sm:$0xff]   ;;  %v1002_v46 = vrot.slane %v2431_v15, 1  ;;  %v2104_v50 = vld [vmem:[#allocation2 + $0x90] sm:$0xff]   ;;  %v2106_v52 = vld [vmem:[#allocation2 + $0x98] sm:$0xff]  }
  0x54   : > { %v475_v23 = vrot.slane %v473_v17, 1  ;;  %v2101_v47 = vld [vmem:[#allocation2 + $0x180] sm:$0xff]   ;;  %v2105_v51 = vld [vmem:[#allocation2 + $0x190] sm:$0xff]   ;;  %v2107_v53 = vld [vmem:[#allocation2 + $0x198] sm:$0xff]   ;;  %s1630_s11 = sshll.u32 %s427_s26, 2 }
  0x55   : > { %1798 = vmatpush3.bf16.msra.mxu1 %v2072_v7  ;;  %1878 = vmatpush3.bf16.msra.mxu0 %v2073_v8  ;;  %v893_v25 = vrot.slane %v891_v19, 1  ;;  %v2108_v54 = vld [vmem:[#allocation2 + $0xa0] sm:$0xff]   ;;  %v2110_v56 = vld [vmem:[#allocation2 + $0xa8] sm:$0xff]   ;;  %v2112_v58 = vld [vmem:[#allocation2 + $0xb0] sm:$0xff]   ;;  %s429_s14 = scalar_lea.vmem %s2552_s6, %s1630_s11 }
  0x56   : > { %1799 = vmatprep.subr.bf16.mxu1 %v2249_v0  ;;  %1879 = vmatprep.subr.bf16.mxu0 %v2249_v0  ;;  %v476_v27 = vor.u32 %v475_v23, %v471_v22  ;;  %v2109_v55 = vld [vmem:[#allocation2 + $0x1a0] sm:$0xff]   ;;  %v2111_v57 = vld [vmem:[#allocation2 + $0x1a8] sm:$0xff]   ;;  %v2113_v59 = vld [vmem:[#allocation2 + $0x1b0] sm:$0xff]  }
  0x57   : > { %v894_v29 = vor.u32 %v893_v25, %v889_v24  ;;  %v2114_v60 = vld [vmem:[#allocation2 + $0xb8] sm:$0xff]   ;;  %v2116_v63 = vld [vmem:[#allocation2 + $0xc0] sm:$0xff]   ;;  %v2119_v3 = vld [vmem:[#allocation2 + $0xc8] sm:$0xff]  }
  0x58   : > { %v2115_v61 = vld [vmem:[#allocation2 + $0x1b8] sm:$0xff]   ;;  %v433_v1 = vld [vmem:[%s414_s30] sm:$0x7]  ;;  %v2120_v4 = vld [vmem:[#allocation2 + $0x1c8] sm:$0xff]  }
  0x59   : > { %1800 = vmatpush3.bf16.msra.mxu1 %v2074_v9  ;;  %1880 = vmatpush3.bf16.msra.mxu0 %v2075_v10  ;;  %v2118_v2 = vld [vmem:[#allocation2 + $0x1c0] sm:$0xff]   ;;  %v2121_v5 = vld [vmem:[#allocation2 + $0xd0] sm:$0xff]   ;;  %v2123_v7 = vld [vmem:[#allocation2 + $0xd8] sm:$0xff]  }
  0x5a   : > { %1801 = vmatprep.subr.bf16.mxu1 %v2249_v0  ;;  %1881 = vmatprep.subr.bf16.mxu0 %v2249_v0  ;;  %v2122_v6 = vld [vmem:[#allocation2 + $0x1d0] sm:$0xff]   ;;  %v2124_v8 = vld [vmem:[#allocation2 + $0x1d8] sm:$0xff]   ;;  %v2125_v9 = vld [vmem:[#allocation2 + $0xe0] sm:$0xff]  }
  0x5b   : > { %v2126_v10 = vld [vmem:[#allocation2 + $0x1e0] sm:$0xff]   ;;  %v2127_v12 = vld [vmem:[#allocation2 + $0xe8] sm:$0xff]   ;;  %v2130_v17 = vld [vmem:[#allocation2 + $0x1f0] sm:$0xff]  }
  0x5c   : > { %v2131_v19 = vld [vmem:[#allocation2 + $0xf8] sm:$0xff]   ;;  %v2133_v23 = vld [vmem:[#allocation2 + $0x200] sm:$0xff]   ;;  %v2134_v24 = vld [vmem:[#allocation2 + $0x208] sm:$0xff]  }
  0x5d   : > { %1802 = vmatpush3.bf16.msra.mxu1 %v2076_v14  ;;  %1882 = vmatpush3.bf16.msra.mxu0 %v2077_v16  ;;  %v2128_v14 = vld [vmem:[#allocation2 + $0x1e8] sm:$0xff]   ;;  %v2129_v16 = vld [vmem:[#allocation2 + $0xf0] sm:$0xff]  }
  0x5e   : > { %1803 = vmatprep.subr.bf16.mxu1 %v2249_v0  ;;  %1883 = vmatprep.subr.bf16.mxu0 %v2249_v0  ;;  %v2135_v25 = vld [vmem:[#allocation2 + $0x210] sm:$0xff]  }
  0x61   : > { %1804 = vmatpush3.bf16.msra.mxu1 %v2078_v18  ;;  %1884 = vmatpush3.bf16.msra.mxu0 %v2079_v20 }
  0x62   : > { %1805 = vmatprep.subr.bf16.mxu1 %v2249_v0  ;;  %1885 = vmatprep.subr.bf16.mxu0 %v2249_v0 }
  0x65   : > { %1806 = vmatpush3.bf16.msra.mxu1 %v2080_v21  ;;  %1886 = vmatpush3.bf16.msra.mxu0 %v2081_v26  ;;  %v2132_v21 = vld [vmem:[#allocation2 + $0x1f8] sm:$0xff]  }
  0x66   : > { %1811 = vmatprep.subr.bf16.mxu1 %v2249_v0  ;;  %1891 = vmatprep.subr.bf16.mxu0 %v2249_v0  ;;  %v2136_v26 = vld [vmem:[#allocation2 + $0x218] sm:$0xff]  }
  0x68   : > { %1808 = vmatmul.mubr.bf16.vlgmr.msra.gmra.mrb[0].mxu1 %v476_v27  ;;  %1888 = vmatmul.mubr.bf16.vlgmr.msra.gmra.mrb[0].mxu0 %v894_v29  ;;  %v2137_v27 = vld [vmem:[#allocation2 + $0x220] sm:$0xff]   ;;  %v2140_v29 = vld [vmem:[#allocation2 + $0x238] sm:$0xff]  }
  0x69   : > { %1812 = vmatpush3.bf16.msra.mxu1 %v2083_v28  ;;  %1892 = vmatpush3.bf16.msra.mxu0 %v2085_v30  ;;  %v2139_v28 = vld [vmem:[#allocation2 + $0x230] sm:$0xff]  }
  0x6a   : > { %1813 = vmatprep.subr.bf16.mxu1 %v2249_v0  ;;  %1893 = vmatprep.subr.bf16.mxu0 %v2249_v0 }
  0x6b   : > { %1827 = vmatprep.mubr.msk.bf16.mxu1 %vm2250_vm0, %v2249_v0  ;;  %1907 = vmatprep.mubr.msk.bf16.mxu0 %vm2250_vm0, %v2249_v0 }
  0x6d   : > { %1814 = vmatpush3.bf16.msra.mxu1 %v2086_v31  ;;  %1894 = vmatpush3.bf16.msra.mxu0 %v2087_v32 }
  0x6e   : > { %1815 = vmatprep.subr.bf16.mxu1 %v2249_v0  ;;  %1895 = vmatprep.subr.bf16.mxu0 %v2249_v0 }
  0x71   : > { %1816 = vmatpush3.bf16.msra.mxu1 %v2088_v33  ;;  %1896 = vmatpush3.bf16.msra.mxu0 %v2089_v34 }
  0x72   : > { %1817 = vmatprep.subr.bf16.mxu1 %v2249_v0  ;;  %1897 = vmatprep.subr.bf16.mxu0 %v2249_v0 }
  0x75   : > { %1818 = vmatpush3.bf16.msra.mxu1 %v2090_v35  ;;  %1898 = vmatpush3.bf16.msra.mxu0 %v2091_v36  ;;  %v1706_v36 = vld [vmem:[#allocation4] ss:$0 sm:$0xff] }
  0x76   : > { %1819 = vmatprep.subr.bf16.mxu1 %v2249_v0  ;;  %1899 = vmatprep.subr.bf16.mxu0 %v2249_v0 }
  0x79   : > { %1820 = vmatpush3.bf16.msra.mxu1 %v2092_v37  ;;  %1900 = vmatpush3.bf16.msra.mxu0 %v2093_v38 }
  0x7a   : > { %1821 = vmatprep.subr.bf16.mxu1 %v2249_v0  ;;  %1901 = vmatprep.subr.bf16.mxu0 %v2249_v0 }
  0x7d   : > { %1822 = vmatpush3.bf16.msra.mxu1 %v2094_v39  ;;  %1902 = vmatpush3.bf16.msra.mxu0 %v2095_v40  ;;  %v1707_v39 = vld [vmem:[%s2551_s5] ss:$0 sm:$0xff] }
  0x7e   : > { %1823 = vmatprep.subr.bf16.mxu1 %v2249_v0  ;;  %1903 = vmatprep.subr.bf16.mxu0 %v2249_v0 }
  0x81   : > { %1824 = vmatpush3.bf16.msra.mxu1 %v2096_v41  ;;  %1904 = vmatpush3.bf16.msra.mxu0 %v2097_v42 }
  0x82   : > { %1825 = vmatprep.subr.bf16.mxu1 %v2249_v0  ;;  %1905 = vmatprep.subr.bf16.mxu0 %v2249_v0 }
  0x85   : > { %1826 = vmatpush3.bf16.msra.mxu1 %v2098_v43  ;;  %1906 = vmatpush3.bf16.msra.mxu0 %v2099_v44 }
  0x86   : > { %1831 = vmatprep.subr.bf16.mxu1 %v2249_v0  ;;  %1911 = vmatprep.subr.bf16.mxu0 %v2249_v0 }
  0x88   : > { %1828 = vmatmul.mubr.bf16.vlgmr.msra.gmra.mrb[0].mxu1 %v2421_v11  ;;  %1908 = vmatmul.mubr.bf16.vlgmr.msra.gmra.mrb[0].mxu0 %v1002_v46  ;;  %v1689_v11 = vcombine.low %v433_v1, %v433_v1 }
  0x89   : > { %1832 = vmatpush3.bf16.msra.mxu1 %v2100_v45  ;;  %1912 = vmatpush3.bf16.msra.mxu0 %v2101_v47 }
  0x8a   : > { %1833 = vmatprep.subr.bf16.mxu1 %v2249_v0  ;;  %1913 = vmatprep.subr.bf16.mxu0 %v2249_v0  ;;  %v1222_v15 = vshll.u32 %v1689_v11, 16  ;;  %v1220_v18 = vshrl.u32 %v1689_v11, 16  ;;  %v1333_v30 = vrot.slane %v1689_v11, 1 }
  0x8b   : > { %1847 = vmatprep.mubr.msk.bf16.mxu1 %vm2250_vm0, %v2249_v0  ;;  %1927 = vmatprep.mubr.msk.bf16.mxu0 %vm2250_vm0, %v2249_v0 }
  0x8c   : > { %v1224_v20 = vrot.slane %v1222_v15, 1 }
  0x8d   : > { %1834 = vmatpush3.bf16.msra.mxu1 %v2102_v48  ;;  %1914 = vmatpush3.bf16.msra.mxu0 %v2103_v49 }
  0x8e   : > { %1835 = vmatprep.subr.bf16.mxu1 %v2249_v0  ;;  %1915 = vmatprep.subr.bf16.mxu0 %v2249_v0  ;;  %v1225_v22 = vor.u32 %v1224_v20, %v1220_v18 }
  0x91   : > { %1836 = vmatpush3.bf16.msra.mxu1 %v2104_v50  ;;  %1916 = vmatpush3.bf16.msra.mxu0 %v2105_v51 }
  0x92   : > { %1837 = vmatprep.subr.bf16.mxu1 %v2249_v0  ;;  %1917 = vmatprep.subr.bf16.mxu0 %v2249_v0 }
  0x95   : > { %1838 = vmatpush3.bf16.msra.mxu1 %v2106_v52  ;;  %1918 = vmatpush3.bf16.msra.mxu0 %v2107_v53 }
  0x96   : > { %1839 = vmatprep.subr.bf16.mxu1 %v2249_v0  ;;  %1919 = vmatprep.subr.bf16.mxu0 %v2249_v0 }
  0x99   : > { %1840 = vmatpush3.bf16.msra.mxu1 %v2108_v54  ;;  %1920 = vmatpush3.bf16.msra.mxu0 %v2109_v55 }
  0x9a   : > { %1841 = vmatprep.subr.bf16.mxu1 %v2249_v0  ;;  %1921 = vmatprep.subr.bf16.mxu0 %v2249_v0 }
  0x9d   : > { %1842 = vmatpush3.bf16.msra.mxu1 %v2110_v56  ;;  %1922 = vmatpush3.bf16.msra.mxu0 %v2111_v57 }
  0x9e   : > { %1843 = vmatprep.subr.bf16.mxu1 %v2249_v0  ;;  %1923 = vmatprep.subr.bf16.mxu0 %v2249_v0 }
  0xa1   : > { %1844 = vmatpush3.bf16.msra.mxu1 %v2112_v58  ;;  %1924 = vmatpush3.bf16.msra.mxu0 %v2113_v59 }
  0xa2   : > { %1845 = vmatprep.subr.bf16.mxu1 %v2249_v0  ;;  %1925 = vmatprep.subr.bf16.mxu0 %v2249_v0 }
  0xa5   : > { %1846 = vmatpush3.bf16.msra.mxu1 %v2114_v60  ;;  %1926 = vmatpush3.bf16.msra.mxu0 %v2115_v61 }
  0xa6   : > { %1851 = vmatprep.subr.bf16.mxu1 %v2249_v0  ;;  %1931 = vmatprep.subr.bf16.mxu0 %v2249_v0 }
  0xa8   : > { %1848 = vmatmul.mubr.bf16.vlgmr.msra.gmra.mrb[0].mxu1 %v671_v62  ;;  %1928 = vmatmul.mubr.bf16.vlgmr.msra.gmra.mrb[0].mxu0 %v433_v1 }
  0xa9   : > { %1852 = vmatpush3.bf16.msra.mxu1 %v2116_v63  ;;  %1932 = vmatpush3.bf16.msra.mxu0 %v2118_v2 }
  0xaa   : > { %1853 = vmatprep.subr.bf16.mxu1 %v2249_v0  ;;  %1933 = vmatprep.subr.bf16.mxu0 %v2249_v0 }
  0xab   : > { %1867 = vmatprep.mubr.msk.bf16.mxu1 %vm2250_vm0, %v2249_v0  ;;  %1947 = vmatprep.mubr.msk.bf16.mxu0 %vm2250_vm0, %v2249_v0 }
  0xad   : > { %1854 = vmatpush3.bf16.msra.mxu1 %v2119_v3  ;;  %1934 = vmatpush3.bf16.msra.mxu0 %v2120_v4 }
  0xae   : > { %1855 = vmatprep.subr.bf16.mxu1 %v2249_v0  ;;  %1935 = vmatprep.subr.bf16.mxu0 %v2249_v0 }
  0xb1   : > { %1856 = vmatpush3.bf16.msra.mxu1 %v2121_v5  ;;  %1936 = vmatpush3.bf16.msra.mxu0 %v2122_v6 }
  0xb2   : > { %1857 = vmatprep.subr.bf16.mxu1 %v2249_v0  ;;  %1937 = vmatprep.subr.bf16.mxu0 %v2249_v0 }
  0xb5   : > { %1858 = vmatpush3.bf16.msra.mxu1 %v2123_v7  ;;  %1938 = vmatpush3.bf16.msra.mxu0 %v2124_v8 }
  0xb6   : > { %1859 = vmatprep.subr.bf16.mxu1 %v2249_v0  ;;  %1939 = vmatprep.subr.bf16.mxu0 %v2249_v0 }
  0xb9   : > { %1860 = vmatpush3.bf16.msra.mxu1 %v2125_v9  ;;  %1940 = vmatpush3.bf16.msra.mxu0 %v2126_v10 }
  0xba   : > { %1861 = vmatprep.subr.bf16.mxu1 %v2249_v0  ;;  %1941 = vmatprep.subr.bf16.mxu0 %v2249_v0 }
  0xbd   : > { %1862 = vmatpush3.bf16.msra.mxu1 %v2127_v12  ;;  %1942 = vmatpush3.bf16.msra.mxu0 %v2128_v14 }
  0xbe   : > { %1863 = vmatprep.subr.bf16.mxu1 %v2249_v0  ;;  %1943 = vmatprep.subr.bf16.mxu0 %v2249_v0 }
  0xc1   : > { %1864 = vmatpush3.bf16.msra.mxu1 %v2129_v16  ;;  %1944 = vmatpush3.bf16.msra.mxu0 %v2130_v17 }
  0xc2   : > { %1865 = vmatprep.subr.bf16.mxu1 %v2249_v0  ;;  %1945 = vmatprep.subr.bf16.mxu0 %v2249_v0 }
  0xc5   : > { %1866 = vmatpush3.bf16.msra.mxu1 %v2131_v19  ;;  %1946 = vmatpush3.bf16.msra.mxu0 %v2132_v21 }
  0xc6   : > { %1951 = vmatprep.subr.bf16.mxu0 %v2249_v0 }
  0xc8   : > { %1868 = vmatmul.mubr.bf16.vlgmr.msra.gmra.mrb[0].mxu1 %v2427_v13  ;;  %1948 = vmatmul.mubr.bf16.vlgmr.msra.gmra.mrb[0].mxu0 %v1225_v22  ;;  %v2138_v13 = vld [vmem:[#allocation2 + $0x228] sm:$0xff]  }
  0xc9   : > { %1952 = vmatpush3.bf16.msra.mxu0 %v2133_v23  ;;  %1967 = vmatprep.mubr.msk.bf16.mxu0 %vm2250_vm0, %v2249_v0 }
  0xca   : > { %1953 = vmatprep.subr.bf16.mxu0 %v2249_v0 }
  0xcd   : > { %1954 = vmatpush3.bf16.msra.mxu0 %v2134_v24 }
  0xce   : > { %1955 = vmatprep.subr.bf16.mxu0 %v2249_v0 }
  0xd1   : > { %1956 = vmatpush3.bf16.msra.mxu0 %v2135_v25 }
  0xd2   : > { %1957 = vmatprep.subr.bf16.mxu0 %v2249_v0 }
  0xd5   : > { %1958 = vmatpush3.bf16.msra.mxu0 %v2136_v26 }
  0xd6   : > { %1959 = vmatprep.subr.bf16.mxu0 %v2249_v0 }
  0xd9   : > { %1960 = vmatpush3.bf16.msra.mxu0 %v2137_v27 }
  0xda   : > { %1961 = vmatprep.subr.bf16.mxu0 %v2249_v0 }
  0xdd   : > { %1962 = vmatpush3.bf16.msra.mxu0 %v2138_v13 }
  0xde   : > { %1963 = vmatprep.subr.bf16.mxu0 %v2249_v0 }
  0xe1   : > { %1964 = vmatpush3.bf16.msra.mxu0 %v2139_v28 }
  0xe2   : > { %1965 = vmatprep.subr.bf16.mxu0 %v2249_v0 }
  0xe5   : > { %1966 = vmatpush3.bf16.msra.mxu0 %v2140_v29 }
  0xe8   : > { %1968 = vmatmul.mubr.bf16.vlgmr.msra.gmra.mrb[0].mxu0 %v1333_v30 }
 0x19b   : > { %v861_v31 = vpop.f32.mrb[0].mxu1 }
 0x19c   : > { %v1869_v32 = vpop.f32.mrb[1].mxu1 }
 0x19d   : > { %v864_v33 = vpop.f32.mrb[2].mxu1 }
 0x19e   : > { %v1870_v34 = vpop.f32.mrb[3].mxu1 }
 0x1bb   : > { %v1417_v35 = vpop.f32.mrb[0].mxu0 }
 0x1bc   : > { %v1971_v37 = vadd.f32 %v1417_v35, %v861_v31  ;;  %v1969_v38 = vpop.f32.mrb[1].mxu0 }
 0x1bd   : > { %v1420_v0 = vpop.f32.mrb[2].mxu0 }
 0x1be   : > { %v1431_v40 = vmul.f32 %v1971_v37, %v1706_v36  ;;  %v1970_v41 = vpop.f32.mrb[3].mxu0 }
 0x1c0   : > { %v1439_v42 = vadd.f32 %v1707_v39, %v1431_v40 }
 0x1c2   : > { %v1440_v43 = vmax.f32 %v1439_v42, 0.0 }
 0x1c4   : > { %1441 = vst [vmem:[%s429_s14] sm:$0xf] %v1440_v43 }
 0x1c5 PF: > { %s18_s25 = sadd.s32 1, %s2243_s25   ;;  %s2561_s21 = smov %s2235_s23 }
 0x1c6   : > { %p15_p12 = scmp.ge.s32.totalorder %s18_s25, 10   ;;  %s2562_s22 = smov %s2239_s24 }
 0x1c7   : > { %s2563_s23 = smov %s2566_s27  ;;  %s2564_s24 = smov %s2570_s28 }
 0x1c8   :  { %17 = sbr.rel (!%p15_p12) target bundleno = 4 (0x4), region = 102 }
 0x1cf   :  { %1475 = vsyncpa [#allocation3], 1 }
 0x1d0   :  { %1477 = vsyncpa [#allocation3 + $0x1], 1 }
 0x1d1   :  { %1478 = vsyncpa [#allocation5], 1 }

// kernel: a_call__.13
= control target key start
LH: loop header
LB: loop body
LE: loop exit
PB: predicated region body
PF: predicated region fallthrough
CT: control target
= control target key end

     0   :  { %10 = vsyncpa [#allocation4], 0  ;;  %s1096_s0 = inlined_call_operand.vmem [shape: bf16[2,16,128], index: 0, kind: input, shape index: {}]   ;;  %s1097_s1 = inlined_call_operand.hbm [shape: bf16[1,128,128], index: 1, kind: input, shape index: {}]   ;;  %s1098_s2 = inlined_call_operand.hbm [shape: f32[1,128], index: 2, kind: input, shape index: {}]   ;;  %s1099_s3 = inlined_call_operand.vmem [shape: f32[1,128], index: 3, kind: input, shape index: {}]   ;;  %s1100_s4 = inlined_call_operand.vmem [shape: f32[2,16,128], index: 4, kind: input, shape index: {}]   ;;  %s1101_s5 = inlined_call_operand.vmem [shape: f32[2,16,128], index: 5, kind: output, shape index: {}]  }
   0x1   :  { %11 = vsyncpa [#allocation6], 0  ;;  %s972_s18 = smov 0   ;;  %s974_s19 = smov 0  }
   0x2   :  { %s976_s20 = smov 0  }
   0x3 LB: > { %s729_s21 = sadd.s32 4294967295, %s934_s20   ;;  %s43_s22 = sadd.s32 1, %s930_s19  ;;  %s934_s20 = sphi %s976_s20, %s17_s20   ;;  %s930_s19 = sphi %s974_s19, %s1111_s19   ;;  %s926_s18 = sphi %s972_s18, %s1110_s18  }
   0x4   : > { %p45_p0 = scmp.ge.s32.totalorder %s43_s22, 2  ;;  %p731_p1 = scmp.ge.s32.totalorder %s934_s20, 1 }
   0x5   : > { %p218_p2 = scmp.lt.s32.totalorder %s934_s20, 3  ;;  %p997_p4 = scmp.eq.s32.totalorder %s729_s21, 0 }
   0x6   : > { %s1113_s22 = smov (%p45_p0, %s43_s22), 0  ;;  %s936_s25 = smov [#allocation3]  }
   0x7   : > { %p993_p3 = pnand %p731_p1, %p218_p2  ;;  %s234_s26 = sshll.u32 %s936_s25, 4  ;;  %s235_s26 = int_to_ptr.vmem [resolvable:$true] %s234_s26 }
   0x8   : > { %s1106_s24 = scalar_select %p997_p4, 1, 0 }
   0x9   : > { %s1105_s23 = scalar_select %p993_p3, 1, 0 }
   0xa   : > { %p798_p5 = pneg %p993_p3  ;;  %s937_s28 = smov [#allocation5]  }
   0xb   : > { %s250_s29 = sshll.u32 %s937_s28, 4  ;;  %s848_s7 = scalar_lea.hbm %s1097_s1, 1024  ;;  %s1009_s29 = int_to_ptr.vmem [resolvable:$true] %s250_s29 }
   0xc   : > { %p1005_p6 = pnand %p997_p4, %p798_p5  ;;  %p849_p7 = scmp.ne.s32.totalorder %s1097_s1, %s848_s7 }
   0xd   : > { %p855_p11 = scmp.lt.u32.totalorder %s848_s7, %s1097_s1 }
   0xe   : > { %p850_p8 = pneg %p1005_p6 }
  0x10   : > { %p851_p9 = pnand %p850_p8, %p849_p7 }
  0x12   : > { %p852_p10 = pneg %p851_p9 }
  0x14   : > { %p857_p12 = pnand %p855_p11, %p852_p10 }
  0x16   : > { %860 = shalt.err (!%p857_p12)
}
  0x17   : > { %s861_s12 = scalar_lea.vmem %s235_s26, 1024  ;;  %p869_p2 = scmp.lt.s32.totalorder %s235_s26, %s235_s26 }
  0x18   : > { %p862_p13 = scmp.ne.s32.totalorder %s235_s26, %s861_s12  ;;  %p870_p5 = scmp.lt.s32.totalorder %s861_s12, %s861_s12 }
  0x1a   : > { %p864_p0 = pnand %p862_p13, %p850_p8  ;;  %p871_p4 = por %p870_p5, %p869_p2 }
  0x1c   : > { %p865_p1 = pneg %p864_p0 }
  0x1e   : > { %p872_p3 = pnand %p871_p4, %p865_p1 }
  0x20   : > { %875 = shalt.err (!%p872_p3)
}
  0x21   : > { %s938_s13 = smov 64   ;;  %s939_s14 = smov 4  }
  0x22   : > { %801 = dma.hbm_to_vmem [thread:$0]  (!%p1005_p6), %s1097_s1, 1024, %s235_s26, [#allocation4], %s938_s13, %s938_s13, %s939_s14  }
  0x23   : > { %s876_s25 = scalar_lea.hbm %s1098_s2, 16 }
  0x24   : > { %p877_p7 = scmp.ne.s32.totalorder %s1098_s2, %s876_s25  ;;  %p883_p9 = scmp.lt.u32.totalorder %s876_s25, %s1098_s2 }
  0x26   : > { %p879_p3 = pnand %p877_p7, %p850_p8 }
  0x28   : > { %p880_p4 = pneg %p879_p3 }
  0x2a   : > { %p885_p10 = pnand %p883_p9, %p880_p4 }
  0x2c   : > { %888 = shalt.err (!%p885_p10)
}
  0x2d   : > { %s889_s26 = scalar_lea.vmem %s1009_s29, 16  ;;  %s896_s8 = scalar_lea.vmem %s1009_s29, 32 }
  0x2e   : > { %p890_p11 = scmp.ne.s32.totalorder %s1009_s29, %s889_s26  ;;  %p897_p0 = scmp.lt.s32.totalorder %s1009_s29, %s1009_s29 }
  0x2f   : > { %p898_p1 = scmp.lt.s32.totalorder %s896_s8, %s889_s26 }
  0x30   : > { %p892_p12 = pnand %p890_p11, %p850_p8 }
  0x31   : > { %p899_p2 = por %p898_p1, %p897_p0 }
  0x32   : > { %p893_p13 = pneg %p892_p12 }
  0x34   : > { %p900_p5 = pnand %p899_p2, %p893_p13 }
  0x36   : > { %903 = shalt.err (!%p900_p5)
}
  0x37   : > { %804 = dma.hbm_to_vmem [thread:$0]  (!%p1005_p6), %s1098_s2, 16, %s1009_s29, [#allocation6]  }
  0x38   : > { %p1108_p7 = scmp.ne.s32.totalorder %s1105_s23, 0 }
  0x39   : > { %p1109_p8 = scmp.ne.s32.totalorder (!%p1108_p7), %s1106_s24, 0 }
  0x3a   : > { %301 = sbr.rel (%p1108_p7) target bundleno = 324 (0x144), region = 40 }
  0x41   : > { %917 = dma.done.wait (%p1109_p8), [#allocation4], 1024  }
  0x42   : > { %919 = vsyncadd (%p1109_p8), [#allocation4], 4294966272 }
  0x43   : > { %921 = dma.done.wait (%p1109_p8), [#allocation6], 16  }
  0x44   : > { %923 = vsyncadd (%p1109_p8), [#allocation6], 4294967280  ;;  %v940_v0 = vmov 0.0   ;;  %vm941_vm0 = vmmov 0   ;;  %p363_p6 = scmp.lt.s32.totalorder %s926_s18, 1  ;;  %v839_v1 = vld [vmem:[#allocation3] sm:$0xff]  }
  0x45   : > { %770 = vmatprep.subr.bf16.mxu0 %v940_v0  ;;  %786 = vmatprep.mubr.msk.bf16.mxu0 %vm941_vm0, %v940_v0  ;;  %v840_v2 = vld [vmem:[#allocation3 + $0x8] sm:$0xff]   ;;  %v841_v3 = vld [vmem:[#allocation3 + $0x10] sm:$0xff]   ;;  %v842_v4 = vld [vmem:[#allocation3 + $0x18] sm:$0xff]  }
  0x46   : > { %s1115_s18 = smov (!%p363_p6, %s926_s18), 1  ;;  %771 = vmatpush3.bf16.msra.mxu0 %v839_v1  ;;  %v843_v5 = vld [vmem:[#allocation3 + $0x20] sm:$0xff]   ;;  %v844_v6 = vld [vmem:[#allocation3 + $0x28] sm:$0xff]   ;;  %v845_v7 = vld [vmem:[#allocation3 + $0x30] sm:$0xff]  }
  0x47   : > { %772 = vmatprep.subr.bf16.mxu0 %v940_v0  ;;  %s758_s23 = sshll.u32 %s1115_s18, 3  ;;  %v846_v8 = vld [vmem:[#allocation3 + $0x38] sm:$0xff]   ;;  %s759_s11 = sshll.u32 %s1115_s18, 4  ;;  %v754_v10 = vld [vmem:[#allocation5] ss:$0 sm:$0xff] }
  0x48   : > { %s373_s29 = scalar_lea.vmem %s1096_s0, %s758_s23  ;;  %s390_s14 = scalar_lea.vmem %s1100_s4, %s759_s11  ;;  %v755_v12 = vld [vmem:[%s1099_s3] ss:$0 sm:$0xff] }
  0x49   : > { %v847_v9 = vld [vmem:[%s373_s29] sm:$0xff]   ;;  %v555_v20 = vld [vmem:[%s390_s14 + $0x8] sm:$0xff]  ;;  %s403_s21 = scalar_lea.vmem %s1101_s5, %s759_s11 }
  0x4a   : > { %773 = vmatpush3.bf16.msra.mxu0 %v840_v2  ;;  %v554_v15 = vld [vmem:[%s390_s14] sm:$0xff] }
  0x4b   : > { %774 = vmatprep.subr.bf16.mxu0 %v940_v0 }
  0x4e   : > { %775 = vmatpush3.bf16.msra.mxu0 %v841_v3 }
  0x4f   : > { %776 = vmatprep.subr.bf16.mxu0 %v940_v0 }
  0x52   : > { %777 = vmatpush3.bf16.msra.mxu0 %v842_v4 }
  0x53   : > { %778 = vmatprep.subr.bf16.mxu0 %v940_v0 }
  0x56   : > { %779 = vmatpush3.bf16.msra.mxu0 %v843_v5 }
  0x57   : > { %780 = vmatprep.subr.bf16.mxu0 %v940_v0 }
  0x5a   : > { %781 = vmatpush3.bf16.msra.mxu0 %v844_v6 }
  0x5b   : > { %782 = vmatprep.subr.bf16.mxu0 %v940_v0 }
  0x5e   : > { %783 = vmatpush3.bf16.msra.mxu0 %v845_v7 }
  0x5f   : > { %784 = vmatprep.subr.bf16.mxu0 %v940_v0 }
  0x62   : > { %785 = vmatpush3.bf16.msra.mxu0 %v846_v8 }
  0x65   : > { %787 = vmatmul.mubr.bf16.vlgmr.msra.gmra.mrb[0].mxu0 %v847_v9 }
 0x138   : > { %v520_v11 = vpop.f32.mrb[0].mxu0 }
 0x139   : > { %v543_v13 = vmul.f32 %v754_v10, %v520_v11  ;;  %v788_v14 = vpop.f32.mrb[1].mxu0 }
 0x13a   : > { %v523_v16 = vpop.f32.mrb[2].mxu0 }
 0x13b   : > { %v552_v17 = vadd.f32 %v755_v12, %v543_v13  ;;  %v544_v18 = vmul.f32 %v754_v10, %v523_v16  ;;  %v789_v19 = vpop.f32.mrb[3].mxu0 }
 0x13d   : > { %v556_v21 = vadd.f32 %v554_v15, %v552_v17  ;;  %v553_v22 = vadd.f32 %v755_v12, %v544_v18 }
 0x13f   : > { %v558_v23 = vmax.f32 %v556_v21, 0.0  ;;  %v557_v24 = vadd.f32 %v555_v20, %v553_v22 }
 0x141   : > { %560 = vst [vmem:[%s403_s21] sm:$0xff] %v558_v23  ;;  %v559_v25 = vmax.f32 %v557_v24, 0.0 }
 0x143   : > { %561 = vst [vmem:[%s403_s21 + $0x8] sm:$0xff] %v559_v25 }
 0x144 PF: > { %s17_s20 = sadd.s32 1, %s934_s20   ;;  %s1110_s18 = smov %s930_s19 }
 0x145   : > { %p14_p3 = scmp.ge.s32.totalorder %s17_s20, 4   ;;  %s1111_s19 = smov %s1113_s22 }
 0x147   :  { %16 = sbr.rel (!%p14_p3) target bundleno = 3 (0x3), region = 95 }
 0x14e   :  { %598 = vsyncpa [#allocation4], 1 }
 0x14f   :  { %600 = vsyncpa [#allocation4 + $0x1], 1 }
 0x150   :  { %601 = vsyncpa [#allocation6], 1 }

// kernel: a_call__.15
= control target key start
LH: loop header
LB: loop body
LE: loop exit
PB: predicated region body
PF: predicated region fallthrough
CT: control target
= control target key end

     0   :  { %s772_s15 = smov 0   ;;  %s774_s16 = smov 0   ;;  %s839_s0 = inlined_call_operand.vmem [shape: bf16[2,16,128], index: 0, kind: input, shape index: {}]   ;;  %s840_s1 = inlined_call_operand.vmem [shape: bf16[1,128,128], index: 1, kind: input, shape index: {}]   ;;  %s841_s2 = inlined_call_operand.vmem [shape: f32[1,128], index: 2, kind: input, shape index: {}]   ;;  %s842_s3 = inlined_call_operand.vmem [shape: f32[1,128], index: 3, kind: input, shape index: {}]   ;;  %s843_s4 = inlined_call_operand.vmem [shape: f32[2,16,128], index: 4, kind: output, shape index: {}]  }
   0x1   :  { %s776_s17 = smov 0  }
   0x2 LB: > { %s40_s18 = sadd.s32 1, %s739_s16  ;;  %p637_p0 = scmp.ge.s32.totalorder %s743_s17, 1  ;;  %s743_s17 = sphi %s776_s17, %s14_s17   ;;  %s739_s16 = sphi %s774_s16, %s845_s16   ;;  %s735_s15 = sphi %s772_s15, %s844_s15  }
   0x3   : > { %p42_p1 = scmp.ge.s32.totalorder %s40_s18, 2  ;;  %p236_p2 = scmp.lt.s32.totalorder %s743_s17, 3 }
   0x5   : > { %s847_s18 = smov (%p42_p1, %s40_s18), 0  ;;  %p237_p3 = pnand %p637_p0, %p236_p2 }
   0x6   : > { %v712_v0 = vld [vmem:[%s840_s1] sm:$0xff] (!%p237_p3)   ;;  %v745_v1 = vmov (!%p237_p3), 0.0   ;;  %v713_v2 = vld [vmem:[%s840_s1 + $0x8] sm:$0xff] (!%p237_p3)   ;;  %vm746_vm0 = vmmov (!%p237_p3), 0   ;;  %p291_p4 = scmp.lt.s32.totalorder (!%p237_p3), %s735_s15, 1  ;;  %v714_v3 = vld [vmem:[%s840_s1 + $0x10] sm:$0xff] (!%p237_p3)  }
   0x7   : > { %240 = sbr.rel (%p237_p3) target bundleno = 258 (0x102), region = 36  ;;  %666 = vmatprep.subr.bf16.mxu0 (!%p237_p3), %v745_v1  ;;  %682 = vmatprep.mubr.msk.bf16.mxu0 (!%p237_p3), %vm746_vm0, %v745_v1  ;;  %v715_v4 = vld [vmem:[%s840_s1 + $0x18] sm:$0xff] (!%p237_p3)   ;;  %v716_v5 = vld [vmem:[%s840_s1 + $0x20] sm:$0xff] (!%p237_p3)   ;;  %v717_v6 = vld [vmem:[%s840_s1 + $0x28] sm:$0xff] (!%p237_p3)  }
   0x8   : > { %667 = vmatpush3.bf16.msra.mxu0 (!%p237_p3), %v712_v0  ;;  %v718_v7 = vld [vmem:[%s840_s1 + $0x30] sm:$0xff] (!%p237_p3)   ;;  %v719_v8 = vld [vmem:[%s840_s1 + $0x38] sm:$0xff] (!%p237_p3)   ;;  %v651_v10 = vld [vmem:[%s841_s2] ss:$0 sm:$0xff] (!%p237_p3) }
   0x9   : > { %668 = vmatprep.subr.bf16.mxu0 (!%p237_p3), %v745_v1  ;;  %v652_v12 = vld [vmem:[%s842_s3] ss:$0 sm:$0xff] (!%p237_p3) }
   0xc   : > { %669 = vmatpush3.bf16.msra.mxu0 (!%p237_p3), %v713_v2 }
   0xd   : > { %670 = vmatprep.subr.bf16.mxu0 (!%p237_p3), %v745_v1 }
   0xe   : > { %s849_s15 = smov (!%p291_p4, %s735_s15), 1 }
   0xf   : > { %s655_s25 = sshll.u32 %s849_s15, 3  ;;  %s656_s19 = sshll.u32 %s849_s15, 4 }
  0x10   : > { %s301_s28 = scalar_lea.vmem %s839_s0, %s655_s25  ;;  %671 = vmatpush3.bf16.msra.mxu0 %v714_v3  ;;  %s329_s24 = scalar_lea.vmem %s843_s4, %s656_s19 }
  0x11   : > { %672 = vmatprep.subr.bf16.mxu0 %v745_v1  ;;  %v720_v9 = vld [vmem:[%s301_s28] sm:$0xff]  }
  0x14   : > { %673 = vmatpush3.bf16.msra.mxu0 %v715_v4 }
  0x15   : > { %674 = vmatprep.subr.bf16.mxu0 %v745_v1 }
  0x18   : > { %675 = vmatpush3.bf16.msra.mxu0 %v716_v5 }
  0x19   : > { %676 = vmatprep.subr.bf16.mxu0 %v745_v1 }
  0x1c   : > { %677 = vmatpush3.bf16.msra.mxu0 %v717_v6 }
  0x1d   : > { %678 = vmatprep.subr.bf16.mxu0 %v745_v1 }
  0x20   : > { %679 = vmatpush3.bf16.msra.mxu0 %v718_v7 }
  0x21   : > { %680 = vmatprep.subr.bf16.mxu0 %v745_v1 }
  0x24   : > { %681 = vmatpush3.bf16.msra.mxu0 %v719_v8 }
  0x27   : > { %683 = vmatmul.mubr.bf16.vlgmr.msra.gmra.mrb[0].mxu0 %v720_v9 }
  0xfa   : > { %v446_v11 = vpop.f32.mrb[0].mxu0 }
  0xfb   : > { %v469_v13 = vmul.f32 %v651_v10, %v446_v11  ;;  %v684_v14 = vpop.f32.mrb[1].mxu0 }
  0xfc   : > { %v449_v15 = vpop.f32.mrb[2].mxu0 }
  0xfd   : > { %v478_v16 = vadd.f32 %v652_v12, %v469_v13  ;;  %v470_v17 = vmul.f32 %v651_v10, %v449_v15  ;;  %v685_v18 = vpop.f32.mrb[3].mxu0 }
  0xff   : > { %480 = vst [vmem:[%s329_s24] sm:$0xff] %v478_v16  ;;  %v479_v19 = vadd.f32 %v652_v12, %v470_v17 }
 0x101   : > { %481 = vst [vmem:[%s329_s24 + $0x8] sm:$0xff] %v479_v19 }
 0x102 PF: > { %s14_s17 = sadd.s32 1, %s743_s17   ;;  %s844_s15 = smov %s739_s16 }
 0x103   : > { %p11_p5 = scmp.ge.s32.totalorder %s14_s17, 4   ;;  %s845_s16 = smov %s847_s18 }
 0x105   :  { %13 = sbr.rel (!%p11_p5) target bundleno = 2 (0x2), region = 83 }

// kernel: a_call__.16
= control target key start
LH: loop header
LB: loop body
LE: loop exit
PB: predicated region body
PF: predicated region fallthrough
CT: control target
= control target key end

     0   :  { %s803_s15 = smov 0   ;;  %s805_s16 = smov 0   ;;  %s852_s0 = inlined_call_operand.vmem [shape: bf16[1,32,128], index: 0, kind: input, shape index: {}]   ;;  %s853_s1 = inlined_call_operand.vmem [shape: bf16[8,128,128], index: 1, kind: input, shape index: {}]   ;;  %s854_s2 = inlined_call_operand.vmem [shape: f32[1,128], index: 2, kind: input, shape index: {}]   ;;  %s855_s3 = inlined_call_operand.vmem [shape: f32[1,128], index: 3, kind: input, shape index: {}]   ;;  %s856_s4 = inlined_call_operand.vmem [shape: f32[8,32,128], index: 4, kind: output, shape index: {}]  }
   0x1   :  { %s807_s17 = smov 0  }
   0x2 LB: > { %s40_s18 = sadd.s32 1, %s772_s16  ;;  %p669_p0 = scmp.ge.s32.totalorder %s776_s17, 1  ;;  %s776_s17 = sphi %s807_s17, %s14_s17   ;;  %s772_s16 = sphi %s805_s16, %s858_s16   ;;  %s768_s15 = sphi %s803_s15, %s857_s15  }
   0x3   : > { %p42_p1 = scmp.ge.s32.totalorder %s40_s18, 8  ;;  %p236_p2 = scmp.lt.s32.totalorder %s776_s17, 9 }
   0x5   : > { %s860_s18 = smov (%p42_p1, %s40_s18), 0  ;;  %p237_p3 = pnand %p669_p0, %p236_p2 }
   0x6   : > { %p300_p4 = scmp.lt.s32.totalorder (!%p237_p3), %s768_s15, 7  ;;  %v752_v0 = vld [vmem:[%s852_s0] sm:$0xff] (!%p237_p3)   ;;  %v753_v9 = vld [vmem:[%s852_s0 + $0x8] sm:$0xff] (!%p237_p3)  }
   0x7   : > { %240 = sbr.rel (%p237_p3) target bundleno = 270 (0x10e), region = 36  ;;  %716 = vmatprep.mubr.bf16.mxu0 (!%p237_p3), %v752_v0  ;;  %v684_v10 = vld [vmem:[%s854_s2] ss:$0 sm:$0xff] (!%p237_p3) }
   0x8   : > { %v685_v12 = vld [vmem:[%s855_s3] ss:$0 sm:$0xff] (!%p237_p3) }
   0xe   : > { %s862_s15 = smov (!%p300_p4, %s768_s15), 7 }
   0xf   : > { %s688_s21 = sshll.u32 %s862_s15, 6  ;;  %s689_s29 = sshll.u32 %s862_s15, 5 }
  0x10   : > { %s310_s24 = scalar_lea.vmem %s853_s1, %s688_s21  ;;  %s329_s8 = scalar_lea.vmem %s856_s4, %s689_s29 }
  0x11   : > { %v744_v1 = vld [vmem:[%s310_s24] sm:$0xff]   ;;  %v745_v2 = vld [vmem:[%s310_s24 + $0x8] sm:$0xff]   ;;  %v746_v3 = vld [vmem:[%s310_s24 + $0x10] sm:$0xff]  }
  0x12   : > { %700 = vmatprep.subr.bf16.mxu0 %v744_v1  ;;  %v747_v4 = vld [vmem:[%s310_s24 + $0x18] sm:$0xff]   ;;  %v748_v5 = vld [vmem:[%s310_s24 + $0x20] sm:$0xff]   ;;  %v749_v6 = vld [vmem:[%s310_s24 + $0x28] sm:$0xff]  }
  0x13   : > { %701 = vmatpush3.bf16.msra.mxu0 %v744_v1  ;;  %v750_v7 = vld [vmem:[%s310_s24 + $0x30] sm:$0xff]   ;;  %v751_v8 = vld [vmem:[%s310_s24 + $0x38] sm:$0xff]  }
  0x14   : > { %702 = vmatprep.subr.bf16.mxu0 %v745_v2 }
  0x17   : > { %703 = vmatpush3.bf16.msra.mxu0 %v745_v2 }
  0x18   : > { %704 = vmatprep.subr.bf16.mxu0 %v746_v3 }
  0x1b   : > { %705 = vmatpush3.bf16.msra.mxu0 %v746_v3 }
  0x1c   : > { %706 = vmatprep.subr.bf16.mxu0 %v747_v4 }
  0x1f   : > { %707 = vmatpush3.bf16.msra.mxu0 %v747_v4 }
  0x20   : > { %708 = vmatprep.subr.bf16.mxu0 %v748_v5 }
  0x23   : > { %709 = vmatpush3.bf16.msra.mxu0 %v748_v5 }
  0x24   : > { %710 = vmatprep.subr.bf16.mxu0 %v749_v6 }
  0x27   : > { %711 = vmatpush3.bf16.msra.mxu0 %v749_v6 }
  0x28   : > { %712 = vmatprep.subr.bf16.mxu0 %v750_v7 }
  0x2b   : > { %713 = vmatpush3.bf16.msra.mxu0 %v750_v7 }
  0x2c   : > { %714 = vmatprep.subr.bf16.mxu0 %v751_v8 }
  0x2f   : > { %715 = vmatpush3.bf16.msra.mxu0 %v751_v8 }
  0x32   : > { %717 = vmatmul.mubr.bf16.vlgmr.msra.gmra.mrb[0].mxu0 %v753_v9 }
 0x105   : > { %v718_v11 = vpop.f32.mrb[0].mxu0 }
 0x106   : > { %v497_v13 = vmul.f32 %v718_v11, %v684_v10  ;;  %v458_v14 = vpop.f32.mrb[1].mxu0 }
 0x107   : > { %v495_v15 = vmul.f32 %v684_v10, %v458_v14  ;;  %v719_v16 = vpop.f32.mrb[2].mxu0 }
 0x108   : > { %v508_v17 = vadd.f32 %v685_v12, %v497_v13  ;;  %v498_v18 = vmul.f32 %v719_v16, %v684_v10  ;;  %v461_v19 = vpop.f32.mrb[3].mxu0 }
 0x109   : > { %v506_v20 = vadd.f32 %v685_v12, %v495_v15  ;;  %v496_v21 = vmul.f32 %v684_v10, %v461_v19 }
 0x10a   : > { %512 = vst [vmem:[%s329_s8 + $0x10] sm:$0xff] %v508_v17  ;;  %v509_v22 = vadd.f32 %v685_v12, %v498_v18 }
 0x10b   : > { %510 = vst [vmem:[%s329_s8] sm:$0xff] %v506_v20  ;;  %v507_v23 = vadd.f32 %v685_v12, %v496_v21 }
 0x10c   : > { %513 = vst [vmem:[%s329_s8 + $0x18] sm:$0xff] %v509_v22 }
 0x10d   : > { %511 = vst [vmem:[%s329_s8 + $0x8] sm:$0xff] %v507_v23 }
 0x10e PF: > { %s14_s17 = sadd.s32 1, %s776_s17   ;;  %s857_s15 = smov %s772_s16 }
 0x10f   : > { %p11_p5 = scmp.ge.s32.totalorder %s14_s17, 10   ;;  %s858_s16 = smov %s860_s18 }
 0x111   :  { %13 = sbr.rel (!%p11_p5) target bundleno = 2 (0x2), region = 83 }

// kernel: a_call__.14
= control target key start
LH: loop header
LB: loop body
LE: loop exit
PB: predicated region body
PF: predicated region fallthrough
CT: control target
= control target key end

     0   :  { %11 = vsyncpa [#allocation3], 0  ;;  %s2364_s21 = smov 0   ;;  %s2366_s22 = smov 0   ;;  %s2810_s0 = inlined_call_operand.vmem [shape: bf16[2,6,6,128], index: 0, kind: input, shape index: {}, may-alias: {0,1,2}]   ;;  %s2811_s1 = inlined_call_operand.vmem [shape: bf16[2,6,6,128], index: 1, kind: input, shape index: {}, may-alias: {0,1,2}]   ;;  %s2812_s2 = inlined_call_operand.vmem [shape: bf16[2,6,6,128], index: 2, kind: input, shape index: {}, may-alias: {0,1,2}]   ;;  %s2813_s3 = inlined_call_operand.vmem [shape: bf16[9,128,128], index: 3, kind: input, shape index: {}]   ;;  %s2814_s4 = inlined_call_operand.hbm [shape: f32[1,128], index: 4, kind: input, shape index: {}]   ;;  %s2815_s5 = inlined_call_operand.vmem [shape: f32[1,128], index: 5, kind: input, shape index: {}]   ;;  %s2816_s6 = inlined_call_operand.vmem [shape: f32[2,4,4,128], index: 6, kind: output, shape index: {}]  }
   0x1   :  { %s2368_s23 = smov 0   ;;  %s2370_s24 = smov 0  }
   0x2   :  { %s2372_s25 = smov 0  }
   0x3 LB: > { %s1614_s26 = sadd.s32 4294967295, %s2324_s25   ;;  %s32_s27 = sadd.s32 1, %s2316_s23  ;;  %s2324_s25 = sphi %s2372_s25, %s17_s25   ;;  %s2320_s24 = sphi %s2370_s24, %s2828_s24   ;;  %s2316_s23 = sphi %s2368_s23, %s2827_s23   ;;  %s2312_s22 = sphi %s2366_s22, %s2826_s22   ;;  %s2308_s21 = sphi %s2364_s21, %s2825_s21  }
   0x4   : > { %p34_p0 = scmp.ge.s32.totalorder %s32_s27, 4  ;;  %s36_s28 = sadd.s32 1, %s2320_s24 }
   0x5   : > { %p1616_p1 = scmp.ge.s32.totalorder %s2324_s25, 1  ;;  %p237_p2 = scmp.lt.s32.totalorder %s2324_s25, 9 }
   0x6   : > { %s2830_s27 = smov (%p34_p0, %s32_s27), 0  ;;  %s2832_s28 = smov (!%p34_p0, %s36_s28), %s2320_s24 }
   0x7   : > { %p2397_p3 = pnand %p1616_p1, %p237_p2  ;;  %p38_p4 = scmp.ge.s32.totalorder %s2832_s28, 2 }
   0x8   : > { %p2401_p5 = scmp.eq.s32.totalorder %s1614_s26, 0  ;;  %s2326_s7 = smov [#allocation2]  }
   0x9   : > { %s2820_s29 = scalar_select %p2397_p3, 1, 0 }
   0xa   : > { %s2821_s30 = scalar_select %p2401_p5, 1, 0 }
   0xb   : > { %p2130_p6 = pneg %p2397_p3  ;;  %s2834_s28 = smov (%p38_p4, %s2832_s28), 0 }
   0xc   : > { %s259_s8 = sshll.u32 %s2326_s7, 4  ;;  %s2254_s12 = scalar_lea.hbm %s2814_s4, 16  ;;  %s260_s8 = int_to_ptr.vmem [resolvable:$true] %s259_s8 }
   0xd   : > { %p2411_p7 = pnand %p2401_p5, %p2130_p6  ;;  %p2255_p8 = scmp.ne.s32.totalorder %s2814_s4, %s2254_s12 }
   0xe   : > { %p2261_p12 = scmp.lt.u32.totalorder %s2254_s12, %s2814_s4 }
   0xf   : > { %p2256_p9 = pneg %p2411_p7 }
  0x11   : > { %p2257_p10 = pnand %p2256_p9, %p2255_p8 }
  0x13   : > { %p2258_p11 = pneg %p2257_p10 }
  0x15   : > { %p2263_p13 = pnand %p2261_p12, %p2258_p11 }
  0x17   : > { %2266 = shalt.err (!%p2263_p13)
}
  0x18   : > { %s2267_s17 = scalar_lea.vmem %s260_s8, 16  ;;  %s2274_s18 = scalar_lea.vmem %s260_s8, 32 }
  0x19   : > { %p2268_p0 = scmp.ne.s32.totalorder %s260_s8, %s2267_s17  ;;  %p2275_p4 = scmp.lt.s32.totalorder %s260_s8, %s260_s8 }
  0x1a   : > { %p2276_p6 = scmp.lt.s32.totalorder %s2274_s18, %s2267_s17 }
  0x1b   : > { %p2270_p1 = pnand %p2268_p0, %p2256_p9 }
  0x1c   : > { %p2277_p5 = por %p2276_p6, %p2275_p4 }
  0x1d   : > { %p2271_p2 = pneg %p2270_p1 }
  0x1f   : > { %p2278_p3 = pnand %p2277_p5, %p2271_p2 }
  0x21   : > { %2281 = shalt.err (!%p2278_p3)
}
  0x22   : > { %2133 = dma.hbm_to_vmem [thread:$0]  (!%p2411_p7), %s2814_s4, 16, %s260_s8, [#allocation3]  }
  0x23   : > { %p2823_p8 = scmp.ne.s32.totalorder %s2820_s29, 0 }
  0x24   : > { %p2824_p10 = scmp.ne.s32.totalorder (!%p2823_p8), %s2821_s30, 0 }
  0x25   : > { %315 = sbr.rel (%p2823_p8) target bundleno = 428 (0x1ac), region = 44 }
  0x2c   : > { %2303 = dma.done.wait (%p2824_p10), [#allocation3], 16  }
  0x2d   : > { %2305 = vsyncadd (%p2824_p10), [#allocation3], 4294967280  ;;  %v2327_v0 = vmov 0.0   ;;  %vm2328_vm0 = vmmov 0   ;;  %p379_p3 = scmp.lt.s32.totalorder %s2312_s22, 1  ;;  %s387_s26 = sadd.s32 1, %s2308_s21 }
  0x2e   : > { %1916 = vmatprep.subr.bf16.mxu1 %v2327_v0  ;;  %1996 = vmatprep.subr.bf16.mxu0 %v2327_v0  ;;  %p381_p5 = scmp.lt.s32.totalorder %s2308_s21, 5  ;;  %v2179_v1 = vld [vmem:[%s2813_s3 + $0x40] sm:$0xff]   ;;  %p390_p7 = scmp.lt.s32.totalorder %s387_s26, 5  ;;  %v2181_v3 = vld [vmem:[%s2813_s3 + $0x48] sm:$0xff]   ;;  %v2183_v5 = vld [vmem:[%s2813_s3 + $0x50] sm:$0xff]  }
  0x2f   : > { %1932 = vmatprep.mubr.msk.bf16.mxu1 %vm2328_vm0, %v2327_v0  ;;  %2012 = vmatprep.mubr.msk.bf16.mxu0 %vm2328_vm0, %v2327_v0  ;;  %s2836_s22 = smov (!%p379_p3, %s2312_s22), 1  ;;  %v2180_v2 = vld [vmem:[%s2813_s3 + $0x100] sm:$0xff]   ;;  %v2182_v4 = vld [vmem:[%s2813_s3 + $0x108] sm:$0xff]   ;;  %v2184_v6 = vld [vmem:[%s2813_s3 + $0x110] sm:$0xff]   ;;  %s397_s17 = sadd.s32 2, %s2308_s21 }
  0x30   : > { %1917 = vmatpush3.bf16.msra.mxu1 %v2179_v1  ;;  %s382_s11 = scalar_select %p381_p5, %s2308_s21, 5  ;;  %1997 = vmatpush3.bf16.msra.mxu0 %v2180_v2  ;;  %v2185_v7 = vld [vmem:[%s2813_s3 + $0x58] sm:$0xff]   ;;  %v2187_v9 = vld [vmem:[%s2813_s3 + $0x60] sm:$0xff]   ;;  %v2189_v14 = vld [vmem:[%s2813_s3 + $0x68] sm:$0xff]  }
  0x31   : > { %1918 = vmatprep.subr.bf16.mxu1 %v2327_v0  ;;  %s2464_s14 = smul.u32 6, %s2836_s22  ;;  %1998 = vmatprep.subr.bf16.mxu0 %v2327_v0  ;;  %s2838_s26 = smov (!%p390_p7, %s387_s26), 5  ;;  %v2186_v8 = vld [vmem:[%s2813_s3 + $0x118] sm:$0xff]   ;;  %v2188_v10 = vld [vmem:[%s2813_s3 + $0x120] sm:$0xff]   ;;  %v2190_v16 = vld [vmem:[%s2813_s3 + $0x128] sm:$0xff]  }
  0x32   : > { %v2191_v18 = vld [vmem:[%s2813_s3 + $0x70] sm:$0xff]   ;;  %v2193_v21 = vld [vmem:[%s2813_s3 + $0x78] sm:$0xff]   ;;  %v2196_v28 = vld [vmem:[%s2813_s3] sm:$0xff]   ;;  %p400_p9 = scmp.lt.s32.totalorder %s397_s17, 5  ;;  %p416_p11 = scmp.lt.s32.totalorder %s2308_s21, 3 }
  0x33   : > { %s384_s19 = sadd.s32 %s2464_s14, %s382_s11  ;;  %s393_s20 = sadd.s32 %s2464_s14, %s2838_s26  ;;  %v2192_v20 = vld [vmem:[%s2813_s3 + $0x130] sm:$0xff]   ;;  %v2194_v26 = vld [vmem:[%s2813_s3 + $0x138] sm:$0xff]   ;;  %v2198_v30 = vld [vmem:[%s2813_s3 + $0x140] sm:$0xff]  }
  0x34   : > { %1919 = vmatpush3.bf16.msra.mxu1 %v2181_v3  ;;  %1999 = vmatpush3.bf16.msra.mxu0 %v2182_v4  ;;  %s1623_s7 = sshll.u32 %s384_s19, 2  ;;  %s1624_s10 = sshll.u32 %s393_s20, 2  ;;  %v2199_v31 = vld [vmem:[%s2813_s3 + $0x8] sm:$0xff]   ;;  %v2201_v33 = vld [vmem:[%s2813_s3 + $0x10] sm:$0xff]   ;;  %v2203_v35 = vld [vmem:[%s2813_s3 + $0x18] sm:$0xff]  }
  0x35   : > { %1920 = vmatprep.subr.bf16.mxu1 %v2327_v0  ;;  %2000 = vmatprep.subr.bf16.mxu0 %v2327_v0  ;;  %s386_s26 = scalar_lea.vmem %s2810_s0, %s1623_s7  ;;  %s395_s18 = scalar_lea.vmem %s2811_s1, %s1624_s10  ;;  %v2200_v32 = vld [vmem:[%s2813_s3 + $0x148] sm:$0xff]   ;;  %v2202_v34 = vld [vmem:[%s2813_s3 + $0x150] sm:$0xff]   ;;  %v2204_v36 = vld [vmem:[%s2813_s3 + $0x158] sm:$0xff]  }
  0x36   : > { %v2499_v11 = vld [vmem:[%s386_s26] sm:$0x7]  ;;  %v2207_v39 = vld [vmem:[%s2813_s3 + $0x28] sm:$0xff]   ;;  %v2209_v41 = vld [vmem:[%s2813_s3 + $0x30] sm:$0xff]   ;;  %s2840_s17 = smov (!%p400_p9, %s397_s17), 5  ;;  %s2842_s21 = smov (!%p416_p11, %s2308_s21), 3 }
  0x37   : > { %v2503_v12 = vcombine.low %v2499_v11, %v2499_v11  ;;  %v2505_v13 = vld [vmem:[%s395_s18] sm:$0x7]  ;;  %v2208_v40 = vld [vmem:[%s2813_s3 + $0x168] sm:$0xff]   ;;  %v2210_v42 = vld [vmem:[%s2813_s3 + $0x170] sm:$0xff]   ;;  %s403_s12 = sadd.s32 %s2464_s14, %s2840_s17  ;;  %s1626_s17 = sshll.u32 %s2836_s22, 2 }
  0x38   : > { %1921 = vmatpush3.bf16.msra.mxu1 %v2183_v5  ;;  %2001 = vmatpush3.bf16.msra.mxu0 %v2184_v6  ;;  %v2512_v15 = vcombine.low %v2505_v13, %v2505_v13  ;;  %v2205_v37 = vld [vmem:[%s2813_s3 + $0x20] sm:$0xff]   ;;  %v2211_v43 = vld [vmem:[%s2813_s3 + $0x38] sm:$0xff]   ;;  %v2215_v48 = vld [vmem:[%s2813_s3 + $0x88] sm:$0xff]   ;;  %s1625_s15 = sshll.u32 %s403_s12, 2  ;;  %s422_s20 = sadd.s32 %s1626_s17, %s2842_s21 }
  0x39   : > { %1922 = vmatprep.subr.bf16.mxu1 %v2327_v0  ;;  %2002 = vmatprep.subr.bf16.mxu0 %v2327_v0  ;;  %v468_v17 = vshll.u32 %v2503_v12, 16  ;;  %v466_v22 = vshrl.u32 %v2503_v12, 16  ;;  %v2206_v38 = vld [vmem:[%s2813_s3 + $0x160] sm:$0xff]   ;;  %v2212_v44 = vld [vmem:[%s2813_s3 + $0x178] sm:$0xff]   ;;  %v2216_v49 = vld [vmem:[%s2813_s3 + $0x188] sm:$0xff]   ;;  %s405_s29 = scalar_lea.vmem %s2812_s2, %s1625_s15  ;;  %v666_v62 = vrot.slane %v2503_v12, 1 }
  0x3a   : > { %v886_v19 = vshll.u32 %v2512_v15, 16  ;;  %v884_v24 = vshrl.u32 %v2512_v15, 16  ;;  %v2213_v45 = vld [vmem:[%s2813_s3 + $0x80] sm:$0xff]   ;;  %v997_v46 = vrot.slane %v2512_v15, 1  ;;  %v2217_v50 = vld [vmem:[%s2813_s3 + $0x90] sm:$0xff]   ;;  %v2219_v52 = vld [vmem:[%s2813_s3 + $0x98] sm:$0xff]  }
  0x3b   : > { %v470_v23 = vrot.slane %v468_v17, 1  ;;  %v2214_v47 = vld [vmem:[%s2813_s3 + $0x180] sm:$0xff]   ;;  %v2218_v51 = vld [vmem:[%s2813_s3 + $0x190] sm:$0xff]   ;;  %v2220_v53 = vld [vmem:[%s2813_s3 + $0x198] sm:$0xff]   ;;  %s1627_s7 = sshll.u32 %s422_s20, 2 }
  0x3c   : > { %1923 = vmatpush3.bf16.msra.mxu1 %v2185_v7  ;;  %2003 = vmatpush3.bf16.msra.mxu0 %v2186_v8  ;;  %v888_v25 = vrot.slane %v886_v19, 1  ;;  %v2221_v54 = vld [vmem:[%s2813_s3 + $0xa0] sm:$0xff]   ;;  %v2223_v56 = vld [vmem:[%s2813_s3 + $0xa8] sm:$0xff]   ;;  %v2225_v58 = vld [vmem:[%s2813_s3 + $0xb0] sm:$0xff]   ;;  %s424_s10 = scalar_lea.vmem %s2816_s6, %s1627_s7 }
  0x3d   : > { %1924 = vmatprep.subr.bf16.mxu1 %v2327_v0  ;;  %2004 = vmatprep.subr.bf16.mxu0 %v2327_v0  ;;  %v471_v27 = vor.u32 %v470_v23, %v466_v22  ;;  %v2222_v55 = vld [vmem:[%s2813_s3 + $0x1a0] sm:$0xff]   ;;  %v2224_v57 = vld [vmem:[%s2813_s3 + $0x1a8] sm:$0xff]   ;;  %v2226_v59 = vld [vmem:[%s2813_s3 + $0x1b0] sm:$0xff]  }
  0x3e   : > { %v889_v29 = vor.u32 %v888_v25, %v884_v24  ;;  %v2227_v60 = vld [vmem:[%s2813_s3 + $0xb8] sm:$0xff]   ;;  %v2229_v63 = vld [vmem:[%s2813_s3 + $0xc0] sm:$0xff]   ;;  %v2232_v3 = vld [vmem:[%s2813_s3 + $0xc8] sm:$0xff]  }
  0x3f   : > { %v2228_v61 = vld [vmem:[%s2813_s3 + $0x1b8] sm:$0xff]   ;;  %v428_v1 = vld [vmem:[%s405_s29] sm:$0x7]  ;;  %v2233_v4 = vld [vmem:[%s2813_s3 + $0x1c8] sm:$0xff]  }
  0x40   : > { %1925 = vmatpush3.bf16.msra.mxu1 %v2187_v9  ;;  %2005 = vmatpush3.bf16.msra.mxu0 %v2188_v10  ;;  %v2231_v2 = vld [vmem:[%s2813_s3 + $0x1c0] sm:$0xff]   ;;  %v2234_v5 = vld [vmem:[%s2813_s3 + $0xd0] sm:$0xff]   ;;  %v2236_v7 = vld [vmem:[%s2813_s3 + $0xd8] sm:$0xff]  }
  0x41   : > { %1926 = vmatprep.subr.bf16.mxu1 %v2327_v0  ;;  %2006 = vmatprep.subr.bf16.mxu0 %v2327_v0  ;;  %v2235_v6 = vld [vmem:[%s2813_s3 + $0x1d0] sm:$0xff]   ;;  %v2237_v8 = vld [vmem:[%s2813_s3 + $0x1d8] sm:$0xff]   ;;  %v2238_v9 = vld [vmem:[%s2813_s3 + $0xe0] sm:$0xff]  }
  0x42   : > { %v2239_v10 = vld [vmem:[%s2813_s3 + $0x1e0] sm:$0xff]   ;;  %v2240_v12 = vld [vmem:[%s2813_s3 + $0xe8] sm:$0xff]   ;;  %v2243_v17 = vld [vmem:[%s2813_s3 + $0x1f0] sm:$0xff]  }
  0x43   : > { %v2244_v19 = vld [vmem:[%s2813_s3 + $0xf8] sm:$0xff]   ;;  %v2246_v23 = vld [vmem:[%s2813_s3 + $0x200] sm:$0xff]   ;;  %v2247_v24 = vld [vmem:[%s2813_s3 + $0x208] sm:$0xff]  }
  0x44   : > { %1927 = vmatpush3.bf16.msra.mxu1 %v2189_v14  ;;  %2007 = vmatpush3.bf16.msra.mxu0 %v2190_v16  ;;  %v2241_v14 = vld [vmem:[%s2813_s3 + $0x1e8] sm:$0xff]   ;;  %v2242_v16 = vld [vmem:[%s2813_s3 + $0xf0] sm:$0xff]  }
  0x45   : > { %1928 = vmatprep.subr.bf16.mxu1 %v2327_v0  ;;  %2008 = vmatprep.subr.bf16.mxu0 %v2327_v0  ;;  %v2248_v25 = vld [vmem:[%s2813_s3 + $0x210] sm:$0xff]  }
  0x48   : > { %1929 = vmatpush3.bf16.msra.mxu1 %v2191_v18  ;;  %2009 = vmatpush3.bf16.msra.mxu0 %v2192_v20 }
  0x49   : > { %1930 = vmatprep.subr.bf16.mxu1 %v2327_v0  ;;  %2010 = vmatprep.subr.bf16.mxu0 %v2327_v0 }
  0x4c   : > { %1931 = vmatpush3.bf16.msra.mxu1 %v2193_v21  ;;  %2011 = vmatpush3.bf16.msra.mxu0 %v2194_v26  ;;  %v2245_v21 = vld [vmem:[%s2813_s3 + $0x1f8] sm:$0xff]   ;;  %v2250_v26 = vld [vmem:[%s2813_s3 + $0x220] sm:$0xff]  }
  0x4d   : > { %1936 = vmatprep.subr.bf16.mxu1 %v2327_v0  ;;  %2016 = vmatprep.subr.bf16.mxu0 %v2327_v0 }
  0x4f   : > { %1933 = vmatmul.mubr.bf16.vlgmr.msra.gmra.mrb[0].mxu1 %v471_v27  ;;  %2013 = vmatmul.mubr.bf16.vlgmr.msra.gmra.mrb[0].mxu0 %v889_v29  ;;  %v2251_v27 = vld [vmem:[%s2813_s3 + $0x228] sm:$0xff]   ;;  %v2253_v29 = vld [vmem:[%s2813_s3 + $0x238] sm:$0xff]  }
  0x50   : > { %1937 = vmatpush3.bf16.msra.mxu1 %v2196_v28  ;;  %2017 = vmatpush3.bf16.msra.mxu0 %v2198_v30  ;;  %v2252_v28 = vld [vmem:[%s2813_s3 + $0x230] sm:$0xff]  }
  0x51   : > { %1938 = vmatprep.subr.bf16.mxu1 %v2327_v0  ;;  %2018 = vmatprep.subr.bf16.mxu0 %v2327_v0 }
  0x52   : > { %1952 = vmatprep.mubr.msk.bf16.mxu1 %vm2328_vm0, %v2327_v0  ;;  %2032 = vmatprep.mubr.msk.bf16.mxu0 %vm2328_vm0, %v2327_v0 }
  0x54   : > { %1939 = vmatpush3.bf16.msra.mxu1 %v2199_v31  ;;  %2019 = vmatpush3.bf16.msra.mxu0 %v2200_v32 }
  0x55   : > { %1940 = vmatprep.subr.bf16.mxu1 %v2327_v0  ;;  %2020 = vmatprep.subr.bf16.mxu0 %v2327_v0 }
  0x58   : > { %1941 = vmatpush3.bf16.msra.mxu1 %v2201_v33  ;;  %2021 = vmatpush3.bf16.msra.mxu0 %v2202_v34 }
  0x59   : > { %1942 = vmatprep.subr.bf16.mxu1 %v2327_v0  ;;  %2022 = vmatprep.subr.bf16.mxu0 %v2327_v0 }
  0x5c   : > { %1943 = vmatpush3.bf16.msra.mxu1 %v2203_v35  ;;  %2023 = vmatpush3.bf16.msra.mxu0 %v2204_v36  ;;  %v1831_v36 = vld [vmem:[#allocation2] ss:$0 sm:$0xff] }
  0x5d   : > { %1944 = vmatprep.subr.bf16.mxu1 %v2327_v0  ;;  %2024 = vmatprep.subr.bf16.mxu0 %v2327_v0 }
  0x60   : > { %1945 = vmatpush3.bf16.msra.mxu1 %v2205_v37  ;;  %2025 = vmatpush3.bf16.msra.mxu0 %v2206_v38 }
  0x61   : > { %1946 = vmatprep.subr.bf16.mxu1 %v2327_v0  ;;  %2026 = vmatprep.subr.bf16.mxu0 %v2327_v0 }
  0x64   : > { %1947 = vmatpush3.bf16.msra.mxu1 %v2207_v39  ;;  %2027 = vmatpush3.bf16.msra.mxu0 %v2208_v40  ;;  %v1832_v39 = vld [vmem:[%s2815_s5] ss:$0 sm:$0xff] }
  0x65   : > { %1948 = vmatprep.subr.bf16.mxu1 %v2327_v0  ;;  %2028 = vmatprep.subr.bf16.mxu0 %v2327_v0 }
  0x68   : > { %1949 = vmatpush3.bf16.msra.mxu1 %v2209_v41  ;;  %2029 = vmatpush3.bf16.msra.mxu0 %v2210_v42 }
  0x69   : > { %1950 = vmatprep.subr.bf16.mxu1 %v2327_v0  ;;  %2030 = vmatprep.subr.bf16.mxu0 %v2327_v0 }
  0x6c   : > { %1951 = vmatpush3.bf16.msra.mxu1 %v2211_v43  ;;  %2031 = vmatpush3.bf16.msra.mxu0 %v2212_v44 }
  0x6d   : > { %1956 = vmatprep.subr.bf16.mxu1 %v2327_v0  ;;  %2036 = vmatprep.subr.bf16.mxu0 %v2327_v0 }
  0x6f   : > { %1953 = vmatmul.mubr.bf16.vlgmr.msra.gmra.mrb[0].mxu1 %v2499_v11  ;;  %2033 = vmatmul.mubr.bf16.vlgmr.msra.gmra.mrb[0].mxu0 %v997_v46  ;;  %v1798_v11 = vcombine.low %v428_v1, %v428_v1 }
  0x70   : > { %1957 = vmatpush3.bf16.msra.mxu1 %v2213_v45  ;;  %2037 = vmatpush3.bf16.msra.mxu0 %v2214_v47 }
  0x71   : > { %1958 = vmatprep.subr.bf16.mxu1 %v2327_v0  ;;  %2038 = vmatprep.subr.bf16.mxu0 %v2327_v0  ;;  %v1217_v15 = vshll.u32 %v1798_v11, 16  ;;  %v1215_v18 = vshrl.u32 %v1798_v11, 16  ;;  %v1328_v30 = vrot.slane %v1798_v11, 1 }
  0x72   : > { %1972 = vmatprep.mubr.msk.bf16.mxu1 %vm2328_vm0, %v2327_v0  ;;  %2052 = vmatprep.mubr.msk.bf16.mxu0 %vm2328_vm0, %v2327_v0 }
  0x73   : > { %v1219_v20 = vrot.slane %v1217_v15, 1 }
  0x74   : > { %1959 = vmatpush3.bf16.msra.mxu1 %v2215_v48  ;;  %2039 = vmatpush3.bf16.msra.mxu0 %v2216_v49 }
  0x75   : > { %1960 = vmatprep.subr.bf16.mxu1 %v2327_v0  ;;  %2040 = vmatprep.subr.bf16.mxu0 %v2327_v0  ;;  %v1220_v22 = vor.u32 %v1219_v20, %v1215_v18 }
  0x78   : > { %1961 = vmatpush3.bf16.msra.mxu1 %v2217_v50  ;;  %2041 = vmatpush3.bf16.msra.mxu0 %v2218_v51 }
  0x79   : > { %1962 = vmatprep.subr.bf16.mxu1 %v2327_v0  ;;  %2042 = vmatprep.subr.bf16.mxu0 %v2327_v0 }
  0x7c   : > { %1963 = vmatpush3.bf16.msra.mxu1 %v2219_v52  ;;  %2043 = vmatpush3.bf16.msra.mxu0 %v2220_v53 }
  0x7d   : > { %1964 = vmatprep.subr.bf16.mxu1 %v2327_v0  ;;  %2044 = vmatprep.subr.bf16.mxu0 %v2327_v0 }
  0x80   : > { %1965 = vmatpush3.bf16.msra.mxu1 %v2221_v54  ;;  %2045 = vmatpush3.bf16.msra.mxu0 %v2222_v55 }
  0x81   : > { %1966 = vmatprep.subr.bf16.mxu1 %v2327_v0  ;;  %2046 = vmatprep.subr.bf16.mxu0 %v2327_v0 }
  0x84   : > { %1967 = vmatpush3.bf16.msra.mxu1 %v2223_v56  ;;  %2047 = vmatpush3.bf16.msra.mxu0 %v2224_v57 }
  0x85   : > { %1968 = vmatprep.subr.bf16.mxu1 %v2327_v0  ;;  %2048 = vmatprep.subr.bf16.mxu0 %v2327_v0 }
  0x88   : > { %1969 = vmatpush3.bf16.msra.mxu1 %v2225_v58  ;;  %2049 = vmatpush3.bf16.msra.mxu0 %v2226_v59 }
  0x89   : > { %1970 = vmatprep.subr.bf16.mxu1 %v2327_v0  ;;  %2050 = vmatprep.subr.bf16.mxu0 %v2327_v0 }
  0x8c   : > { %1971 = vmatpush3.bf16.msra.mxu1 %v2227_v60  ;;  %2051 = vmatpush3.bf16.msra.mxu0 %v2228_v61 }
  0x8d   : > { %1976 = vmatprep.subr.bf16.mxu1 %v2327_v0  ;;  %2056 = vmatprep.subr.bf16.mxu0 %v2327_v0 }
  0x8f   : > { %1973 = vmatmul.mubr.bf16.vlgmr.msra.gmra.mrb[0].mxu1 %v666_v62  ;;  %2053 = vmatmul.mubr.bf16.vlgmr.msra.gmra.mrb[0].mxu0 %v428_v1 }
  0x90   : > { %1977 = vmatpush3.bf16.msra.mxu1 %v2229_v63  ;;  %2057 = vmatpush3.bf16.msra.mxu0 %v2231_v2 }
  0x91   : > { %1978 = vmatprep.subr.bf16.mxu1 %v2327_v0  ;;  %2058 = vmatprep.subr.bf16.mxu0 %v2327_v0 }
  0x92   : > { %1992 = vmatprep.mubr.msk.bf16.mxu1 %vm2328_vm0, %v2327_v0  ;;  %2072 = vmatprep.mubr.msk.bf16.mxu0 %vm2328_vm0, %v2327_v0 }
  0x94   : > { %1979 = vmatpush3.bf16.msra.mxu1 %v2232_v3  ;;  %2059 = vmatpush3.bf16.msra.mxu0 %v2233_v4 }
  0x95   : > { %1980 = vmatprep.subr.bf16.mxu1 %v2327_v0  ;;  %2060 = vmatprep.subr.bf16.mxu0 %v2327_v0 }
  0x98   : > { %1981 = vmatpush3.bf16.msra.mxu1 %v2234_v5  ;;  %2061 = vmatpush3.bf16.msra.mxu0 %v2235_v6 }
  0x99   : > { %1982 = vmatprep.subr.bf16.mxu1 %v2327_v0  ;;  %2062 = vmatprep.subr.bf16.mxu0 %v2327_v0 }
  0x9c   : > { %1983 = vmatpush3.bf16.msra.mxu1 %v2236_v7  ;;  %2063 = vmatpush3.bf16.msra.mxu0 %v2237_v8 }
  0x9d   : > { %1984 = vmatprep.subr.bf16.mxu1 %v2327_v0  ;;  %2064 = vmatprep.subr.bf16.mxu0 %v2327_v0 }
  0xa0   : > { %1985 = vmatpush3.bf16.msra.mxu1 %v2238_v9  ;;  %2065 = vmatpush3.bf16.msra.mxu0 %v2239_v10 }
  0xa1   : > { %1986 = vmatprep.subr.bf16.mxu1 %v2327_v0  ;;  %2066 = vmatprep.subr.bf16.mxu0 %v2327_v0 }
  0xa4   : > { %1987 = vmatpush3.bf16.msra.mxu1 %v2240_v12  ;;  %2067 = vmatpush3.bf16.msra.mxu0 %v2241_v14 }
  0xa5   : > { %1988 = vmatprep.subr.bf16.mxu1 %v2327_v0  ;;  %2068 = vmatprep.subr.bf16.mxu0 %v2327_v0 }
  0xa8   : > { %1989 = vmatpush3.bf16.msra.mxu1 %v2242_v16  ;;  %2069 = vmatpush3.bf16.msra.mxu0 %v2243_v17 }
  0xa9   : > { %1990 = vmatprep.subr.bf16.mxu1 %v2327_v0  ;;  %2070 = vmatprep.subr.bf16.mxu0 %v2327_v0 }
  0xac   : > { %1991 = vmatpush3.bf16.msra.mxu1 %v2244_v19  ;;  %2071 = vmatpush3.bf16.msra.mxu0 %v2245_v21 }
  0xad   : > { %2076 = vmatprep.subr.bf16.mxu0 %v2327_v0 }
  0xaf   : > { %1993 = vmatmul.mubr.bf16.vlgmr.msra.gmra.mrb[0].mxu1 %v2505_v13  ;;  %2073 = vmatmul.mubr.bf16.vlgmr.msra.gmra.mrb[0].mxu0 %v1220_v22  ;;  %v2249_v13 = vld [vmem:[%s2813_s3 + $0x218] sm:$0xff]  }
  0xb0   : > { %2077 = vmatpush3.bf16.msra.mxu0 %v2246_v23  ;;  %2092 = vmatprep.mubr.msk.bf16.mxu0 %vm2328_vm0, %v2327_v0 }
  0xb1   : > { %2078 = vmatprep.subr.bf16.mxu0 %v2327_v0 }
  0xb4   : > { %2079 = vmatpush3.bf16.msra.mxu0 %v2247_v24 }
  0xb5   : > { %2080 = vmatprep.subr.bf16.mxu0 %v2327_v0 }
  0xb8   : > { %2081 = vmatpush3.bf16.msra.mxu0 %v2248_v25 }
  0xb9   : > { %2082 = vmatprep.subr.bf16.mxu0 %v2327_v0 }
  0xbc   : > { %2083 = vmatpush3.bf16.msra.mxu0 %v2249_v13 }
  0xbd   : > { %2084 = vmatprep.subr.bf16.mxu0 %v2327_v0 }
  0xc0   : > { %2085 = vmatpush3.bf16.msra.mxu0 %v2250_v26 }
  0xc1   : > { %2086 = vmatprep.subr.bf16.mxu0 %v2327_v0 }
  0xc4   : > { %2087 = vmatpush3.bf16.msra.mxu0 %v2251_v27 }
  0xc5   : > { %2088 = vmatprep.subr.bf16.mxu0 %v2327_v0 }
  0xc8   : > { %2089 = vmatpush3.bf16.msra.mxu0 %v2252_v28 }
  0xc9   : > { %2090 = vmatprep.subr.bf16.mxu0 %v2327_v0 }
  0xcc   : > { %2091 = vmatpush3.bf16.msra.mxu0 %v2253_v29 }
  0xcf   : > { %2093 = vmatmul.mubr.bf16.vlgmr.msra.gmra.mrb[0].mxu0 %v1328_v30 }
 0x182   : > { %v856_v31 = vpop.f32.mrb[0].mxu1 }
 0x183   : > { %v1994_v32 = vpop.f32.mrb[1].mxu1 }
 0x184   : > { %v859_v33 = vpop.f32.mrb[2].mxu1 }
 0x185   : > { %v1995_v34 = vpop.f32.mrb[3].mxu1 }
 0x1a2   : > { %v1412_v35 = vpop.f32.mrb[0].mxu0 }
 0x1a3   : > { %v2096_v37 = vadd.f32 %v1412_v35, %v856_v31  ;;  %v2094_v38 = vpop.f32.mrb[1].mxu0 }
 0x1a4   : > { %v1415_v0 = vpop.f32.mrb[2].mxu0 }
 0x1a5   : > { %v1426_v40 = vmul.f32 %v2096_v37, %v1831_v36  ;;  %v2095_v41 = vpop.f32.mrb[3].mxu0 }
 0x1a7   : > { %v1434_v42 = vadd.f32 %v1832_v39, %v1426_v40 }
 0x1a9   : > { %v1435_v43 = vmax.f32 %v1434_v42, 0.0 }
 0x1ab   : > { %1436 = vst [vmem:[%s424_s10] sm:$0xf] %v1435_v43 }
 0x1ac PF: > { %s17_s25 = sadd.s32 1, %s2324_s25   ;;  %s2825_s21 = smov %s2316_s23 }
 0x1ad   : > { %p14_p12 = scmp.ge.s32.totalorder %s17_s25, 10   ;;  %s2826_s22 = smov %s2320_s24 }
 0x1ae   : > { %s2827_s23 = smov %s2830_s27  ;;  %s2828_s24 = smov %s2834_s28 }
 0x1af   :  { %16 = sbr.rel (!%p14_p12) target bundleno = 3 (0x3), region = 100 }
 0x1b6   :  { %1470 = vsyncpa [#allocation3], 1 }
 0x1b7   :  { %1472 = vsyncpa [#allocation3 + $0x1], 1 }

// kernel: a_call__.17
= control target key start
LH: loop header
LB: loop body
LE: loop exit
PB: predicated region body
PF: predicated region fallthrough
CT: control target
= control target key end

     0   :  { %s1047_s15 = smov 0   ;;  %s1049_s16 = smov 0   ;;  %s1200_s0 = inlined_call_operand.vmem [shape: bf16[1,32,128], index: 0, kind: input, shape index: {}]   ;;  %s1201_s1 = inlined_call_operand.vmem [shape: bf16[2,128,4096], index: 1, kind: input, shape index: {}]   ;;  %s1202_s2 = inlined_call_operand.vmem [shape: f32[1,4096], index: 2, kind: input, shape index: {}]   ;;  %s1203_s3 = inlined_call_operand.vmem [shape: f32[1,4096], index: 3, kind: input, shape index: {}]   ;;  %s1204_s4 = inlined_call_operand.vmem [shape: f32[2,32,4096], index: 4, kind: output, shape index: {}]  }
   0x1   :  { %s1051_s17 = smov 0   ;;  %s1053_s18 = smov 0  }
   0x2   :  { %s1055_s19 = smov 0   ;;  %s1057_s20 = smov 0  }
   0x3   :  { %s1059_s21 = smov 0  }
   0x4 LB: > { %s32_s22 = sadd.s32 1, %s1011_s19  ;;  %s40_s23 = sadd.s32 1, %s1015_s20  ;;  %s1019_s21 = sphi %s1059_s21, %s14_s21   ;;  %s1015_s20 = sphi %s1057_s20, %s1211_s20   ;;  %s1011_s19 = sphi %s1055_s19, %s1210_s19   ;;  %s1007_s18 = sphi %s1053_s18, %s1209_s18   ;;  %s1003_s17 = sphi %s1051_s17, %s1208_s17   ;;  %s999_s16 = sphi %s1049_s16, %s1207_s16   ;;  %s995_s15 = sphi %s1047_s15, %s1206_s15  }
   0x5   : > { %p34_p0 = scmp.ge.s32.totalorder %s32_s22, 16  ;;  %s828_s24 = sadd.s32 4294967295, %s1019_s21  }
   0x6   : > { %p86_p1 = scmp.ne.s32.totalorder %s999_s16, %s995_s15  ;;  %p87_p2 = scmp.eq.s32.totalorder %s1019_s21, 0 }
   0x7   : > { %s1213_s22 = smov (%p34_p0, %s32_s22), 0  ;;  %s1215_s23 = smov (!%p34_p0, %s40_s23), %s1015_s20 }
   0x8   : > { %p42_p3 = scmp.ge.s32.totalorder %s1215_s23, 2  ;;  %p172_p4 = scmp.eq.s32.totalorder %s828_s24, 31 }
   0x9   : > { %s75_s25 = ssub.s32 %s1011_s19, %s1213_s22  ;;  %p88_p5 = por %p87_p2, %p86_p1 }
   0xa   : > { %s1217_s23 = smov (%p42_p3, %s1215_s23), 0  ;;  %p1095_p6 = por %p172_p4, %p86_p1 }
   0xb   : > { %s72_s27 = ssub.s32 %s1015_s20, %s1217_s23  ;;  %s79_s29 = sadd.s32 1, %s999_s16 }
   0xc   : > { %s76_s28 = sor.u32 %s75_s25, %s72_s27  ;;  %p832_p8 = scmp.ge.s32.totalorder %s1019_s21, 32 }
   0xd   : > { %p77_p7 = scmp.eq.s32.totalorder %s76_s28, 0 }
   0xe   : > { %206 = sbr.rel (%p832_p8) target bundleno = 44 (0x2c), region = 20 }
   0xf   : > { %s1103_s30 = scalar_select %p77_p7, %s999_s16, %s79_s29  }
  0x15   : > { %209 = sbr.rel (!%p88_p5) target bundleno = 44 (0x2c), region = 24  ;;  %s211_s5 = sand.u32 (%p88_p5), 1, %s999_s16  }
  0x16   : > { %s834_s6 = sshll.u32 (%p88_p5), %s1011_s19, 1  ;;  %s833_s7 = sshll.u32 (%p88_p5), %s211_s5, 7 }
  0x17   : > { %s835_s8 = sshll.u32 (%p88_p5), %s1015_s20, 9  ;;  %s213_s14 = scalar_lea.vmem (%p88_p5), [#allocation3], %s833_s7 }
  0x18   : > { %s219_s9 = sadd.s32 (%p88_p5), %s835_s8, %s834_s6 }
  0x19   : > { %s836_s10 = sshll.u32 (%p88_p5), %s219_s9, 2 }
  0x1a   : > { %s1112_s13 = scalar_lea.vmem (%p88_p5), %s1201_s1, %s836_s10 }
  0x1b   : > { %v279_v0 = vld [vmem:[%s1112_s13] sm:$0xff] (%p88_p5) }
  0x1c   : > { %v281_v1 = vld [vmem:[%s1112_s13 + $0x80] sm:$0xff]  ;;  %280 = vst [vmem:[%s213_s14] sm:$0xff] %v279_v0 }
  0x1d   : > { %v283_v2 = vld [vmem:[%s1112_s13 + $0x100] sm:$0xff]  ;;  %282 = vst [vmem:[%s213_s14 + $0x8] sm:$0xff] %v281_v1 }
  0x1e   : > { %284 = vst [vmem:[%s213_s14 + $0x10] sm:$0xff] %v283_v2  ;;  %v285_v3 = vld [vmem:[%s1112_s13 + $0x180] sm:$0xff] }
  0x1f   : > { %v287_v4 = vld [vmem:[%s1112_s13 + $0x200] sm:$0xff]  ;;  %286 = vst [vmem:[%s213_s14 + $0x18] sm:$0xff] %v285_v3 }
  0x20   : > { %v289_v5 = vld [vmem:[%s1112_s13 + $0x280] sm:$0xff]  ;;  %288 = vst [vmem:[%s213_s14 + $0x20] sm:$0xff] %v287_v4 }
  0x21   : > { %290 = vst [vmem:[%s213_s14 + $0x28] sm:$0xff] %v289_v5  ;;  %v291_v6 = vld [vmem:[%s1112_s13 + $0x300] sm:$0xff] }
  0x22   : > { %v293_v7 = vld [vmem:[%s1112_s13 + $0x380] sm:$0xff]  ;;  %292 = vst [vmem:[%s213_s14 + $0x30] sm:$0xff] %v291_v6 }
  0x23   : > { %v295_v8 = vld [vmem:[%s1112_s13 + $0x400] sm:$0xff]  ;;  %294 = vst [vmem:[%s213_s14 + $0x38] sm:$0xff] %v293_v7 }
  0x24   : > { %296 = vst [vmem:[%s213_s14 + $0x40] sm:$0xff] %v295_v8  ;;  %v297_v9 = vld [vmem:[%s1112_s13 + $0x480] sm:$0xff] }
  0x25   : > { %v299_v10 = vld [vmem:[%s1112_s13 + $0x500] sm:$0xff]  ;;  %298 = vst [vmem:[%s213_s14 + $0x48] sm:$0xff] %v297_v9 }
  0x26   : > { %v301_v11 = vld [vmem:[%s1112_s13 + $0x580] sm:$0xff]  ;;  %300 = vst [vmem:[%s213_s14 + $0x50] sm:$0xff] %v299_v10 }
  0x27   : > { %302 = vst [vmem:[%s213_s14 + $0x58] sm:$0xff] %v301_v11  ;;  %v303_v12 = vld [vmem:[%s1112_s13 + $0x600] sm:$0xff] }
  0x28   : > { %v305_v13 = vld [vmem:[%s1112_s13 + $0x680] sm:$0xff]  ;;  %304 = vst [vmem:[%s213_s14 + $0x60] sm:$0xff] %v303_v12 }
  0x29   : > { %v307_v14 = vld [vmem:[%s1112_s13 + $0x700] sm:$0xff]  ;;  %306 = vst [vmem:[%s213_s14 + $0x68] sm:$0xff] %v305_v13 }
  0x2a   : > { %308 = vst [vmem:[%s213_s14 + $0x70] sm:$0xff] %v307_v14  ;;  %v309_v15 = vld [vmem:[%s1112_s13 + $0x780] sm:$0xff] }
  0x2b   : > { %310 = vst [vmem:[%s213_s14 + $0x78] sm:$0xff] %v309_v15 }
  0x2c PF: > { %p837_p9 = scmp.ge.s32.totalorder %s1019_s21, 1  ;;  %p331_p10 = scmp.lt.s32.totalorder %s1019_s21, 33 }
  0x2e   : > { %p332_p11 = pnand %p837_p9, %p331_p10 }
  0x2f   : > { %s338_s24 = sand.u32 (!%p332_p11), 1, %s995_s15   ;;  %v1021_v16 = vmov (!%p332_p11), 0   ;;  %v963_v33 = vld [vmem:[%s1200_s0] sm:$0xff] (!%p332_p11)   ;;  %v964_v34 = vld [vmem:[%s1200_s0 + $0x8] sm:$0xff] (!%p332_p11)   ;;  %s1160_s7 = sshll.u32 (!%p332_p11), %s1003_s17, 1  ;;  %v616_v35 = vlaneseq (!%p332_p11) }
  0x30   : > { %335 = sbr.rel (%p332_p11) target bundleno = 312 (0x138), region = 70  ;;  %s838_s25 = sshll.u32 (!%p332_p11), %s338_s24, 7  ;;  %566 = vmatprep.mubr.bf16.mxu0 (!%p332_p11), %v1021_v16  ;;  %576 = vmatprep.mubr.bf16.mxu1 (!%p332_p11), %v1021_v16 }
  0x31   : > { %s1135_s27 = scalar_lea.vmem (!%p332_p11), [#allocation3], %s838_s25  ;;  %p390_p12 = scmp.lt.s32.totalorder (!%p332_p11), %s1160_s7, 31  ;;  %v617_v36 = vshrl.u32 (!%p332_p11), %v616_v35, 7 }
  0x32   : > { %v939_v17 = vld [vmem:[%s1135_s27 + $0x4] ss:$8 sps:$4 sm:$0xff] (!%p332_p11)   ;;  %v941_v18 = vld [vmem:[%s1135_s27] ss:$8 sps:$4 sm:$0xff] (!%p332_p11)   ;;  %v942_v19 = vld [vmem:[%s1135_s27 + $0x14] ss:$8 sps:$4 sm:$0xff] (!%p332_p11)  }
  0x33   : > { %534 = vmatprep.subr.bf16.mxu0 (!%p332_p11), %v939_v17  ;;  %866 = vmatprep.subr.bf16.mxu1 (!%p332_p11), %v939_v17  ;;  %v944_v20 = vld [vmem:[%s1135_s27 + $0x10] ss:$8 sps:$4 sm:$0xff] (!%p332_p11)   ;;  %v945_v21 = vld [vmem:[%s1135_s27 + $0x24] ss:$8 sps:$4 sm:$0xff] (!%p332_p11)   ;;  %v947_v22 = vld [vmem:[%s1135_s27 + $0x20] ss:$8 sps:$4 sm:$0xff] (!%p332_p11)  }
  0x34   : > { %535 = vmatpush1.bf16.msra.mxu0 (!%p332_p11), %v941_v18  ;;  %874 = vmatpush1.bf16.msra.mxu1 (!%p332_p11), %v941_v18  ;;  %v948_v23 = vld [vmem:[%s1135_s27 + $0x34] ss:$8 sps:$4 sm:$0xff] (!%p332_p11)   ;;  %v950_v24 = vld [vmem:[%s1135_s27 + $0x30] ss:$8 sps:$4 sm:$0xff] (!%p332_p11)   ;;  %v951_v25 = vld [vmem:[%s1135_s27 + $0x44] ss:$8 sps:$4 sm:$0xff] (!%p332_p11)  }
  0x35   : > { %536 = vmatprep.subr.bf16.mxu0 (!%p332_p11), %v942_v19  ;;  %867 = vmatprep.subr.bf16.mxu1 (!%p332_p11), %v942_v19  ;;  %v953_v26 = vld [vmem:[%s1135_s27 + $0x40] ss:$8 sps:$4 sm:$0xff] (!%p332_p11)   ;;  %v954_v27 = vld [vmem:[%s1135_s27 + $0x54] ss:$8 sps:$4 sm:$0xff] (!%p332_p11)   ;;  %v956_v28 = vld [vmem:[%s1135_s27 + $0x50] ss:$8 sps:$4 sm:$0xff] (!%p332_p11)  }
  0x36   : > { %v957_v29 = vld [vmem:[%s1135_s27 + $0x64] ss:$8 sps:$4 sm:$0xff] (!%p332_p11)   ;;  %v959_v30 = vld [vmem:[%s1135_s27 + $0x60] ss:$8 sps:$4 sm:$0xff] (!%p332_p11)   ;;  %v960_v31 = vld [vmem:[%s1135_s27 + $0x74] ss:$8 sps:$4 sm:$0xff] (!%p332_p11)  }
  0x37   : > { %v962_v32 = vld [vmem:[%s1135_s27 + $0x70] ss:$8 sps:$4 sm:$0xff]   ;;  %s391_s8 = scalar_select %p390_p12, %s1160_s7, 31  ;;  %v618_v37 = vsub.s32 0, %v617_v36  ;;  %v622_v39 = vsub.s32 1, %v617_v36 }
  0x38   : > { %537 = vmatpush1.bf16.msra.mxu0 %v944_v20  ;;  %875 = vmatpush1.bf16.msra.mxu1 %v944_v20  ;;  %s839_s17 = sshll.u32 %s338_s24, 6  ;;  %s862_s24 = sshll.u32 (%p1095_p6), %s1007_s18, 7 }
  0x39   : > { %538 = vmatprep.subr.bf16.mxu0 %v945_v21  ;;  %868 = vmatprep.subr.bf16.mxu1 %v945_v21  ;;  %s392_s11 = scalar_lea.vmem %s1202_s2, %s391_s8  ;;  %s397_s14 = scalar_lea.vmem %s1203_s3, %s391_s8 }
  0x3a   : > { %v614_v38 = vld [vmem:[%s392_s11] sm:$0x3]  ;;  %s377_s15 = scalar_lea.vmem [#allocation4], %s839_s17  ;;  %s674_s25 = sadd.s32 (%p1095_p6), %s862_s24, %s1160_s7 }
  0x3b   : > { %v634_v40 = vld [vmem:[%s397_s14] sm:$0x3]  ;;  %v619_v41 = vrot.slane %v614_v38, %v618_v37  ;;  %v623_v42 = vrot.slane %v614_v38, %v622_v39  ;;  %s863_s27 = sshll.u32 (%p1095_p6), %s674_s25, 3 }
  0x3c   : > { %539 = vmatpush1.bf16.msra.mxu0 %v947_v22  ;;  %876 = vmatpush1.bf16.msra.mxu1 %v947_v22  ;;  %v639_v43 = vrot.slane %v634_v40, %v618_v37  ;;  %v643_v46 = vrot.slane %v634_v40, %v622_v39  ;;  %s676_s5 = scalar_lea.vmem (%p1095_p6), %s1204_s4, %s863_s27 }
  0x3d   : > { %540 = vmatprep.subr.bf16.mxu0 %v948_v23  ;;  %869 = vmatprep.subr.bf16.mxu1 %v948_v23 }
  0x40   : > { %541 = vmatpush1.bf16.msra.mxu0 %v950_v24  ;;  %877 = vmatpush1.bf16.msra.mxu1 %v950_v24 }
  0x41   : > { %542 = vmatprep.subr.bf16.mxu0 %v951_v25  ;;  %870 = vmatprep.subr.bf16.mxu1 %v951_v25 }
  0x44   : > { %543 = vmatpush1.bf16.msra.mxu0 %v953_v26  ;;  %878 = vmatpush1.bf16.msra.mxu1 %v953_v26 }
  0x45   : > { %544 = vmatprep.subr.bf16.mxu0 %v954_v27  ;;  %871 = vmatprep.subr.bf16.mxu1 %v954_v27 }
  0x48   : > { %545 = vmatpush1.bf16.msra.mxu0 %v956_v28  ;;  %879 = vmatpush1.bf16.msra.mxu1 %v956_v28 }
  0x49   : > { %546 = vmatprep.subr.bf16.mxu0 %v957_v29  ;;  %872 = vmatprep.subr.bf16.mxu1 %v957_v29 }
  0x4c   : > { %547 = vmatpush1.bf16.msra.mxu0 %v959_v30  ;;  %880 = vmatpush1.bf16.msra.mxu1 %v959_v30 }
  0x4d   : > { %548 = vmatprep.subr.bf16.mxu0 %v960_v31  ;;  %873 = vmatprep.subr.bf16.mxu1 %v960_v31 }
  0x50   : > { %549 = vmatpush1.bf16.msra.mxu0 %v962_v32  ;;  %881 = vmatpush1.bf16.msra.mxu1 %v962_v32 }
  0x53   : > { %567 = vmatmul.mubr.bf16.vlgmr.msra.gmra.mrb[0].mxu0 %v963_v33  ;;  %577 = vmatmul.mubr.bf16.vlgmr.msra.gmra.mrb[0].mxu1 %v964_v34 }
 0x126   : > { %v568_v44 = vpop.f32.mrb[0].mxu0  ;;  %v578_v45 = vpop.f32.mrb[0].mxu1 }
 0x127   : > { %v626_v47 = vmul.f32 %v619_v41, %v568_v44  ;;  %v630_v48 = vmul.f32 %v619_v41, %v578_v45  ;;  %v570_v49 = vpop.f32.mrb[1].mxu0  ;;  %v580_v50 = vpop.f32.mrb[1].mxu1 }
 0x128   : > { %v627_v51 = vmul.f32 %v623_v42, %v570_v49  ;;  %v631_v52 = vmul.f32 %v623_v42, %v580_v50  ;;  %v572_v53 = vpop.f32.mrb[2].mxu0  ;;  %v582_v54 = vpop.f32.mrb[2].mxu1  ;;  %668 = sbr.rel (!%p1095_p6) target bundleno = 312 (0x138), region = 86 }
 0x129   : > { %v646_v55 = vadd.f32 %v639_v43, %v626_v47  ;;  %v650_v56 = vadd.f32 %v639_v43, %v630_v48  ;;  %v628_v57 = vmul.f32 %v619_v41, %v572_v53  ;;  %v632_v58 = vmul.f32 %v619_v41, %v582_v54  ;;  %v574_v59 = vpop.f32.mrb[3].mxu0  ;;  %v584_v60 = vpop.f32.mrb[3].mxu1 }
 0x12a   : > { %v647_v61 = vadd.f32 %v643_v46, %v627_v51  ;;  %v651_v62 = vadd.f32 %v643_v46, %v631_v52  ;;  %v629_v63 = vmul.f32 %v623_v42, %v574_v59  ;;  %v633_v0 = vmul.f32 %v623_v42, %v584_v60 }
 0x12b   : > { %654 = vst [vmem:[%s377_s15] sm:$0xff] %v646_v55  ;;  %658 = vst [vmem:[%s377_s15 + $0x20] sm:$0xff] %v650_v56  ;;  %v648_v1 = vadd.f32 %v639_v43, %v628_v57  ;;  %v652_v2 = vadd.f32 %v639_v43, %v632_v58 }
 0x12c   : > { %655 = vst [vmem:[%s377_s15 + $0x8] sm:$0xff] %v647_v61  ;;  %659 = vst [vmem:[%s377_s15 + $0x28] sm:$0xff] %v651_v62  ;;  %v649_v3 = vadd.f32 %v643_v46, %v629_v63  ;;  %v653_v4 = vadd.f32 %v643_v46, %v633_v0 }
 0x12d   : > { %656 = vst [vmem:[%s377_s15 + $0x10] sm:$0xff] %v648_v1  ;;  %660 = vst [vmem:[%s377_s15 + $0x30] sm:$0xff] %v652_v2 }
 0x12e   : > { %657 = vst [vmem:[%s377_s15 + $0x18] sm:$0xff] %v649_v3  ;;  %661 = vst [vmem:[%s377_s15 + $0x38] sm:$0xff] %v653_v4 }
 0x132   : > { %v689_v5 = vld [vmem:[%s377_s15] sm:$0xff] }
 0x133   : > { %v691_v6 = vld [vmem:[%s377_s15 + $0x8] sm:$0xff]  ;;  %v697_v9 = vld [vmem:[%s377_s15 + $0x20] sm:$0xff]  ;;  %690 = vst [vmem:[%s676_s5] sm:$0xff] %v689_v5 }
 0x134   : > { %v693_v7 = vld [vmem:[%s377_s15 + $0x10] sm:$0xff]  ;;  %v699_v10 = vld [vmem:[%s377_s15 + $0x28] sm:$0xff]  ;;  %692 = vst [vmem:[%s676_s5 + $0x8] sm:$0xff] %v691_v6  ;;  %698 = vst [vmem:[%s676_s5 + $0x200] sm:$0xff] %v697_v9 }
 0x135   : > { %v695_v8 = vld [vmem:[%s377_s15 + $0x18] sm:$0xff]  ;;  %v701_v11 = vld [vmem:[%s377_s15 + $0x30] sm:$0xff]  ;;  %694 = vst [vmem:[%s676_s5 + $0x100] sm:$0xff] %v693_v7  ;;  %700 = vst [vmem:[%s676_s5 + $0x208] sm:$0xff] %v699_v10 }
 0x136   : > { %v703_v12 = vld [vmem:[%s377_s15 + $0x38] sm:$0xff]  ;;  %696 = vst [vmem:[%s676_s5 + $0x108] sm:$0xff] %v695_v8  ;;  %702 = vst [vmem:[%s676_s5 + $0x300] sm:$0xff] %v701_v11 }
 0x137   : > { %704 = vst [vmem:[%s676_s5 + $0x308] sm:$0xff] %v703_v12 }
 0x138 PF: > { %s14_s21 = sadd.s32 1, %s1019_s21   ;;  %s1206_s15 = smov %s999_s16 }
 0x139   : > { %p11_p13 = scmp.ge.s32.totalorder %s14_s21, 34   ;;  %s1207_s16 = smov %s1103_s30 }
 0x13a   : > { %s1208_s17 = smov %s1011_s19  ;;  %s1209_s18 = smov %s1015_s20 }
 0x13b   : > { %s1210_s19 = smov %s1213_s22  ;;  %s1211_s20 = smov %s1217_s23 }
 0x13c   :  { %13 = sbr.rel (!%p11_p13) target bundleno = 4 (0x4), region = 149 }

</bundles_post_ra>
